<compile_context>
chip_gen: v5e
topology: v5e:2x2
jax: 0.10.0
libtpu: 0.0.40
codegen_flags: <defaults>
</compile_context>

<pallas_src>
import functools

import jax
import jax.numpy as jnp
from jax import lax
from jax.experimental import pallas as pl
from jax.experimental.pallas import tpu as pltpu


def _vmem_limit_bytes():
    """Generation-aware VMEM budget: ~80% of physical, capped at 100 MiB.

    v5e/v6e (128 MiB physical) -> ~100 MiB; v7x (64 MiB physical) -> ~51 MiB.
    """
    try:
        cap = pltpu.get_tpu_info().vmem_capacity_bytes
    except Exception:
        cap = 64 * 1024 * 1024  # conservative (v7x-sized) fallback
    return min(int(cap * 0.8), 100 * 1024 * 1024)


# ------------------------- Phase 1: GRU recurrence kernel -------------------------

def _gru_recurrence_kernel(tok_ref,     # scalar prefetch, SMEM (T_pad,) int32
                           emb_ref,     # (V, 1, D)   embedding table (VMEM resident)
                           h0_ref,      # (1, D)      initial hidden state
                           wg_ref,      # (2D, 4D)    fused gate weights (see prepare_params)
                           bg_ref,      # (1, 4D)     fused gate biases, f32
                           h_all_ref):  # out (T_pad, 1, D)  hidden state after each step
    D = h0_ref.shape[1]
    T = h_all_ref.shape[0]
    bg = bg_ref[...]                    # small, hoisted out of the loop
    w_dtype = wg_ref.dtype

    def step(t, h):
        tok_t = tok_ref[t]                              # SMEM scalar read
        x = emb_ref[tok_t].astype(jnp.float32)          # (1, D) embedding row gather
        xh = jnp.concatenate([x, h], axis=1)            # (1, 2D), lane-axis concat
        # One MXU push gives [r_pre | z_pre | n_i | n_h]; weights fed in their stored
        # dtype (no in-kernel f32 up-cast of the weight tile), f32 accumulation.
        g = jnp.dot(xh.astype(w_dtype), wg_ref[...],
                    preferred_element_type=jnp.float32) + bg        # (1, 4D)
        r = jax.nn.sigmoid(g[:, 0:D])
        z = jax.nn.sigmoid(g[:, D:2 * D])
        n = jnp.tanh(g[:, 2 * D:3 * D] + r * g[:, 3 * D:4 * D])
        h1 = (1.0 - z) * n + z * h
        h_all_ref[t] = h1.astype(h_all_ref.dtype)       # leading-axis store
        return h1

    lax.fori_loop(0, T, step, h0_ref[...].astype(jnp.float32), unroll=T <= 16)


def _run_gru(tokens_pad, h0, prepped):
    emb = prepped["embedding"]          # (V, 1, D)
    wg = prepped["w_gates"]             # (2D, 4D)
    bg = prepped["b_gates"]             # (1, 4D)
    V, _, D = emb.shape
    T_pad = tokens_pad.shape[0]

    grid_spec = pltpu.PrefetchScalarGridSpec(
        num_scalar_prefetch=1,
        grid=(1,),                      # single invocation: recurrence runs in-kernel
        in_specs=[
            # NOTE: for very large vocabularies the (V,1,D) table would not fit VMEM;
            # gather rows outside the kernel (or DMA-gather) in that regime.
            pl.BlockSpec((V, 1, D), lambda i, tok: (0, 0, 0)),
            pl.BlockSpec((1, D), lambda i, tok: (0, 0)),
            pl.BlockSpec((2 * D, 4 * D), lambda i, tok: (0, 0)),
            pl.BlockSpec((1, 4 * D), lambda i, tok: (0, 0)),
        ],
        out_specs=pl.BlockSpec((T_pad, 1, D), lambda i, tok: (0, 0, 0)),
    )
    h_all = pl.pallas_call(
        _gru_recurrence_kernel,
        grid_spec=grid_spec,
        out_shape=jax.ShapeDtypeStruct((T_pad, 1, D), jnp.float32),
        compiler_params=pltpu.CompilerParams(
            dimension_semantics=("arbitrary",),
            vmem_limit_bytes=_vmem_limit_bytes(),
        ),
    )(tokens_pad, emb, h0, wg, bg)
    return h_all.reshape(T_pad, D)


# ---------------- Phase 2a: projection + in-kernel log-softmax (W_out resident) ----------------

def _proj_logsoftmax_kernel(h_ref,      # (t_tile, D)
                            wout_ref,   # (D, V)   full, VMEM-resident
                            bout_ref,   # (1, V)
                            logp_ref):  # out (t_tile, V)  log-softmax rows
    y = jnp.dot(h_ref[...].astype(wout_ref.dtype), wout_ref[...],
                preferred_element_type=jnp.float32) + bout_ref[...]
    m = jnp.max(y, axis=1, keepdims=True)
    lse = m + jnp.log(jnp.sum(jnp.exp(y - m), axis=1, keepdims=True))
    logp_ref[...] = (y - lse).astype(logp_ref.dtype)


def _run_projection_full(h_all, prepped, t_tile):
    wout = prepped["w_out"]             # (D, V)
    bout = prepped["b_out"]             # (1, V)
    D, V = wout.shape
    T_pad = h_all.shape[0]
    n_t = T_pad // t_tile

    grid_spec = pltpu.PrefetchScalarGridSpec(
        num_scalar_prefetch=0,
        grid=(n_t,),
        in_specs=[
            pl.BlockSpec((t_tile, D), lambda i: (i, 0)),
            # Constant index_maps -> W_out / b_out DMA'd from HBM once, VMEM-resident.
            # TODO(synk): for very large D*V on v7x (64 MiB VMEM) add
            # pipeline_mode=pl.Buffered(1) to these grid-invariant specs to single-buffer
            # them, and/or store them bf16 via prepare_params(weights_dtype=jnp.bfloat16).
            pl.BlockSpec((D, V), lambda i: (0, 0)),
            pl.BlockSpec((1, V), lambda i: (0, 0)),
        ],
        out_specs=pl.BlockSpec((t_tile, V), lambda i: (i, 0)),
    )
    return pl.pallas_call(
        _proj_logsoftmax_kernel,
        grid_spec=grid_spec,
        out_shape=jax.ShapeDtypeStruct((T_pad, V), jnp.float32),
        compiler_params=pltpu.CompilerParams(
            dimension_semantics=("parallel",),   # rows independent -> v7x 2-TC sharding
            vmem_limit_bytes=_vmem_limit_bytes(),
        ),
    )(h_all, wout, bout)


# ---------------- Phase 2b: vocab-tiled streaming projection (for huge V) ----------------

def _proj_tiled_kernel(h_ref,       # (t_tile, D)
                       wout_ref,    # (D, v_tile)  streamed tile of W_out
                       bout_ref,    # (1, v_tile)
                       logits_ref,  # out (t_tile, v_tile) unnormalized logits
                       lse_ref,     # out (t_tile, 1)      per-row log-sum-exp
                       m_sc, s_sc): # scratch (t_tile, 1) f32 running max / sum-exp
    kv = pl.program_id(1)
    n_kv = pl.num_programs(1)

    @pl.when(kv == 0)
    def _():
        m_sc[...] = jnp.full_like(m_sc, -1e30)   # finite init (avoids -inf - -inf NaN edge)
        s_sc[...] = jnp.zeros_like(s_sc)

    y = jnp.dot(h_ref[...].astype(wout_ref.dtype), wout_ref[...],
                preferred_element_type=jnp.float32) + bout_ref[...]
    logits_ref[...] = y.astype(logits_ref.dtype)

    m_prev = m_sc[...]
    m_new = jnp.maximum(m_prev, jnp.max(y, axis=1, keepdims=True))
    s_sc[...] = s_sc[...] * jnp.exp(m_prev - m_new) + \
        jnp.sum(jnp.exp(y - m_new), axis=1, keepdims=True)
    m_sc[...] = m_new

    @pl.when(kv == n_kv - 1)
    def _():
        lse_ref[...] = (m_sc[...] + jnp.log(s_sc[...])).astype(lse_ref.dtype)


def _run_projection_tiled(h_all, prepped, t_tile, v_tile):
    wout = prepped["w_out"]
    bout = prepped["b_out"]
    D, V = wout.shape
    T_pad = h_all.shape[0]
    n_t = T_pad // t_tile
    n_kv = V // v_tile

    grid_spec = pltpu.PrefetchScalarGridSpec(
        num_scalar_prefetch=0,
        grid=(n_t, n_kv),               # kv innermost; scratch/lse carried across kv only
        in_specs=[
            pl.BlockSpec((t_tile, D), lambda ti, kv: (ti, 0)),
            pl.BlockSpec((D, v_tile), lambda ti, kv: (0, kv)),
            pl.BlockSpec((1, v_tile), lambda ti, kv: (0, kv)),
        ],
        out_specs=[
            pl.BlockSpec((t_tile, v_tile), lambda ti, kv: (ti, kv)),
            pl.BlockSpec((t_tile, 1), lambda ti, kv: (ti, 0)),
        ],
        scratch_shapes=[
            pltpu.VMEM((t_tile, 1), jnp.float32),
            pltpu.VMEM((t_tile, 1), jnp.float32),
        ],
    )
    logits, lse = pl.pallas_call(
        _proj_tiled_kernel,
        grid_spec=grid_spec,
        out_shape=(jax.ShapeDtypeStruct((T_pad, V), jnp.float32),
                   jax.ShapeDtypeStruct((T_pad, 1), jnp.float32)),
        compiler_params=pltpu.CompilerParams(
            # kv axis MUST stay "arbitrary": the online-LSE scratch and the lse output
            # block are carried across it.  The ti axis is safely parallel (state is
            # re-initialized at kv == 0 for every ti).
            dimension_semantics=("parallel", "arbitrary"),
            vmem_limit_bytes=_vmem_limit_bytes(),
        ),
    )(h_all, wout, bout)
    # TODO(synk): fold this normalization in-kernel for the streamed-vocab path too (needs a
    # full-row resident output block with lane-aligned dynamic tile stores).
    return logits - lse


# ------------------------------- parameter preparation -------------------------------

def prepare_params(params, weights_dtype=jnp.float32):
    """One-time weight prep, hoisted out of the decode path.

    Gate weights are laid out as (2D, 4D) columns [Wir^T;Whr^T | Wiz^T;Whz^T | Win^T;0 | 0;Whn^T]
    with biases merged for the r/z gates, so one (1,2D)@(2D,4D) MXU push yields all gate
    pre-activations.  weights_dtype=jnp.bfloat16 halves HBM traffic / VMEM residency
    (kernels accumulate in f32); the default f32 keeps exact parity with the PyTorch module.
    """
    D = params["gru_w_ih"].shape[1]
    V = params["lin_w"].shape[0]
    wih_t = params["gru_w_ih"].T        # (D, 3D) columns [r | z | n]
    whh_t = params["gru_w_hh"].T        # (D, 3D)
    zeros = jnp.zeros((D, D), wih_t.dtype)
    top = jnp.concatenate([wih_t[:, :D], wih_t[:, D:2 * D], wih_t[:, 2 * D:], zeros], axis=1)
    bot = jnp.concatenate([whh_t[:, :D], whh_t[:, D:2 * D], zeros, whh_t[:, 2 * D:]], axis=1)
    w_gates = jnp.concatenate([top, bot], axis=0)                       # (2D, 4D)
    bih, bhh = params["gru_b_ih"], params["gru_b_hh"]
    b_gates = jnp.concatenate(
        [bih[:D] + bhh[:D], bih[D:2 * D] + bhh[D:2 * D], bih[2 * D:], bhh[2 * D:]]
    ).reshape(1, 4 * D)
    return {
        "embedding": params["embedding"].astype(weights_dtype).reshape(V, 1, D),
        "w_gates": w_gates.astype(weights_dtype),
        "b_gates": b_gates.astype(jnp.float32),
        "w_out": params["lin_w"].T.astype(weights_dtype),               # (D, V)
        "b_out": params["lin_b"].reshape(1, V).astype(jnp.float32),
    }


# ----------------------------------- public wrappers -----------------------------------

@functools.partial(jax.jit, static_argnames=("v_tile", "t_tile"))
def simple_decoder_decode(tokens, h0, prepped, *, v_tile=None, t_tile=8):
    """Run T teacher-forced decode steps.

    tokens: (T,) int32 ids.  h0: (1, D) f32.  Returns (logp (T, V), h_all (T, D)).
    v_tile=None (or ==V) keeps W_out fully VMEM-resident (recommended whenever it fits);
    otherwise the vocab is streamed in v_tile-wide slabs (multiple of 128).
    """
    V = prepped["embedding"].shape[0]
    T = tokens.shape[0]
    tokens = tokens.astype(jnp.int32)

    if T <= t_tile:
        t_eff, T_pad = T, T
    else:
        assert t_tile % 8 == 0, "t_tile must be a multiple of 8"
        t_eff = t_tile
        T_pad = pl.cdiv(T, t_tile) * t_tile
    if T_pad > T:
        tokens = jnp.concatenate([tokens, jnp.zeros((T_pad - T,), jnp.int32)])

    h_all = _run_gru(tokens, h0, prepped)               # (T_pad, D)

    if v_tile is None or v_tile == V:
        logp = _run_projection_full(h_all, prepped, t_eff)
    else:
        assert V % v_tile == 0 and v_tile % 128 == 0, "v_tile must divide V and be lane-aligned"
        logp = _run_projection_tiled(h_all, prepped, t_eff, v_tile)

    return logp[:T], h_all[:T]


def simple_decoder_forward(token, h0, prepped):
    """Single-step API matching SimpleDecoder.forward(x1, h0) -> (log_softmax(y), h1)."""
    tokens = jnp.asarray(token, jnp.int32).reshape((1,))
    logp, h_all = simple_decoder_decode(tokens, h0, prepped)
    return logp, h_all[0:1]


# ----------------------------- pure-JAX reference -----------------------------

def _reference_step(token, h0, params):
    x = params["embedding"][token].reshape(1, -1)
    gi = x @ params["gru_w_ih"].T + params["gru_b_ih"]
    gh = h0 @ params["gru_w_hh"].T + params["gru_b_hh"]
    D = h0.shape[1]
    r = jax.nn.sigmoid(gi[:, :D] + gh[:, :D])
    z = jax.nn.sigmoid(gi[:, D:2 * D] + gh[:, D:2 * D])
    n = jnp.tanh(gi[:, 2 * D:] + r * gh[:, 2 * D:])
    h1 = (1.0 - z) * n + z * h0
    y = h1 @ params["lin_w"].T + params["lin_b"]
    return jax.nn.log_softmax(y, axis=1), h1


def _reference_decode(token_list, h0, params):
    logps, hs = [], []
    h = h0
    for tkn in token_list:
        lp, h = _reference_step(int(tkn), h, params)
        logps.append(lp)
        hs.append(h)
    return jnp.concatenate(logps, axis=0), jnp.concatenate(hs, axis=0)


def init_params(key, input_size, vocab_size):
    """Deterministic init matching the module's parameter shapes (PyTorch-style ranges)."""
    D, V = input_size, vocab_size
    ks = jax.random.split(key, 7)
    k = 1.0 / jnp.sqrt(D)
    return {
        "embedding": jax.random.normal(ks[0], (V, D), jnp.float32),
        "gru_w_ih": jax.random.uniform(ks[1], (3 * D, D), jnp.float32, -k, k),
        "gru_w_hh": jax.random.uniform(ks[2], (3 * D, D), jnp.float32, -k, k),
        "gru_b_ih": jax.random.uniform(ks[3], (3 * D,), jnp.float32, -k, k),
        "gru_b_hh": jax.random.uniform(ks[4], (3 * D,), jnp.float32, -k, k),
        "lin_w": jax.random.uniform(ks[5], (V, D), jnp.float32, -k, k),
        "lin_b": jax.random.uniform(ks[6], (V,), jnp.float32, -k, k),
    }


if __name__ == "__main__":
    INPUT_SIZE = 128   # hidden / embedding dim (multiple of 128 -> lane-aligned gate slices)
    VOCAB_SIZE = 256   # small synthetic vocab (multiple of 128 -> lane-dense output)

    key = jax.random.PRNGKey(0)
    pkey, hkey = jax.random.split(key)
    params = init_params(pkey, INPUT_SIZE, VOCAB_SIZE)
    prepped = prepare_params(params)     # one-time weight prep (f32 for exact parity)

    token_list = [5, 3, 8, 2, 1]         # like y[0] in the original script
    tokens = jnp.array(token_list, jnp.int32)
    h0 = jax.random.normal(hkey, (1, INPUT_SIZE), jnp.float32)

    # (a) recommended path: W_out fully VMEM-resident, log-softmax normalized in-kernel
    logp_a, h_a = simple_decoder_decode(tokens, h0, prepped)
    # (b) vocab-tiled streaming path (only needed when W_out exceeds the VMEM budget)
    logp_b, h_b = simple_decoder_decode(tokens, h0, prepped, v_tile=VOCAB_SIZE // 2)
    jax.block_until_ready((logp_a, h_a, logp_b, h_b))

    ref_logp, ref_h = _reference_decode(token_list, h0, params)
    assert logp_a.shape == (len(token_list), VOCAB_SIZE)
    assert h_a.shape == (len(token_list), INPUT_SIZE)
    assert jnp.allclose(logp_a, ref_logp, atol=2e-3, rtol=2e-3)
    assert jnp.allclose(h_a, ref_h, atol=2e-3, rtol=2e-3)
    assert jnp.allclose(logp_b, ref_logp, atol=2e-3, rtol=2e-3)
    assert jnp.allclose(h_b, ref_h, atol=2e-3, rtol=2e-3)

    # single-step path == SimpleDecoder.forward(x1, h0)
    logp1, h1 = simple_decoder_forward(token_list[0], h0, prepped)
    ref_logp1, ref_h1 = _reference_step(token_list[0], h0, params)
    assert jnp.allclose(logp1, ref_logp1, atol=2e-3, rtol=2e-3)
    assert jnp.allclose(h1, ref_h1, atol=2e-3, rtol=2e-3)

    print("KERNEL_OK")
</pallas_src>

<mosaic_0001>
module attributes {stable_mosaic.version = 11 : i64} {
  func.func @_gru_recurrence_kernel(%arg0: i32, %arg1: memref<5xi32, #tpu.memory_space<smem>>, %arg2: memref<256x1x128xf32, #tpu.memory_space<vmem>>, %arg3: memref<1x128xf32, #tpu.memory_space<vmem>>, %arg4: memref<256x512xf32, #tpu.memory_space<vmem>>, %arg5: memref<1x512xf32, #tpu.memory_space<vmem>>, %arg6: memref<5x1x128xf32, #tpu.memory_space<vmem>>) attributes {dimension_semantics = [#tpu.dimension_semantics<arbitrary>], iteration_bounds = array<i64: 1>, scalar_prefetch = 1 : i64, scratch_operands = 0 : i64, tpu.core_type = #tpu.core_type<tc>, window_params = [{pipeline_mode = #tpu.pipeline_mode<synchronous>, transform_indices = @transform_0, window_bounds = array<i64: 256, 1, 128>}, {pipeline_mode = #tpu.pipeline_mode<synchronous>, transform_indices = @transform_1, window_bounds = array<i64: 1, 128>}, {pipeline_mode = #tpu.pipeline_mode<synchronous>, transform_indices = @transform_2, window_bounds = array<i64: 256, 512>}, {pipeline_mode = #tpu.pipeline_mode<synchronous>, transform_indices = @transform_3, window_bounds = array<i64: 1, 512>}, {pipeline_mode = #tpu.pipeline_mode<synchronous>, transform_indices = @transform_4, window_bounds = array<i64: 5, 1, 128>}]} {
    %c0 = arith.constant 0 : index
    %c0_0 = arith.constant 0 : index
    %0 = vector.load %arg5[%c0, %c0_0] : memref<1x512xf32, #tpu.memory_space<vmem>>, vector<1x512xf32>
    %c0_1 = arith.constant 0 : index
    %c0_2 = arith.constant 0 : index
    %1 = vector.load %arg3[%c0_1, %c0_2] : memref<1x128xf32, #tpu.memory_space<vmem>>, vector<1x128xf32>
    %c0_i32 = arith.constant 0 : i32
    %2 = arith.index_cast %c0_i32 : i32 to index
    %3 = memref.load %arg1[%2] : memref<5xi32, #tpu.memory_space<smem>>
    %4 = arith.index_cast %3 : i32 to index
    %c0_3 = arith.constant 0 : index
    %c0_4 = arith.constant 0 : index
    %5 = vector.load %arg2[%4, %c0_3, %c0_4] : memref<256x1x128xf32, #tpu.memory_space<vmem>>, vector<1x1x128xf32>
    %6 = vector.shape_cast %5 : vector<1x1x128xf32> to vector<1x128xf32>
    %7 = tpu.concatenate %6, %1 in 1 : vector<1x128xf32>, vector<1x128xf32> -> vector<1x256xf32>
    %c0_5 = arith.constant 0 : index
    %c0_6 = arith.constant 0 : index
    %8 = vector.load %arg4[%c0_5, %c0_6] : memref<256x512xf32, #tpu.memory_space<vmem>>, vector<256x512xf32>
    %cst = arith.constant dense<0.000000e+00> : vector<1x512xf32>
    %9 = tpu.matmul %7, %8, %cst {dimension_numbers = #tpu.dot_dimension_numbers<[1], [0], [0], [1], [0, 0, 1, 1], [], []>} : vector<1x256xf32>, vector<256x512xf32>, vector<1x512xf32> -> vector<1x512xf32>
    %10 = arith.addf %9, %0 : vector<1x512xf32>
    %11 = vector.extract_strided_slice %10 {offsets = [0, 0], sizes = [1, 128], strides = [1, 1]} : vector<1x512xf32> to vector<1x128xf32>
    %12 = arith.negf %11 : vector<1x128xf32>
    %13 = math.exp %12 : vector<1x128xf32>
    %cst_7 = arith.constant 1.000000e+00 : f32
    %14 = vector.broadcast %cst_7 : f32 to vector<1x128xf32>
    %15 = arith.addf %14, %13 : vector<1x128xf32>
    %16 = arith.divf %14, %15 : vector<1x128xf32>
    %17 = vector.extract_strided_slice %10 {offsets = [0, 128], sizes = [1, 128], strides = [1, 1]} : vector<1x512xf32> to vector<1x128xf32>
    %18 = arith.negf %17 : vector<1x128xf32>
    %19 = math.exp %18 : vector<1x128xf32>
    %cst_8 = arith.constant 1.000000e+00 : f32
    %20 = vector.broadcast %cst_8 : f32 to vector<1x128xf32>
    %21 = arith.addf %20, %19 : vector<1x128xf32>
    %22 = arith.divf %20, %21 : vector<1x128xf32>
    %23 = vector.extract_strided_slice %10 {offsets = [0, 256], sizes = [1, 128], strides = [1, 1]} : vector<1x512xf32> to vector<1x128xf32>
    %24 = vector.extract_strided_slice %10 {offsets = [0, 384], sizes = [1, 128], strides = [1, 1]} : vector<1x512xf32> to vector<1x128xf32>
    %25 = arith.mulf %16, %24 : vector<1x128xf32>
    %26 = arith.addf %23, %25 : vector<1x128xf32>
    %27 = math.tanh %26 : vector<1x128xf32>
    %cst_9 = arith.constant 1.000000e+00 : f32
    %28 = vector.broadcast %cst_9 : f32 to vector<1x128xf32>
    %29 = arith.subf %28, %22 : vector<1x128xf32>
    %30 = arith.mulf %29, %27 : vector<1x128xf32>
    %31 = arith.mulf %22, %1 : vector<1x128xf32>
    %32 = arith.addf %30, %31 : vector<1x128xf32>
    %33 = arith.index_cast %c0_i32 : i32 to index
    %c0_10 = arith.constant 0 : index
    %c0_11 = arith.constant 0 : index
    %34 = vector.load %arg6[%33, %c0_10, %c0_11] : memref<5x1x128xf32, #tpu.memory_space<vmem>>, vector<1x1x128xf32>
    %35 = vector.shape_cast %34 : vector<1x1x128xf32> to vector<1x128xf32>
    %36 = vector.shape_cast %32 : vector<1x128xf32> to vector<1x1x128xf32>
    tpu.vector_store %arg6[%33, %c0_10, %c0_11], %36 {strides = array<i32>} : memref<5x1x128xf32, #tpu.memory_space<vmem>>, vector<1x1x128xf32>,
    %c1_i32 = arith.constant 1 : i32
    %37 = arith.index_cast %c1_i32 : i32 to index
    %38 = memref.load %arg1[%37] : memref<5xi32, #tpu.memory_space<smem>>
    %39 = arith.index_cast %38 : i32 to index
    %c0_12 = arith.constant 0 : index
    %c0_13 = arith.constant 0 : index
    %40 = vector.load %arg2[%39, %c0_12, %c0_13] : memref<256x1x128xf32, #tpu.memory_space<vmem>>, vector<1x1x128xf32>
    %41 = vector.shape_cast %40 : vector<1x1x128xf32> to vector<1x128xf32>
    %42 = tpu.concatenate %41, %32 in 1 : vector<1x128xf32>, vector<1x128xf32> -> vector<1x256xf32>
    %c0_14 = arith.constant 0 : index
    %c0_15 = arith.constant 0 : index
    %43 = vector.load %arg4[%c0_14, %c0_15] : memref<256x512xf32, #tpu.memory_space<vmem>>, vector<256x512xf32>
    %cst_16 = arith.constant dense<0.000000e+00> : vector<1x512xf32>
    %44 = tpu.matmul %42, %43, %cst_16 {dimension_numbers = #tpu.dot_dimension_numbers<[1], [0], [0], [1], [0, 0, 1, 1], [], []>} : vector<1x256xf32>, vector<256x512xf32>, vector<1x512xf32> -> vector<1x512xf32>
    %45 = arith.addf %44, %0 : vector<1x512xf32>
    %46 = vector.extract_strided_slice %45 {offsets = [0, 0], sizes = [1, 128], strides = [1, 1]} : vector<1x512xf32> to vector<1x128xf32>
    %47 = arith.negf %46 : vector<1x128xf32>
    %48 = math.exp %47 : vector<1x128xf32>
    %cst_17 = arith.constant 1.000000e+00 : f32
    %49 = vector.broadcast %cst_17 : f32 to vector<1x128xf32>
    %50 = arith.addf %49, %48 : vector<1x128xf32>
    %51 = arith.divf %49, %50 : vector<1x128xf32>
    %52 = vector.extract_strided_slice %45 {offsets = [0, 128], sizes = [1, 128], strides = [1, 1]} : vector<1x512xf32> to vector<1x128xf32>
    %53 = arith.negf %52 : vector<1x128xf32>
    %54 = math.exp %53 : vector<1x128xf32>
    %cst_18 = arith.constant 1.000000e+00 : f32
    %55 = vector.broadcast %cst_18 : f32 to vector<1x128xf32>
    %56 = arith.addf %55, %54 : vector<1x128xf32>
    %57 = arith.divf %55, %56 : vector<1x128xf32>
    %58 = vector.extract_strided_slice %45 {offsets = [0, 256], sizes = [1, 128], strides = [1, 1]} : vector<1x512xf32> to vector<1x128xf32>
    %59 = vector.extract_strided_slice %45 {offsets = [0, 384], sizes = [1, 128], strides = [1, 1]} : vector<1x512xf32> to vector<1x128xf32>
    %60 = arith.mulf %51, %59 : vector<1x128xf32>
    %61 = arith.addf %58, %60 : vector<1x128xf32>
    %62 = math.tanh %61 : vector<1x128xf32>
    %cst_19 = arith.constant 1.000000e+00 : f32
    %63 = vector.broadcast %cst_19 : f32 to vector<1x128xf32>
    %64 = arith.subf %63, %57 : vector<1x128xf32>
    %65 = arith.mulf %64, %62 : vector<1x128xf32>
    %66 = arith.mulf %57, %32 : vector<1x128xf32>
    %67 = arith.addf %65, %66 : vector<1x128xf32>
    %68 = arith.index_cast %c1_i32 : i32 to index
    %c0_20 = arith.constant 0 : index
    %c0_21 = arith.constant 0 : index
    %69 = vector.load %arg6[%68, %c0_20, %c0_21] : memref<5x1x128xf32, #tpu.memory_space<vmem>>, vector<1x1x128xf32>
    %70 = vector.shape_cast %69 : vector<1x1x128xf32> to vector<1x128xf32>
    %71 = vector.shape_cast %67 : vector<1x128xf32> to vector<1x1x128xf32>
    tpu.vector_store %arg6[%68, %c0_20, %c0_21], %71 {strides = array<i32>} : memref<5x1x128xf32, #tpu.memory_space<vmem>>, vector<1x1x128xf32>,
    %c2_i32 = arith.constant 2 : i32
    %72 = arith.index_cast %c2_i32 : i32 to index
    %73 = memref.load %arg1[%72] : memref<5xi32, #tpu.memory_space<smem>>
    %74 = arith.index_cast %73 : i32 to index
    %c0_22 = arith.constant 0 : index
    %c0_23 = arith.constant 0 : index
    %75 = vector.load %arg2[%74, %c0_22, %c0_23] : memref<256x1x128xf32, #tpu.memory_space<vmem>>, vector<1x1x128xf32>
    %76 = vector.shape_cast %75 : vector<1x1x128xf32> to vector<1x128xf32>
    %77 = tpu.concatenate %76, %67 in 1 : vector<1x128xf32>, vector<1x128xf32> -> vector<1x256xf32>
    %c0_24 = arith.constant 0 : index
    %c0_25 = arith.constant 0 : index
    %78 = vector.load %arg4[%c0_24, %c0_25] : memref<256x512xf32, #tpu.memory_space<vmem>>, vector<256x512xf32>
    %cst_26 = arith.constant dense<0.000000e+00> : vector<1x512xf32>
    %79 = tpu.matmul %77, %78, %cst_26 {dimension_numbers = #tpu.dot_dimension_numbers<[1], [0], [0], [1], [0, 0, 1, 1], [], []>} : vector<1x256xf32>, vector<256x512xf32>, vector<1x512xf32> -> vector<1x512xf32>
    %80 = arith.addf %79, %0 : vector<1x512xf32>
    %81 = vector.extract_strided_slice %80 {offsets = [0, 0], sizes = [1, 128], strides = [1, 1]} : vector<1x512xf32> to vector<1x128xf32>
    %82 = arith.negf %81 : vector<1x128xf32>
    %83 = math.exp %82 : vector<1x128xf32>
    %cst_27 = arith.constant 1.000000e+00 : f32
    %84 = vector.broadcast %cst_27 : f32 to vector<1x128xf32>
    %85 = arith.addf %84, %83 : vector<1x128xf32>
    %86 = arith.divf %84, %85 : vector<1x128xf32>
    %87 = vector.extract_strided_slice %80 {offsets = [0, 128], sizes = [1, 128], strides = [1, 1]} : vector<1x512xf32> to vector<1x128xf32>
    %88 = arith.negf %87 : vector<1x128xf32>
    %89 = math.exp %88 : vector<1x128xf32>
    %cst_28 = arith.constant 1.000000e+00 : f32
    %90 = vector.broadcast %cst_28 : f32 to vector<1x128xf32>
    %91 = arith.addf %90, %89 : vector<1x128xf32>
    %92 = arith.divf %90, %91 : vector<1x128xf32>
    %93 = vector.extract_strided_slice %80 {offsets = [0, 256], sizes = [1, 128], strides = [1, 1]} : vector<1x512xf32> to vector<1x128xf32>
    %94 = vector.extract_strided_slice %80 {offsets = [0, 384], sizes = [1, 128], strides = [1, 1]} : vector<1x512xf32> to vector<1x128xf32>
    %95 = arith.mulf %86, %94 : vector<1x128xf32>
    %96 = arith.addf %93, %95 : vector<1x128xf32>
    %97 = math.tanh %96 : vector<1x128xf32>
    %cst_29 = arith.constant 1.000000e+00 : f32
    %98 = vector.broadcast %cst_29 : f32 to vector<1x128xf32>
    %99 = arith.subf %98, %92 : vector<1x128xf32>
    %100 = arith.mulf %99, %97 : vector<1x128xf32>
    %101 = arith.mulf %92, %67 : vector<1x128xf32>
    %102 = arith.addf %100, %101 : vector<1x128xf32>
    %103 = arith.index_cast %c2_i32 : i32 to index
    %c0_30 = arith.constant 0 : index
    %c0_31 = arith.constant 0 : index
    %104 = vector.load %arg6[%103, %c0_30, %c0_31] : memref<5x1x128xf32, #tpu.memory_space<vmem>>, vector<1x1x128xf32>
    %105 = vector.shape_cast %104 : vector<1x1x128xf32> to vector<1x128xf32>
    %106 = vector.shape_cast %102 : vector<1x128xf32> to vector<1x1x128xf32>
    tpu.vector_store %arg6[%103, %c0_30, %c0_31], %106 {strides = array<i32>} : memref<5x1x128xf32, #tpu.memory_space<vmem>>, vector<1x1x128xf32>,
    %c3_i32 = arith.constant 3 : i32
    %107 = arith.index_cast %c3_i32 : i32 to index
    %108 = memref.load %arg1[%107] : memref<5xi32, #tpu.memory_space<smem>>
    %109 = arith.index_cast %108 : i32 to index
    %c0_32 = arith.constant 0 : index
    %c0_33 = arith.constant 0 : index
    %110 = vector.load %arg2[%109, %c0_32, %c0_33] : memref<256x1x128xf32, #tpu.memory_space<vmem>>, vector<1x1x128xf32>
    %111 = vector.shape_cast %110 : vector<1x1x128xf32> to vector<1x128xf32>
    %112 = tpu.concatenate %111, %102 in 1 : vector<1x128xf32>, vector<1x128xf32> -> vector<1x256xf32>
    %c0_34 = arith.constant 0 : index
    %c0_35 = arith.constant 0 : index
    %113 = vector.load %arg4[%c0_34, %c0_35] : memref<256x512xf32, #tpu.memory_space<vmem>>, vector<256x512xf32>
    %cst_36 = arith.constant dense<0.000000e+00> : vector<1x512xf32>
    %114 = tpu.matmul %112, %113, %cst_36 {dimension_numbers = #tpu.dot_dimension_numbers<[1], [0], [0], [1], [0, 0, 1, 1], [], []>} : vector<1x256xf32>, vector<256x512xf32>, vector<1x512xf32> -> vector<1x512xf32>
    %115 = arith.addf %114, %0 : vector<1x512xf32>
    %116 = vector.extract_strided_slice %115 {offsets = [0, 0], sizes = [1, 128], strides = [1, 1]} : vector<1x512xf32> to vector<1x128xf32>
    %117 = arith.negf %116 : vector<1x128xf32>
    %118 = math.exp %117 : vector<1x128xf32>
    %cst_37 = arith.constant 1.000000e+00 : f32
    %119 = vector.broadcast %cst_37 : f32 to vector<1x128xf32>
    %120 = arith.addf %119, %118 : vector<1x128xf32>
    %121 = arith.divf %119, %120 : vector<1x128xf32>
    %122 = vector.extract_strided_slice %115 {offsets = [0, 128], sizes = [1, 128], strides = [1, 1]} : vector<1x512xf32> to vector<1x128xf32>
    %123 = arith.negf %122 : vector<1x128xf32>
    %124 = math.exp %123 : vector<1x128xf32>
    %cst_38 = arith.constant 1.000000e+00 : f32
    %125 = vector.broadcast %cst_38 : f32 to vector<1x128xf32>
    %126 = arith.addf %125, %124 : vector<1x128xf32>
    %127 = arith.divf %125, %126 : vector<1x128xf32>
    %128 = vector.extract_strided_slice %115 {offsets = [0, 256], sizes = [1, 128], strides = [1, 1]} : vector<1x512xf32> to vector<1x128xf32>
    %129 = vector.extract_strided_slice %115 {offsets = [0, 384], sizes = [1, 128], strides = [1, 1]} : vector<1x512xf32> to vector<1x128xf32>
    %130 = arith.mulf %121, %129 : vector<1x128xf32>
    %131 = arith.addf %128, %130 : vector<1x128xf32>
    %132 = math.tanh %131 : vector<1x128xf32>
    %cst_39 = arith.constant 1.000000e+00 : f32
    %133 = vector.broadcast %cst_39 : f32 to vector<1x128xf32>
    %134 = arith.subf %133, %127 : vector<1x128xf32>
    %135 = arith.mulf %134, %132 : vector<1x128xf32>
    %136 = arith.mulf %127, %102 : vector<1x128xf32>
    %137 = arith.addf %135, %136 : vector<1x128xf32>
    %138 = arith.index_cast %c3_i32 : i32 to index
    %c0_40 = arith.constant 0 : index
    %c0_41 = arith.constant 0 : index
    %139 = vector.load %arg6[%138, %c0_40, %c0_41] : memref<5x1x128xf32, #tpu.memory_space<vmem>>, vector<1x1x128xf32>
    %140 = vector.shape_cast %139 : vector<1x1x128xf32> to vector<1x128xf32>
    %141 = vector.shape_cast %137 : vector<1x128xf32> to vector<1x1x128xf32>
    tpu.vector_store %arg6[%138, %c0_40, %c0_41], %141 {strides = array<i32>} : memref<5x1x128xf32, #tpu.memory_space<vmem>>, vector<1x1x128xf32>,
    %c4_i32 = arith.constant 4 : i32
    %142 = arith.index_cast %c4_i32 : i32 to index
    %143 = memref.load %arg1[%142] : memref<5xi32, #tpu.memory_space<smem>>
    %144 = arith.index_cast %143 : i32 to index
    %c0_42 = arith.constant 0 : index
    %c0_43 = arith.constant 0 : index
    %145 = vector.load %arg2[%144, %c0_42, %c0_43] : memref<256x1x128xf32, #tpu.memory_space<vmem>>, vector<1x1x128xf32>
    %146 = vector.shape_cast %145 : vector<1x1x128xf32> to vector<1x128xf32>
    %147 = tpu.concatenate %146, %137 in 1 : vector<1x128xf32>, vector<1x128xf32> -> vector<1x256xf32>
    %c0_44 = arith.constant 0 : index
    %c0_45 = arith.constant 0 : index
    %148 = vector.load %arg4[%c0_44, %c0_45] : memref<256x512xf32, #tpu.memory_space<vmem>>, vector<256x512xf32>
    %cst_46 = arith.constant dense<0.000000e+00> : vector<1x512xf32>
    %149 = tpu.matmul %147, %148, %cst_46 {dimension_numbers = #tpu.dot_dimension_numbers<[1], [0], [0], [1], [0, 0, 1, 1], [], []>} : vector<1x256xf32>, vector<256x512xf32>, vector<1x512xf32> -> vector<1x512xf32>
    %150 = arith.addf %149, %0 : vector<1x512xf32>
    %151 = vector.extract_strided_slice %150 {offsets = [0, 0], sizes = [1, 128], strides = [1, 1]} : vector<1x512xf32> to vector<1x128xf32>
    %152 = arith.negf %151 : vector<1x128xf32>
    %153 = math.exp %152 : vector<1x128xf32>
    %cst_47 = arith.constant 1.000000e+00 : f32
    %154 = vector.broadcast %cst_47 : f32 to vector<1x128xf32>
    %155 = arith.addf %154, %153 : vector<1x128xf32>
    %156 = arith.divf %154, %155 : vector<1x128xf32>
    %157 = vector.extract_strided_slice %150 {offsets = [0, 128], sizes = [1, 128], strides = [1, 1]} : vector<1x512xf32> to vector<1x128xf32>
    %158 = arith.negf %157 : vector<1x128xf32>
    %159 = math.exp %158 : vector<1x128xf32>
    %cst_48 = arith.constant 1.000000e+00 : f32
    %160 = vector.broadcast %cst_48 : f32 to vector<1x128xf32>
    %161 = arith.addf %160, %159 : vector<1x128xf32>
    %162 = arith.divf %160, %161 : vector<1x128xf32>
    %163 = vector.extract_strided_slice %150 {offsets = [0, 256], sizes = [1, 128], strides = [1, 1]} : vector<1x512xf32> to vector<1x128xf32>
    %164 = vector.extract_strided_slice %150 {offsets = [0, 384], sizes = [1, 128], strides = [1, 1]} : vector<1x512xf32> to vector<1x128xf32>
    %165 = arith.mulf %156, %164 : vector<1x128xf32>
    %166 = arith.addf %163, %165 : vector<1x128xf32>
    %167 = math.tanh %166 : vector<1x128xf32>
    %cst_49 = arith.constant 1.000000e+00 : f32
    %168 = vector.broadcast %cst_49 : f32 to vector<1x128xf32>
    %169 = arith.subf %168, %162 : vector<1x128xf32>
    %170 = arith.mulf %169, %167 : vector<1x128xf32>
    %171 = arith.mulf %162, %137 : vector<1x128xf32>
    %172 = arith.addf %170, %171 : vector<1x128xf32>
    %173 = arith.index_cast %c4_i32 : i32 to index
    %c0_50 = arith.constant 0 : index
    %c0_51 = arith.constant 0 : index
    %174 = vector.load %arg6[%173, %c0_50, %c0_51] : memref<5x1x128xf32, #tpu.memory_space<vmem>>, vector<1x1x128xf32>
    %175 = vector.shape_cast %174 : vector<1x1x128xf32> to vector<1x128xf32>
    %176 = vector.shape_cast %172 : vector<1x128xf32> to vector<1x1x128xf32>
    tpu.vector_store %arg6[%173, %c0_50, %c0_51], %176 {strides = array<i32>} : memref<5x1x128xf32, #tpu.memory_space<vmem>>, vector<1x1x128xf32>,
    %c5_i32 = arith.constant 5 : i32
    return
  }
  func.func @transform_0(%arg0: i32, %arg1: memref<5xi32, #tpu.memory_space<smem>>) -> (i32, i32, i32) {
    %c0_i32 = arith.constant 0 : i32
    %c0_i32_0 = arith.constant 0 : i32
    %c0_i32_1 = arith.constant 0 : i32
    %c0_i32_2 = arith.constant 0 : i32
    return %c0_i32, %c0_i32_0, %c0_i32_1 : i32, i32, i32
  }
  func.func @transform_1(%arg0: i32, %arg1: memref<5xi32, #tpu.memory_space<smem>>) -> (i32, i32) {
    %c0_i32 = arith.constant 0 : i32
    %c0_i32_0 = arith.constant 0 : i32
    %c0_i32_1 = arith.constant 0 : i32
    return %c0_i32, %c0_i32_0 : i32, i32
  }
  func.func @transform_2(%arg0: i32, %arg1: memref<5xi32, #tpu.memory_space<smem>>) -> (i32, i32) {
    %c0_i32 = arith.constant 0 : i32
    %c0_i32_0 = arith.constant 0 : i32
    %c0_i32_1 = arith.constant 0 : i32
    return %c0_i32, %c0_i32_0 : i32, i32
  }
  func.func @transform_3(%arg0: i32, %arg1: memref<5xi32, #tpu.memory_space<smem>>) -> (i32, i32) {
    %c0_i32 = arith.constant 0 : i32
    %c0_i32_0 = arith.constant 0 : i32
    %c0_i32_1 = arith.constant 0 : i32
    return %c0_i32, %c0_i32_0 : i32, i32
  }
  func.func @transform_4(%arg0: i32, %arg1: memref<5xi32, #tpu.memory_space<smem>>) -> (i32, i32, i32) {
    %c0_i32 = arith.constant 0 : i32
    %c0_i32_0 = arith.constant 0 : i32
    %c0_i32_1 = arith.constant 0 : i32
    %c0_i32_2 = arith.constant 0 : i32
    return %c0_i32, %c0_i32_0, %c0_i32_1 : i32, i32, i32
  }
}

module attributes {stable_mosaic.version = 11 : i64} {
  func.func @_proj_logsoftmax_kernel(%arg0: i32, %arg1: memref<5x128xf32, #tpu.memory_space<vmem>>, %arg2: memref<128x256xf32, #tpu.memory_space<vmem>>, %arg3: memref<1x256xf32, #tpu.memory_space<vmem>>, %arg4: memref<5x256xf32, #tpu.memory_space<vmem>>) attributes {dimension_semantics = [#tpu.dimension_semantics<parallel>], iteration_bounds = array<i64: 1>, scalar_prefetch = 0 : i64, scratch_operands = 0 : i64, tpu.core_type = #tpu.core_type<tc>, window_params = [{transform_indices = @transform_0, window_bounds = array<i64: 5, 128>}, {pipeline_mode = #tpu.pipeline_mode<synchronous>, transform_indices = @transform_1, window_bounds = array<i64: 128, 256>}, {pipeline_mode = #tpu.pipeline_mode<synchronous>, transform_indices = @transform_2, window_bounds = array<i64: 1, 256>}, {transform_indices = @transform_3, window_bounds = array<i64: 5, 256>}]} {
    %c0 = arith.constant 0 : index
    %c0_0 = arith.constant 0 : index
    %0 = vector.load %arg1[%c0, %c0_0] : memref<5x128xf32, #tpu.memory_space<vmem>>, vector<5x128xf32>
    %c0_1 = arith.constant 0 : index
    %c0_2 = arith.constant 0 : index
    %1 = vector.load %arg2[%c0_1, %c0_2] : memref<128x256xf32, #tpu.memory_space<vmem>>, vector<128x256xf32>
    %cst = arith.constant dense<0.000000e+00> : vector<5x256xf32>
    %2 = tpu.matmul %0, %1, %cst {dimension_numbers = #tpu.dot_dimension_numbers<[1], [0], [0], [1], [0, 0, 1, 1], [], []>} : vector<5x128xf32>, vector<128x256xf32>, vector<5x256xf32> -> vector<5x256xf32>
    %c0_3 = arith.constant 0 : index
    %c0_4 = arith.constant 0 : index
    %3 = vector.load %arg3[%c0_3, %c0_4] : memref<1x256xf32, #tpu.memory_space<vmem>>, vector<1x256xf32>
    %4 = vector.broadcast %3 : vector<1x256xf32> to vector<5x256xf32>
    %5 = arith.addf %2, %4 : vector<5x256xf32>
    %cst_5 = arith.constant dense<0xFF800000> : vector<5xf32>
    %6 = vector.multi_reduction <maximumf>, %5, %cst_5 [1] : vector<5x256xf32> to vector<5xf32>
    %7 = vector.shape_cast %6 : vector<5xf32> to vector<5x1xf32>
    %8 = vector.broadcast %7 : vector<5x1xf32> to vector<5x256xf32>
    %9 = arith.subf %5, %8 : vector<5x256xf32>
    %10 = math.exp %9 : vector<5x256xf32>
    %cst_6 = arith.constant dense<0.000000e+00> : vector<5xf32>
    %11 = vector.multi_reduction <add>, %10, %cst_6 [1] : vector<5x256xf32> to vector<5xf32>
    %12 = vector.shape_cast %11 : vector<5xf32> to vector<5x1xf32>
    %13 = math.log %12 : vector<5x1xf32>
    %14 = arith.addf %7, %13 : vector<5x1xf32>
    %15 = vector.broadcast %14 : vector<5x1xf32> to vector<5x256xf32>
    %16 = arith.subf %5, %15 : vector<5x256xf32>
    %c0_7 = arith.constant 0 : index
    %c0_8 = arith.constant 0 : index
    %17 = vector.load %arg4[%c0_7, %c0_8] : memref<5x256xf32, #tpu.memory_space<vmem>>, vector<5x256xf32>
    tpu.vector_store %arg4[%c0_7, %c0_8], %16 {strides = array<i32>} : memref<5x256xf32, #tpu.memory_space<vmem>>, vector<5x256xf32>,
    return
  }
  func.func @transform_0(%arg0: i32) -> (i32, i32) {
    %c0_i32 = arith.constant 0 : i32
    %c0_i32_0 = arith.constant 0 : i32
    return %arg0, %c0_i32 : i32, i32
  }
  func.func @transform_1(%arg0: i32) -> (i32, i32) {
    %c0_i32 = arith.constant 0 : i32
    %c0_i32_0 = arith.constant 0 : i32
    %c0_i32_1 = arith.constant 0 : i32
    return %c0_i32, %c0_i32_0 : i32, i32
  }
  func.func @transform_2(%arg0: i32) -> (i32, i32) {
    %c0_i32 = arith.constant 0 : i32
    %c0_i32_0 = arith.constant 0 : i32
    %c0_i32_1 = arith.constant 0 : i32
    return %c0_i32, %c0_i32_0 : i32, i32
  }
  func.func @transform_3(%arg0: i32) -> (i32, i32) {
    %c0_i32 = arith.constant 0 : i32
    %c0_i32_0 = arith.constant 0 : i32
    return %arg0, %c0_i32 : i32, i32
  }
}

</mosaic_0001>

<bundles_post_ra>
// kernel: simple_decoder_decode.3
= control target key start
LH: loop header
LB: loop body
LE: loop exit
PB: predicated region body
PF: predicated region fallthrough
CT: control target
= control target key end

     0   :  { %8 = vsyncpa [#allocation3], 0  ;;  %s253_s0 = inlined_call_operand.vmem [shape: f32[5,128], index: 0, kind: input, shape index: {}]   ;;  %s254_s1 = inlined_call_operand.hbm [shape: f32[128,256], index: 1, kind: input, shape index: {}]   ;;  %s255_s2 = inlined_call_operand.vmem [shape: f32[1,256], index: 2, kind: input, shape index: {}]   ;;  %s256_s3 = inlined_call_operand.hbm [shape: f32[5,256], index: 3, kind: output, shape index: {}]  }
   0x1   :  { %9 = vsyncpa [#allocation4], 0  ;;  %s16_s14 = sshll.u32 %s254_s1, 4  ;;  %s213_s15 = smov [#allocation2]   ;;  %s17_s14 = int_to_ptr.hbm [resolvable:$true] %s16_s14 }
   0x2   :  { %s18_s16 = sshll.u32 %s213_s15, 4  ;;  %s214_s17 = smov 256   ;;  %s19_s16 = int_to_ptr.vmem [resolvable:$true] %s18_s16 }
   0x3   :  { %s215_s18 = smov 16  }
   0x4   :  { %24 = dma.hbm_to_vmem [thread:$0]  %s17_s14, 4096, %s19_s16, [#allocation3], %s214_s17, %s214_s17, %s215_s18  }
   0x5   :  { %209 = dma.done.wait [#allocation3], 4096  }
   0x6   :  { %210 = vsyncadd [#allocation3], 4294963200  ;;  %v62_v0 = vld [vmem:[#allocation2 + $0xf0] sm:$0xff]  ;;  %v63_v1 = vld [vmem:[#allocation2 + $0xf8] sm:$0xff]  ;;  %vm110_vm0 = vcmask 1044480   ;;  %s141_s24 = sshll.u32 %s256_s3, 4  ;;  %s142_s24 = int_to_ptr.hbm [resolvable:$true] %s141_s24 }
   0x7   :  { %v60_v2 = vld [vmem:[#allocation2 + $0xe0] sm:$0xff]  ;;  %70 = vmatpush.msra.mxu0 %v62_v0  ;;  %90 = vmatpush.msra.mxu1 %v63_v1  ;;  %v61_v3 = vld [vmem:[#allocation2 + $0xe8] sm:$0xff]  ;;  %v58_v4 = vld [vmem:[#allocation2 + $0xd0] sm:$0xff] }
   0x8   :  { %v59_v5 = vld [vmem:[#allocation2 + $0xd8] sm:$0xff]  ;;  %v56_v6 = vld [vmem:[#allocation2 + $0xc0] sm:$0xff]  ;;  %v57_v7 = vld [vmem:[#allocation2 + $0xc8] sm:$0xff] }
   0x9   :  { %71 = vmatpush.msra.mxu0 %v60_v2  ;;  %91 = vmatpush.msra.mxu1 %v61_v3  ;;  %v54_v8 = vld [vmem:[#allocation2 + $0xb0] sm:$0xff]  ;;  %v55_v9 = vld [vmem:[#allocation2 + $0xb8] sm:$0xff]  ;;  %v52_v10 = vld [vmem:[#allocation2 + $0xa0] sm:$0xff] }
   0xa   :  { %v53_v11 = vld [vmem:[#allocation2 + $0xa8] sm:$0xff]  ;;  %v50_v12 = vld [vmem:[#allocation2 + $0x90] sm:$0xff]  ;;  %v51_v13 = vld [vmem:[#allocation2 + $0x98] sm:$0xff] }
   0xb   :  { %72 = vmatpush.msra.mxu0 %v58_v4  ;;  %92 = vmatpush.msra.mxu1 %v59_v5  ;;  %v48_v14 = vld [vmem:[#allocation2 + $0x80] sm:$0xff]  ;;  %v49_v15 = vld [vmem:[#allocation2 + $0x88] sm:$0xff]  ;;  %v46_v16 = vld [vmem:[#allocation2 + $0x70] sm:$0xff] }
   0xc   :  { %v47_v17 = vld [vmem:[#allocation2 + $0x78] sm:$0xff]  ;;  %v44_v18 = vld [vmem:[#allocation2 + $0x60] sm:$0xff]  ;;  %v45_v19 = vld [vmem:[#allocation2 + $0x68] sm:$0xff] }
   0xd   :  { %73 = vmatpush.msra.mxu0 %v56_v6  ;;  %93 = vmatpush.msra.mxu1 %v57_v7  ;;  %v42_v20 = vld [vmem:[#allocation2 + $0x50] sm:$0xff]  ;;  %v43_v21 = vld [vmem:[#allocation2 + $0x58] sm:$0xff]  ;;  %v40_v22 = vld [vmem:[#allocation2 + $0x40] sm:$0xff] }
   0xe   :  { %v41_v23 = vld [vmem:[#allocation2 + $0x48] sm:$0xff]  ;;  %v38_v24 = vld [vmem:[#allocation2 + $0x30] sm:$0xff]  ;;  %v39_v25 = vld [vmem:[#allocation2 + $0x38] sm:$0xff] }
   0xf   :  { %74 = vmatpush.msra.mxu0 %v54_v8  ;;  %94 = vmatpush.msra.mxu1 %v55_v9  ;;  %v36_v26 = vld [vmem:[#allocation2 + $0x20] sm:$0xff]  ;;  %v37_v27 = vld [vmem:[#allocation2 + $0x28] sm:$0xff]  ;;  %v34_v28 = vld [vmem:[#allocation2 + $0x10] sm:$0xff] }
  0x10   :  { %v35_v29 = vld [vmem:[#allocation2 + $0x18] sm:$0xff]  ;;  %v32_v30 = vld [vmem:[#allocation2] sm:$0xff]  ;;  %v33_v31 = vld [vmem:[#allocation2 + $0x8] sm:$0xff] }
  0x11   :  { %75 = vmatpush.msra.mxu0 %v52_v10  ;;  %95 = vmatpush.msra.mxu1 %v53_v11  ;;  %v31_v32 = vld [vmem:[%s253_s0] sm:$0x1f]  ;;  %s216_s0 = smov [#allocation5]  }
  0x12   :  { %v64_v33 = vld [vmem:[%s255_s2] sm:$0x3]  ;;  %s139_s2 = sshll.u32 %s216_s0, 4  ;;  %s140_s2 = int_to_ptr.vmem [resolvable:$true] %s139_s2 }
  0x13   :  { %76 = vmatpush.msra.mxu0 %v50_v12  ;;  %96 = vmatpush.msra.mxu1 %v51_v13  ;;  %v66_v34 = vperm.slane %v64_v33, 0  ;;  %v67_v35 = vperm.slane %v64_v33, 1 }
  0x15   :  { %77 = vmatpush.msra.mxu0 %v48_v14  ;;  %97 = vmatpush.msra.mxu1 %v49_v15 }
  0x17   :  { %78 = vmatpush.msra.mxu0 %v46_v16  ;;  %98 = vmatpush.msra.mxu1 %v47_v17 }
  0x19   :  { %79 = vmatpush.msra.mxu0 %v44_v18  ;;  %99 = vmatpush.msra.mxu1 %v45_v19 }
  0x1b   :  { %80 = vmatpush.msra.mxu0 %v42_v20  ;;  %100 = vmatpush.msra.mxu1 %v43_v21 }
  0x1d   :  { %81 = vmatpush.msra.mxu0 %v40_v22  ;;  %101 = vmatpush.msra.mxu1 %v41_v23 }
  0x1f   :  { %82 = vmatpush.msra.mxu0 %v38_v24  ;;  %102 = vmatpush.msra.mxu1 %v39_v25 }
  0x21   :  { %83 = vmatpush.msra.mxu0 %v36_v26  ;;  %103 = vmatpush.msra.mxu1 %v37_v27 }
  0x23   :  { %84 = vmatpush.msra.mxu0 %v34_v28  ;;  %104 = vmatpush.msra.mxu1 %v35_v29 }
  0x25   :  { %85 = vmatpush.msra.mxu0 %v32_v30  ;;  %105 = vmatpush.msra.mxu1 %v33_v31 }
  0x26   :  { %86 = vmatmul.f32.vlgmr.msra.gmra.mxu0 %v31_v32  ;;  %106 = vmatmul.f32.vlgmr.msra.gmra.mxu1 %v31_v32 }
  0xa3   :  { %v87_v36 = vpop.f32.mrf.mxu0  ;;  %v107_v37 = vpop.f32.mrf.mxu1 }
  0xa4   :  { %v88_v38 = vadd.f32 %v87_v36, %v66_v34  ;;  %v108_v39 = vadd.f32 %v107_v37, %v67_v35 }
  0xa6   :  { %v111_v40 = vsel %vm110_vm0, %v88_v38, -inf  ;;  %v112_v41 = vsel %vm110_vm0, %v108_v39, -inf }
  0xa7   :  { %v113_v42 = vmax.f32 %v111_v40, %v112_v41 }
  0xa9   :  { %114 = vmax.xlane.f32.xlu0 %v113_v42 }
 0x11c   :  { %v115_v43 = vpop.xlane.xlu0 %114 }
 0x11d   :  { %v116_v44 = vsub.f32 %v88_v38, %v115_v43  ;;  %v117_v45 = vsub.f32 %v108_v39, %v115_v43 }
 0x11f   :  { %v118_v46 = vmul.f32 1.442695, %v116_v44  ;;  %v120_v47 = vmul.f32 1.442695, %v117_v45 }
 0x121   :  { %155 = vpow2.f32 %v118_v46 }
 0x122   :  { %157 = vpow2.f32 %v120_v47 }
 0x127   :  { %v156_v48 = vpop.eup %155 }
 0x128   :  { %v158_v49 = vpop.eup %157  ;;  %v122_v50 = vsel %vm110_vm0, %v156_v48, 0.0 }
 0x129   :  { %v123_v51 = vsel %vm110_vm0, %v158_v49, 0.0 }
 0x12a   :  { %v124_v52 = vadd.f32 %v123_v51, %v122_v50 }
 0x12c   :  { %125 = vadd.xlane.f32.xlu0 %v124_v52 }
 0x19f   :  { %v126_v53 = vpop.xlane.xlu0 %125 }
 0x1a0   :  { %159 = vlog2.f32 %v126_v53 }
 0x1a6   :  { %v160_v54 = vpop.eup %159 }
 0x1a7   :  { %v128_v55 = vmul.f32 0.6931472, %v160_v54 }
 0x1a9   :  { %v129_v56 = vadd.f32 %v128_v55, %v115_v43 }
 0x1ab   :  { %v130_v57 = vsub.f32 %v88_v38, %v129_v56  ;;  %v131_v58 = vsub.f32 %v108_v39, %v129_v56 }
 0x1ad   :  { %132 = vst [vmem:[#allocation5] sm:$0x1f] %v130_v57 }
 0x1ae   :  { %133 = vst [vmem:[#allocation5 + $0x8] sm:$0x1f] %v131_v58 }
 0x1af   :  { %144 = dma.vmem_to_hbm [thread:$0]  %s140_s2, 256, %s142_s24, [#allocation4]  }
 0x1b0   :  { %211 = dma.done.wait [#allocation4], 256  }
 0x1b1   :  { %212 = vsyncadd [#allocation4], 4294967040 }
 0x1b2   :  { %149 = vsyncpa [#allocation3], 1 }
 0x1b3   :  { %150 = vsyncpa [#allocation4], 1 }

// kernel: simple_decoder_decode.2
= control target key start
LH: loop header
LB: loop body
LE: loop exit
PB: predicated region body
PF: predicated region fallthrough
CT: control target
= control target key end

     0   :  { %s1990_s21 = smov [#allocation3]   ;;  %s3201_s0 = inlined_call_operand.hbm [shape: s32[5], index: 0, kind: input, shape index: {}]   ;;  %s3202_s1 = inlined_call_operand.hbm [shape: f32[256,1,128], index: 1, kind: input, shape index: {}]   ;;  %s3203_s2 = inlined_call_operand.hbm [shape: f32[1,128], index: 2, kind: input, shape index: {}]   ;;  %s3204_s3 = inlined_call_operand.hbm [shape: f32[256,512], index: 3, kind: input, shape index: {}]   ;;  %s3205_s4 = inlined_call_operand.hbm [shape: f32[1,512], index: 4, kind: input, shape index: {}]   ;;  %s3206_s5 = inlined_call_operand.vmem [shape: f32[5,1,128], index: 5, kind: output, shape index: {}]  }
   0x1   :  { %s11_s20 = sshll.u32 %s3201_s0, 4  ;;  %s12_s20 = int_to_ptr.hbm [resolvable:$true] %s11_s20 }
   0x2   :  { %14 = dma.hbm_to_smem %s12_s20, 16, %s1990_s21, [#allocation2] }
   0x3   :  { %1982 = dma.done.wait [#allocation2], 16 }
   0x4   :  { %1983 = vsyncadd [#allocation2], 4294967280 }
   0x5   :  { %17 = sfence }
   0x6   :  { %18 = vsyncpa [#allocation5], 0 }
   0x7   :  { %19 = vsyncpa [#allocation7], 0  ;;  %s39_s24 = sshll.u32 %s3203_s2, 4  ;;  %s40_s24 = int_to_ptr.hbm [resolvable:$true] %s39_s24 }
   0x8   :  { %20 = vsyncpa [#allocation10], 0  ;;  %s1991_s25 = smov [#allocation6]   ;;  %s25_s0 = sshll.u32 %s3202_s1, 4  ;;  %s26_s0 = int_to_ptr.hbm [resolvable:$true] %s25_s0 }
   0x9   :  { %s41_s26 = sshll.u32 %s1991_s25, 4  ;;  %s1992_s29 = smov [#allocation4]   ;;  %s42_s26 = int_to_ptr.vmem [resolvable:$true] %s41_s26 }
   0xa   :  { %44 = dma.hbm_to_vmem [thread:$0]  %s40_s24, 16, %s42_s26, [#allocation7]  }
   0xb   :  { %s27_s30 = sshll.u32 %s1992_s29, 4  ;;  %s1993_s6 = smov 16   ;;  %s28_s30 = int_to_ptr.vmem [resolvable:$true] %s27_s30 }
   0xc   :  { %s1994_s7 = smov 1   ;;  %s49_s2 = sshll.u32 %s3204_s3, 4  ;;  %s50_s2 = int_to_ptr.hbm [resolvable:$true] %s49_s2 }
   0xd   :  { %33 = dma.hbm_to_vmem [thread:$0]  %s26_s0, 4096, %s28_s30, [#allocation5], %s1993_s6, %s1993_s6, %s1994_s7  }
   0xe   :  { %s1995_s10 = smov [#allocation8]   ;;  %s63_s1 = sshll.u32 %s3205_s4, 4  ;;  %s64_s1 = int_to_ptr.hbm [resolvable:$true] %s63_s1 }
   0xf   :  { %s51_s11 = sshll.u32 %s1995_s10, 4  ;;  %s1996_s14 = smov 512   ;;  %s52_s11 = int_to_ptr.vmem [resolvable:$true] %s51_s11 }
  0x10   :  { %s1997_s15 = smov 32   ;;  %s1998_s16 = smov [#allocation9]  }
  0x11   :  { %57 = dma.hbm_to_vmem [thread:$0]  %s50_s2, 16384, %s52_s11, [#allocation7], %s1996_s14, %s1996_s14, %s1997_s15  }
  0x12   :  { %s65_s17 = sshll.u32 %s1998_s16, 4  ;;  %s66_s17 = int_to_ptr.vmem [resolvable:$true] %s65_s17 }
  0x13   :  { %68 = dma.hbm_to_vmem [thread:$0]  %s64_s1, 64, %s66_s17, [#allocation10]  }
  0x14   :  { %1984 = dma.done.wait [#allocation5], 4096  }
  0x15   :  { %1985 = vsyncadd [#allocation5], 4294963200 }
  0x16   :  { %1986 = dma.done.wait [#allocation7], 16400  }
  0x17   :  { %1987 = vsyncadd [#allocation7], 4294950896 }
  0x18   :  { %1988 = dma.done.wait [#allocation10], 64  }
  0x19   :  { %1989 = vsyncadd [#allocation10], 4294967232  ;;  %v2044_v0 = vld [vmem:[#allocation8 + $0x1e0] sm:$0xff]  ;;  %v2046_v1 = vld [vmem:[#allocation8 + $0x1e8] sm:$0xff]  ;;  %s2164_s3 = sld [smem:[#allocation3]] }
  0x1a   :  { %v2048_v2 = vld [vmem:[#allocation8 + $0x1c0] sm:$0xff]  ;;  %227 = vmatpush.msra.mxu0 %v2044_v0  ;;  %267 = vmatpush.msra.mxu2 %v2046_v1  ;;  %v2054_v4 = vld [vmem:[#allocation8 + $0x1c8] sm:$0xff]  ;;  %v2233_v63 = vld [vmem:[#allocation8 + $0x1f8] sm:$0xff]  ;;  %s1799_s18 = sld [smem:[#allocation3 + $0x1]] }
  0x1b   :  { %v2052_v3 = vld [vmem:[#allocation8 + $0x3e0] sm:$0xff]  ;;  %v2056_v5 = vld [vmem:[#allocation8 + $0x3e8] sm:$0xff]  ;;  %3375 = vst [vmem:[#allocation26_spill] sm:$0xff] %v2233_v63  ;;  %s2871_s22 = sld [smem:[#allocation3 + $0x2]] }
  0x1c   :  { %247 = vmatpush.msra.mxu1 %v2052_v3  ;;  %287 = vmatpush.msra.mxu3 %v2056_v5  ;;  %v2060_v6 = vld [vmem:[#allocation8 + $0x1a0] sm:$0xff]  ;;  %v2064_v8 = vld [vmem:[#allocation8 + $0x1a8] sm:$0xff]  ;;  %s1807_s26 = sld [smem:[#allocation3 + $0x3]] }
  0x1d   :  { %v2062_v7 = vld [vmem:[#allocation8 + $0x3c0] sm:$0xff]  ;;  %228 = vmatpush.msra.mxu0 %v2048_v2  ;;  %268 = vmatpush.msra.mxu2 %v2054_v4  ;;  %v2068_v9 = vld [vmem:[#allocation8 + $0x3c8] sm:$0xff]  ;;  %s3169_s29 = sld [smem:[#allocation3 + $0x4]] }
  0x1e   :  { %v2070_v10 = vld [vmem:[#allocation8 + $0x3a0] sm:$0xff]  ;;  %248 = vmatpush.msra.mxu1 %v2062_v7  ;;  %288 = vmatpush.msra.mxu3 %v2068_v9  ;;  %v2076_v12 = vld [vmem:[#allocation8 + $0x188] sm:$0xff] }
  0x1f   :  { %v2074_v11 = vld [vmem:[#allocation8 + $0x180] sm:$0xff]  ;;  %v2078_v13 = vld [vmem:[#allocation8 + $0x3a8] sm:$0xff]  ;;  %229 = vmatpush.msra.mxu0 %v2060_v6  ;;  %269 = vmatpush.msra.mxu2 %v2064_v8  ;;  %s88_s4 = scalar_lea.vmem [#allocation4], %s2164_s3 }
  0x20   :  { %v2082_v14 = vld [vmem:[#allocation8 + $0x380] sm:$0xff]  ;;  %v2084_v15 = vld [vmem:[#allocation8 + $0x388] sm:$0xff]  ;;  %249 = vmatpush.msra.mxu1 %v2070_v10  ;;  %289 = vmatpush.msra.mxu3 %v2078_v13  ;;  %v2229_v62 = vld [vmem:[%s88_s4] sm:$0x1]  ;;  %s434_s19 = scalar_lea.vmem [#allocation4], %s1799_s18 }
  0x21   :  { %v2088_v16 = vld [vmem:[#allocation8 + $0x160] sm:$0xff]  ;;  %v2090_v17 = vld [vmem:[#allocation8 + $0x168] sm:$0xff]  ;;  %230 = vmatpush.msra.mxu0 %v2074_v11  ;;  %270 = vmatpush.msra.mxu2 %v2076_v12  ;;  %s772_s23 = scalar_lea.vmem [#allocation4], %s2871_s22 }
  0x22   :  { %v2094_v18 = vld [vmem:[#allocation8 + $0x360] sm:$0xff]  ;;  %v2096_v19 = vld [vmem:[#allocation8 + $0x368] sm:$0xff]  ;;  %250 = vmatpush.msra.mxu1 %v2082_v14  ;;  %290 = vmatpush.msra.mxu3 %v2084_v15  ;;  %s1110_s27 = scalar_lea.vmem [#allocation4], %s1807_s26 }
  0x23   :  { %v2100_v20 = vld [vmem:[#allocation8 + $0x140] sm:$0xff]  ;;  %v2102_v21 = vld [vmem:[#allocation8 + $0x148] sm:$0xff]  ;;  %231 = vmatpush.msra.mxu0 %v2088_v16  ;;  %271 = vmatpush.msra.mxu2 %v2090_v17  ;;  %s1448_s30 = scalar_lea.vmem [#allocation4], %s3169_s29 }
  0x24   :  { %v2106_v22 = vld [vmem:[#allocation8 + $0x340] sm:$0xff]  ;;  %v2108_v23 = vld [vmem:[#allocation8 + $0x348] sm:$0xff]  ;;  %251 = vmatpush.msra.mxu1 %v2094_v18  ;;  %291 = vmatpush.msra.mxu3 %v2096_v19 }
  0x25   :  { %v2112_v24 = vld [vmem:[#allocation8 + $0x120] sm:$0xff]  ;;  %v2114_v25 = vld [vmem:[#allocation8 + $0x128] sm:$0xff]  ;;  %232 = vmatpush.msra.mxu0 %v2100_v20  ;;  %272 = vmatpush.msra.mxu2 %v2102_v21 }
  0x26   :  { %v2118_v26 = vld [vmem:[#allocation8 + $0x320] sm:$0xff]  ;;  %v2120_v27 = vld [vmem:[#allocation8 + $0x328] sm:$0xff]  ;;  %252 = vmatpush.msra.mxu1 %v2106_v22  ;;  %292 = vmatpush.msra.mxu3 %v2108_v23 }
  0x27   :  { %v2124_v28 = vld [vmem:[#allocation8 + $0x100] sm:$0xff]  ;;  %v2126_v29 = vld [vmem:[#allocation8 + $0x108] sm:$0xff]  ;;  %233 = vmatpush.msra.mxu0 %v2112_v24  ;;  %273 = vmatpush.msra.mxu2 %v2114_v25 }
  0x28   :  { %v2130_v30 = vld [vmem:[#allocation8 + $0x300] sm:$0xff]  ;;  %v2132_v31 = vld [vmem:[#allocation8 + $0x308] sm:$0xff]  ;;  %253 = vmatpush.msra.mxu1 %v2118_v26  ;;  %293 = vmatpush.msra.mxu3 %v2120_v27 }
  0x29   :  { %v2136_v32 = vld [vmem:[#allocation8 + $0xe0] sm:$0xff]  ;;  %v2138_v33 = vld [vmem:[#allocation8 + $0xe8] sm:$0xff]  ;;  %234 = vmatpush.msra.mxu0 %v2124_v28  ;;  %274 = vmatpush.msra.mxu2 %v2126_v29 }
  0x2a   :  { %v2142_v34 = vld [vmem:[#allocation8 + $0x2e0] sm:$0xff]  ;;  %v2144_v35 = vld [vmem:[#allocation8 + $0x2e8] sm:$0xff]  ;;  %254 = vmatpush.msra.mxu1 %v2130_v30  ;;  %294 = vmatpush.msra.mxu3 %v2132_v31 }
  0x2b   :  { %v2148_v36 = vld [vmem:[#allocation8 + $0xc0] sm:$0xff]  ;;  %v2150_v37 = vld [vmem:[#allocation8 + $0xc8] sm:$0xff]  ;;  %235 = vmatpush.msra.mxu0 %v2136_v32  ;;  %275 = vmatpush.msra.mxu2 %v2138_v33 }
  0x2c   :  { %v2154_v38 = vld [vmem:[#allocation8 + $0x2c0] sm:$0xff]  ;;  %v2156_v39 = vld [vmem:[#allocation8 + $0x2c8] sm:$0xff]  ;;  %255 = vmatpush.msra.mxu1 %v2142_v34  ;;  %295 = vmatpush.msra.mxu3 %v2144_v35 }
  0x2d   :  { %v2160_v40 = vld [vmem:[#allocation8 + $0xa0] sm:$0xff]  ;;  %v2162_v41 = vld [vmem:[#allocation8 + $0xa8] sm:$0xff]  ;;  %236 = vmatpush.msra.mxu0 %v2148_v36  ;;  %276 = vmatpush.msra.mxu2 %v2150_v37 }
  0x2e   :  { %v2168_v42 = vld [vmem:[#allocation8 + $0x2a0] sm:$0xff]  ;;  %v2170_v43 = vld [vmem:[#allocation8 + $0x2a8] sm:$0xff]  ;;  %256 = vmatpush.msra.mxu1 %v2154_v38  ;;  %296 = vmatpush.msra.mxu3 %v2156_v39 }
  0x2f   :  { %v2174_v44 = vld [vmem:[#allocation8 + $0x80] sm:$0xff]  ;;  %v2176_v45 = vld [vmem:[#allocation8 + $0x88] sm:$0xff]  ;;  %237 = vmatpush.msra.mxu0 %v2160_v40  ;;  %277 = vmatpush.msra.mxu2 %v2162_v41 }
  0x30   :  { %v2180_v46 = vld [vmem:[#allocation8 + $0x280] sm:$0xff]  ;;  %v2182_v47 = vld [vmem:[#allocation8 + $0x288] sm:$0xff]  ;;  %257 = vmatpush.msra.mxu1 %v2168_v42  ;;  %297 = vmatpush.msra.mxu3 %v2170_v43 }
  0x31   :  { %v2186_v48 = vld [vmem:[#allocation8 + $0x60] sm:$0xff]  ;;  %v2188_v49 = vld [vmem:[#allocation8 + $0x68] sm:$0xff]  ;;  %238 = vmatpush.msra.mxu0 %v2174_v44  ;;  %278 = vmatpush.msra.mxu2 %v2176_v45 }
  0x32   :  { %v2192_v50 = vld [vmem:[#allocation8 + $0x260] sm:$0xff]  ;;  %v2194_v51 = vld [vmem:[#allocation8 + $0x268] sm:$0xff]  ;;  %258 = vmatpush.msra.mxu1 %v2180_v46  ;;  %298 = vmatpush.msra.mxu3 %v2182_v47 }
  0x33   :  { %3364 = vst [vmem:[#allocation15_spill] sm:$0xff] %v2194_v51  ;;  %v2198_v52 = vld [vmem:[#allocation8 + $0x40] sm:$0xff]  ;;  %v2200_v53 = vld [vmem:[#allocation8 + $0x48] sm:$0xff]  ;;  %239 = vmatpush.msra.mxu0 %v2186_v48  ;;  %279 = vmatpush.msra.mxu2 %v2188_v49 }
  0x34   :  { %3365 = vst [vmem:[#allocation16_spill] sm:$0xff] %v2198_v52  ;;  %v2204_v54 = vld [vmem:[#allocation8 + $0x240] sm:$0xff]  ;;  %v2206_v55 = vld [vmem:[#allocation8 + $0x248] sm:$0xff]  ;;  %259 = vmatpush.msra.mxu1 %v2192_v50  ;;  %299 = vmatpush.msra.mxu3 %v2194_v51  ;;  %v2261_v51 = vld [vmem:[#allocation8 + $0x3d8] sm:$0xff] }
  0x35   :  { %3366 = vst [vmem:[#allocation17_spill] sm:$0xff] %v2200_v53  ;;  %v2210_v56 = vld [vmem:[#allocation8 + $0x20] sm:$0xff]  ;;  %v2212_v57 = vld [vmem:[#allocation8 + $0x28] sm:$0xff]  ;;  %240 = vmatpush.msra.mxu0 %v2198_v52  ;;  %280 = vmatpush.msra.mxu2 %v2200_v53  ;;  %v2272_v52 = vld [vmem:[#allocation8 + $0x3b8] sm:$0xff] }
  0x36   :  { %3367 = vst [vmem:[#allocation18_spill] sm:$0xff] %v2204_v54  ;;  %v2216_v58 = vld [vmem:[#allocation8 + $0x220] sm:$0xff]  ;;  %v2218_v59 = vld [vmem:[#allocation8 + $0x228] sm:$0xff]  ;;  %260 = vmatpush.msra.mxu1 %v2204_v54  ;;  %300 = vmatpush.msra.mxu3 %v2206_v55  ;;  %v2275_v53 = vld [vmem:[#allocation8 + $0x1b0] sm:$0xff] }
  0x37   :  { %3368 = vst [vmem:[#allocation19_spill] sm:$0xff] %v2206_v55  ;;  %v2222_v60 = vld [vmem:[#allocation8] sm:$0xff]  ;;  %v2224_v61 = vld [vmem:[#allocation8 + $0x8] sm:$0xff]  ;;  %241 = vmatpush.msra.mxu0 %v2210_v56  ;;  %281 = vmatpush.msra.mxu2 %v2212_v57 }
  0x38   :  { %3369 = vst [vmem:[#allocation20_spill] sm:$0xff] %v2210_v56  ;;  %261 = vmatpush.msra.mxu1 %v2216_v58  ;;  %301 = vmatpush.msra.mxu3 %v2218_v59  ;;  %v2235_v54 = vld [vmem:[#allocation8 + $0x200] sm:$0xff]  ;;  %v2239_v55 = vld [vmem:[#allocation8 + $0x208] sm:$0xff]  ;;  %v2241_v56 = vld [vmem:[#allocation6] sm:$0x1] }
  0x39   :  { %3370 = vst [vmem:[#allocation21_spill] sm:$0xff] %v2212_v57  ;;  %242 = vmatpush.msra.mxu0 %v2222_v60  ;;  %282 = vmatpush.msra.mxu2 %v2224_v61  ;;  %v2245_v57 = vld [vmem:[#allocation8 + $0x1d8] sm:$0xff] }
  0x3a   :  { %3371 = vst [vmem:[#allocation22_spill] sm:$0xff] %v2216_v58  ;;  %243 = vmatmul.f32.vlgmr.msra.gmra.mxu0 %v2229_v62  ;;  %283 = vmatmul.f32.vlgmr.msra.gmra.mxu2 %v2229_v62  ;;  %v2251_v58 = vld [vmem:[#allocation8 + $0x1f0] sm:$0xff] }
  0x3b   :  { %3372 = vst [vmem:[#allocation23_spill] sm:$0xff] %v2218_v59  ;;  %347 = vmatpush.msrb.mxu2 %v2233_v63  ;;  %262 = vmatpush.msra.mxu1 %v2235_v54  ;;  %v2249_v59 = vld [vmem:[#allocation8 + $0x3f8] sm:$0xff]  ;;  %v2263_v63 = vld [vmem:[#allocation8 + $0x1d0] sm:$0xff] }
  0x3c   :  { %3373 = vst [vmem:[#allocation24_spill] sm:$0xff] %v2222_v60  ;;  %302 = vmatpush.msra.mxu3 %v2239_v55  ;;  %263 = vmatmul.f32.vlgmr.msra.gmra.mxu1 %v2241_v56  ;;  %v2255_v60 = vld [vmem:[#allocation8 + $0x1b8] sm:$0xff] }
  0x3d   :  { %3374 = vst [vmem:[#allocation25_spill] sm:$0xff] %v2224_v61  ;;  %v2257_v61 = vld [vmem:[#allocation8 + $0x3f0] sm:$0xff]  ;;  %303 = vmatmul.f32.vlgmr.msra.gmra.mxu3 %v2241_v56  ;;  %348 = vmatpush.msrb.mxu2 %v2245_v57 }
  0x3e   :  { %3376 = vst [vmem:[#allocation27_spill] sm:$0xff] %v2235_v54  ;;  %367 = vmatpush.msrb.mxu3 %v2249_v59  ;;  %v2266_v54 = vld [vmem:[#allocation8 + $0x198] sm:$0xff]  ;;  %307 = vmatpush.msrb.mxu0 %v2251_v58 }
  0x3f   :  { %3377 = vst [vmem:[#allocation28_spill] sm:$0xff] %v2239_v55  ;;  %v2269_v55 = vld [vmem:[#allocation8 + $0x3d0] sm:$0xff]  ;;  %349 = vmatpush.msrb.mxu2 %v2255_v60  ;;  %327 = vmatpush.msrb.mxu1 %v2257_v61 }
  0x40   :  { %3378 = vst [vmem:[#allocation29_spill] sm:$0xff] %v2245_v57  ;;  %368 = vmatpush.msrb.mxu3 %v2261_v51  ;;  %v2278_v57 = vld [vmem:[#allocation8 + $0x178] sm:$0xff]  ;;  %308 = vmatpush.msrb.mxu0 %v2263_v63 }
  0x41   :  { %3379 = vst [vmem:[#allocation30_spill] sm:$0xff] %v2249_v59  ;;  %v2281_v59 = vld [vmem:[#allocation8 + $0x3b0] sm:$0xff]  ;;  %350 = vmatpush.msrb.mxu2 %v2266_v54  ;;  %328 = vmatpush.msrb.mxu1 %v2269_v55 }
  0x42   :  { %3380 = vst [vmem:[#allocation31_spill] sm:$0xff] %v2251_v58  ;;  %v2284_v58 = vld [vmem:[#allocation8 + $0x398] sm:$0xff]  ;;  %369 = vmatpush.msrb.mxu3 %v2272_v52  ;;  %309 = vmatpush.msrb.mxu0 %v2275_v53 }
  0x43   :  { %3381 = vst [vmem:[#allocation32_spill] sm:$0xff] %v2255_v60  ;;  %v2287_v60 = vld [vmem:[#allocation8 + $0x190] sm:$0xff]  ;;  %351 = vmatpush.msrb.mxu2 %v2278_v57  ;;  %329 = vmatpush.msrb.mxu1 %v2281_v59 }
  0x44   :  { %3382 = vst [vmem:[#allocation33_spill] sm:$0xff] %v2257_v61  ;;  %v2290_v61 = vld [vmem:[#allocation8 + $0x158] sm:$0xff]  ;;  %370 = vmatpush.msrb.mxu3 %v2284_v58  ;;  %310 = vmatpush.msrb.mxu0 %v2287_v60 }
  0x45   :  { %3383 = vst [vmem:[#allocation34_spill] sm:$0xff] %v2261_v51  ;;  %v2293_v51 = vld [vmem:[#allocation8 + $0x390] sm:$0xff]  ;;  %352 = vmatpush.msrb.mxu2 %v2290_v61 }
  0x46   :  { %3384 = vst [vmem:[#allocation35_spill] sm:$0xff] %v2263_v63  ;;  %v2296_v63 = vld [vmem:[#allocation8 + $0x378] sm:$0xff]  ;;  %330 = vmatpush.msrb.mxu1 %v2293_v51 }
  0x47   :  { %3385 = vst [vmem:[#allocation36_spill] sm:$0xff] %v2266_v54  ;;  %v2299_v54 = vld [vmem:[#allocation8 + $0x170] sm:$0xff]  ;;  %371 = vmatpush.msrb.mxu3 %v2296_v63 }
  0x48   :  { %3386 = vst [vmem:[#allocation37_spill] sm:$0xff] %v2269_v55  ;;  %v2302_v55 = vld [vmem:[#allocation8 + $0x138] sm:$0xff]  ;;  %311 = vmatpush.msrb.mxu0 %v2299_v54 }
  0x49   :  { %3387 = vst [vmem:[#allocation38_spill] sm:$0xff] %v2272_v52  ;;  %v2305_v52 = vld [vmem:[#allocation8 + $0x370] sm:$0xff]  ;;  %353 = vmatpush.msrb.mxu2 %v2302_v55 }
  0x4a   :  { %3388 = vst [vmem:[#allocation39_spill] sm:$0xff] %v2275_v53  ;;  %v2308_v53 = vld [vmem:[#allocation8 + $0x358] sm:$0xff]  ;;  %331 = vmatpush.msrb.mxu1 %v2305_v52 }
  0x4b   :  { %3389 = vst [vmem:[#allocation40_spill] sm:$0xff] %v2278_v57  ;;  %v2311_v57 = vld [vmem:[#allocation8 + $0x150] sm:$0xff]  ;;  %372 = vmatpush.msrb.mxu3 %v2308_v53 }
  0x4c   :  { %3390 = vst [vmem:[#allocation41_spill] sm:$0xff] %v2281_v59  ;;  %v2314_v59 = vld [vmem:[#allocation8 + $0x118] sm:$0xff]  ;;  %312 = vmatpush.msrb.mxu0 %v2311_v57 }
  0x4d   :  { %3391 = vst [vmem:[#allocation42_spill] sm:$0xff] %v2284_v58  ;;  %v2317_v58 = vld [vmem:[#allocation8 + $0x350] sm:$0xff]  ;;  %354 = vmatpush.msrb.mxu2 %v2314_v59 }
  0x4e   :  { %3392 = vst [vmem:[#allocation43_spill] sm:$0xff] %v2287_v60  ;;  %v2320_v60 = vld [vmem:[#allocation8 + $0x338] sm:$0xff]  ;;  %332 = vmatpush.msrb.mxu1 %v2317_v58 }
  0x4f   :  { %3393 = vst [vmem:[#allocation44_spill] sm:$0xff] %v2290_v61  ;;  %v2323_v61 = vld [vmem:[#allocation8 + $0x130] sm:$0xff]  ;;  %373 = vmatpush.msrb.mxu3 %v2320_v60 }
  0x50   :  { %3394 = vst [vmem:[#allocation45_spill] sm:$0xff] %v2293_v51  ;;  %v2326_v51 = vld [vmem:[#allocation8 + $0xf8] sm:$0xff]  ;;  %313 = vmatpush.msrb.mxu0 %v2323_v61 }
  0x51   :  { %3395 = vst [vmem:[#allocation46_spill] sm:$0xff] %v2296_v63  ;;  %v2329_v63 = vld [vmem:[#allocation8 + $0x330] sm:$0xff]  ;;  %355 = vmatpush.msrb.mxu2 %v2326_v51 }
  0x52   :  { %3396 = vst [vmem:[#allocation47_spill] sm:$0xff] %v2299_v54  ;;  %v2332_v54 = vld [vmem:[#allocation8 + $0x318] sm:$0xff]  ;;  %333 = vmatpush.msrb.mxu1 %v2329_v63 }
  0x53   :  { %3397 = vst [vmem:[#allocation48_spill] sm:$0xff] %v2302_v55  ;;  %v2335_v55 = vld [vmem:[#allocation8 + $0x110] sm:$0xff]  ;;  %374 = vmatpush.msrb.mxu3 %v2332_v54 }
  0x54   :  { %3398 = vst [vmem:[#allocation49_spill] sm:$0xff] %v2305_v52  ;;  %v2338_v52 = vld [vmem:[#allocation8 + $0xd8] sm:$0xff]  ;;  %314 = vmatpush.msrb.mxu0 %v2335_v55 }
  0x55   :  { %3399 = vst [vmem:[#allocation50_spill] sm:$0xff] %v2308_v53  ;;  %v2341_v53 = vld [vmem:[#allocation8 + $0x310] sm:$0xff]  ;;  %356 = vmatpush.msrb.mxu2 %v2338_v52 }
  0x56   :  { %3400 = vst [vmem:[#allocation51_spill] sm:$0xff] %v2311_v57  ;;  %v2344_v57 = vld [vmem:[#allocation8 + $0x2f8] sm:$0xff]  ;;  %334 = vmatpush.msrb.mxu1 %v2341_v53 }
  0x57   :  { %3401 = vst [vmem:[#allocation52_spill] sm:$0xff] %v2314_v59  ;;  %v2347_v59 = vld [vmem:[#allocation8 + $0xf0] sm:$0xff]  ;;  %375 = vmatpush.msrb.mxu3 %v2344_v57 }
  0x58   :  { %3402 = vst [vmem:[#allocation53_spill] sm:$0xff] %v2317_v58  ;;  %v2350_v58 = vld [vmem:[#allocation8 + $0xb8] sm:$0xff]  ;;  %315 = vmatpush.msrb.mxu0 %v2347_v59 }
  0x59   :  { %3403 = vst [vmem:[#allocation54_spill] sm:$0xff] %v2320_v60  ;;  %v2353_v60 = vld [vmem:[#allocation8 + $0x2f0] sm:$0xff]  ;;  %357 = vmatpush.msrb.mxu2 %v2350_v58 }
  0x5a   :  { %3404 = vst [vmem:[#allocation55_spill] sm:$0xff] %v2323_v61  ;;  %v2356_v61 = vld [vmem:[#allocation8 + $0x2d8] sm:$0xff]  ;;  %335 = vmatpush.msrb.mxu1 %v2353_v60 }
  0x5b   :  { %3405 = vst [vmem:[#allocation56_spill] sm:$0xff] %v2326_v51  ;;  %v2359_v51 = vld [vmem:[#allocation8 + $0xd0] sm:$0xff]  ;;  %376 = vmatpush.msrb.mxu3 %v2356_v61 }
  0x5c   :  { %3406 = vst [vmem:[#allocation57_spill] sm:$0xff] %v2329_v63  ;;  %v2362_v63 = vld [vmem:[#allocation8 + $0x98] sm:$0xff]  ;;  %316 = vmatpush.msrb.mxu0 %v2359_v51 }
  0x5d   :  { %3407 = vst [vmem:[#allocation58_spill] sm:$0xff] %v2332_v54  ;;  %v2365_v54 = vld [vmem:[#allocation8 + $0x2d0] sm:$0xff]  ;;  %358 = vmatpush.msrb.mxu2 %v2362_v63 }
  0x5e   :  { %3408 = vst [vmem:[#allocation59_spill] sm:$0xff] %v2335_v55  ;;  %v2368_v55 = vld [vmem:[#allocation8 + $0x2b8] sm:$0xff]  ;;  %336 = vmatpush.msrb.mxu1 %v2365_v54 }
  0x5f   :  { %3409 = vst [vmem:[#allocation60_spill] sm:$0xff] %v2338_v52  ;;  %v2371_v52 = vld [vmem:[#allocation8 + $0xb0] sm:$0xff]  ;;  %377 = vmatpush.msrb.mxu3 %v2368_v55 }
  0x60   :  { %3410 = vst [vmem:[#allocation61_spill] sm:$0xff] %v2341_v53  ;;  %v2374_v53 = vld [vmem:[#allocation8 + $0x78] sm:$0xff]  ;;  %317 = vmatpush.msrb.mxu0 %v2371_v52 }
  0x61   :  { %3411 = vst [vmem:[#allocation62_spill] sm:$0xff] %v2344_v57  ;;  %v2377_v57 = vld [vmem:[#allocation8 + $0x2b0] sm:$0xff]  ;;  %359 = vmatpush.msrb.mxu2 %v2374_v53 }
  0x62   :  { %3412 = vst [vmem:[#allocation63_spill] sm:$0xff] %v2347_v59  ;;  %v2380_v59 = vld [vmem:[#allocation8 + $0x298] sm:$0xff]  ;;  %337 = vmatpush.msrb.mxu1 %v2377_v57 }
  0x63   :  { %3413 = vst [vmem:[#allocation64_spill] sm:$0xff] %v2350_v58  ;;  %v2383_v58 = vld [vmem:[#allocation8 + $0x90] sm:$0xff]  ;;  %378 = vmatpush.msrb.mxu3 %v2380_v59 }
  0x64   :  { %3414 = vst [vmem:[#allocation65_spill] sm:$0xff] %v2353_v60  ;;  %v2386_v60 = vld [vmem:[#allocation8 + $0x58] sm:$0xff]  ;;  %318 = vmatpush.msrb.mxu0 %v2383_v58 }
  0x65   :  { %3415 = vst [vmem:[#allocation66_spill] sm:$0xff] %v2356_v61  ;;  %v2389_v61 = vld [vmem:[#allocation8 + $0x290] sm:$0xff]  ;;  %360 = vmatpush.msrb.mxu2 %v2386_v60 }
  0x66   :  { %3416 = vst [vmem:[#allocation67_spill] sm:$0xff] %v2359_v51  ;;  %v2392_v51 = vld [vmem:[#allocation8 + $0x278] sm:$0xff]  ;;  %338 = vmatpush.msrb.mxu1 %v2389_v61 }
  0x67   :  { %3417 = vst [vmem:[#allocation68_spill] sm:$0xff] %v2362_v63  ;;  %v2395_v63 = vld [vmem:[#allocation8 + $0x70] sm:$0xff]  ;;  %379 = vmatpush.msrb.mxu3 %v2392_v51 }
  0x68   :  { %3418 = vst [vmem:[#allocation69_spill] sm:$0xff] %v2365_v54  ;;  %v2398_v54 = vld [vmem:[#allocation8 + $0x38] sm:$0xff]  ;;  %319 = vmatpush.msrb.mxu0 %v2395_v63 }
  0x69   :  { %3419 = vst [vmem:[#allocation70_spill] sm:$0xff] %v2368_v55  ;;  %v2401_v55 = vld [vmem:[#allocation8 + $0x270] sm:$0xff]  ;;  %361 = vmatpush.msrb.mxu2 %v2398_v54 }
  0x6a   :  { %3420 = vst [vmem:[#allocation71_spill] sm:$0xff] %v2371_v52  ;;  %v2404_v52 = vld [vmem:[#allocation8 + $0x258] sm:$0xff]  ;;  %339 = vmatpush.msrb.mxu1 %v2401_v55 }
  0x6b   :  { %3421 = vst [vmem:[#allocation72_spill] sm:$0xff] %v2374_v53  ;;  %v2407_v53 = vld [vmem:[#allocation8 + $0x50] sm:$0xff]  ;;  %380 = vmatpush.msrb.mxu3 %v2404_v52 }
  0x6c   :  { %3422 = vst [vmem:[#allocation73_spill] sm:$0xff] %v2377_v57  ;;  %v2410_v57 = vld [vmem:[#allocation8 + $0x18] sm:$0xff]  ;;  %320 = vmatpush.msrb.mxu0 %v2407_v53 }
  0x6d   :  { %3423 = vst [vmem:[#allocation74_spill] sm:$0xff] %v2380_v59  ;;  %v2413_v59 = vld [vmem:[#allocation8 + $0x250] sm:$0xff]  ;;  %362 = vmatpush.msrb.mxu2 %v2410_v57 }
  0x6e   :  { %3424 = vst [vmem:[#allocation75_spill] sm:$0xff] %v2383_v58  ;;  %v2416_v58 = vld [vmem:[#allocation8 + $0x238] sm:$0xff]  ;;  %340 = vmatpush.msrb.mxu1 %v2413_v59  ;;  %363 = vmatmul.f32.vlgmr.msrb.gmra.mxu2 %v2229_v62 }
  0x6f   :  { %3425 = vst [vmem:[#allocation76_spill] sm:$0xff] %v2386_v60  ;;  %v2421_v60 = vld [vmem:[#allocation8 + $0x30] sm:$0xff]  ;;  %381 = vmatpush.msrb.mxu3 %v2416_v58  ;;  %604 = vmatpush.msra.mxu2 %v2046_v1 }
  0x70   :  { %3426 = vst [vmem:[#allocation77_spill] sm:$0xff] %v2389_v61  ;;  %v2423_v61 = vld [vmem:[#allocation8 + $0x230] sm:$0xff]  ;;  %321 = vmatpush.msrb.mxu0 %v2421_v60 }
  0x71   :  { %3427 = vst [vmem:[#allocation78_spill] sm:$0xff] %v2392_v51  ;;  %v2426_v51 = vld [vmem:[#allocation8 + $0x218] sm:$0xff]  ;;  %341 = vmatpush.msrb.mxu1 %v2423_v61  ;;  %605 = vmatpush.msra.mxu2 %v2054_v4  ;;  %v3431_v1 = vld [vmem:[#allocation16_spill] sm:$0xff] }
  0x72   :  { %3428 = vst [vmem:[#allocation79_spill] sm:$0xff] %v2398_v54  ;;  %v2431_v54 = vld [vmem:[#allocation8 + $0x10] sm:$0xff]  ;;  %382 = vmatpush.msrb.mxu3 %v2426_v51 }
  0x73   :  { %3429 = vst [vmem:[#allocation80_spill] sm:$0xff] %v2404_v52  ;;  %v2435_v52 = vld [vmem:[#allocation8 + $0x210] sm:$0xff]  ;;  %383 = vmatmul.f32.vlgmr.msrb.gmra.mxu3 %v2241_v56  ;;  %322 = vmatpush.msrb.mxu0 %v2431_v54 }
  0x74   :  { %323 = vmatmul.f32.vlgmr.msrb.gmra.mxu0 %v2229_v62  ;;  %342 = vmatpush.msrb.mxu1 %v2435_v52  ;;  %v3434_v4 = vld [vmem:[#allocation21_spill] sm:$0xff]  ;;  %v3481_v62 = vld [vmem:[#allocation71_spill] sm:$0xff] }
  0x75   :  { %343 = vmatmul.f32.vlgmr.msrb.gmra.mxu1 %v2241_v56  ;;  %564 = vmatpush.msra.mxu0 %v2044_v0  ;;  %v3430_v0 = vld [vmem:[#allocation17_spill] sm:$0xff] }
  0x76   :  { %584 = vmatpush.msra.mxu1 %v2052_v3  ;;  %624 = vmatpush.msra.mxu3 %v2056_v5  ;;  %v3433_v3 = vld [vmem:[#allocation18_spill] sm:$0xff]  ;;  %v3435_v5 = vld [vmem:[#allocation20_spill] sm:$0xff] }
  0x77   :  { %565 = vmatpush.msra.mxu0 %v2048_v2  ;;  %606 = vmatpush.msra.mxu2 %v2064_v8  ;;  %v3432_v2 = vld [vmem:[#allocation15_spill] sm:$0xff]  ;;  %v3438_v8 = vld [vmem:[#allocation25_spill] sm:$0xff] }
  0x78   :  { %585 = vmatpush.msra.mxu1 %v2062_v7  ;;  %625 = vmatpush.msra.mxu3 %v2068_v9  ;;  %v3437_v7 = vld [vmem:[#allocation22_spill] sm:$0xff]  ;;  %v3439_v9 = vld [vmem:[#allocation24_spill] sm:$0xff] }
  0x79   :  { %566 = vmatpush.msra.mxu0 %v2060_v6  ;;  %607 = vmatpush.msra.mxu2 %v2076_v12  ;;  %v3436_v6 = vld [vmem:[#allocation19_spill] sm:$0xff]  ;;  %v3442_v12 = vld [vmem:[#allocation26_spill] sm:$0xff] }
  0x7a   :  { %586 = vmatpush.msra.mxu1 %v2070_v10  ;;  %626 = vmatpush.msra.mxu3 %v2078_v13  ;;  %v3440_v10 = vld [vmem:[#allocation23_spill] sm:$0xff] }
  0x7b   :  { %567 = vmatpush.msra.mxu0 %v2074_v11  ;;  %608 = vmatpush.msra.mxu2 %v2090_v17  ;;  %v3441_v11 = vld [vmem:[#allocation31_spill] sm:$0xff]  ;;  %v3447_v17 = vld [vmem:[#allocation29_spill] sm:$0xff] }
  0x7c   :  { %587 = vmatpush.msra.mxu1 %v2082_v14  ;;  %627 = vmatpush.msra.mxu3 %v2084_v15  ;;  %v3443_v13 = vld [vmem:[#allocation27_spill] sm:$0xff]  ;;  %v3444_v14 = vld [vmem:[#allocation28_spill] sm:$0xff] }
  0x7d   :  { %568 = vmatpush.msra.mxu0 %v2088_v16  ;;  %609 = vmatpush.msra.mxu2 %v2102_v21  ;;  %v3445_v15 = vld [vmem:[#allocation35_spill] sm:$0xff]  ;;  %v3446_v16 = vld [vmem:[#allocation33_spill] sm:$0xff]  ;;  %v3451_v21 = vld [vmem:[#allocation32_spill] sm:$0xff] }
  0x7e   :  { %588 = vmatpush.msra.mxu1 %v2094_v18  ;;  %628 = vmatpush.msra.mxu3 %v2096_v19  ;;  %v3448_v18 = vld [vmem:[#allocation30_spill] sm:$0xff]  ;;  %v3449_v19 = vld [vmem:[#allocation39_spill] sm:$0xff] }
  0x7f   :  { %569 = vmatpush.msra.mxu0 %v2100_v20  ;;  %610 = vmatpush.msra.mxu2 %v2114_v25  ;;  %v3450_v20 = vld [vmem:[#allocation37_spill] sm:$0xff]  ;;  %v3455_v25 = vld [vmem:[#allocation36_spill] sm:$0xff] }
  0x80   :  { %589 = vmatpush.msra.mxu1 %v2106_v22  ;;  %629 = vmatpush.msra.mxu3 %v2108_v23  ;;  %v3452_v22 = vld [vmem:[#allocation34_spill] sm:$0xff]  ;;  %v3453_v23 = vld [vmem:[#allocation43_spill] sm:$0xff] }
  0x81   :  { %570 = vmatpush.msra.mxu0 %v2112_v24  ;;  %611 = vmatpush.msra.mxu2 %v2126_v29  ;;  %v3454_v24 = vld [vmem:[#allocation41_spill] sm:$0xff]  ;;  %v3459_v29 = vld [vmem:[#allocation40_spill] sm:$0xff] }
  0x82   :  { %590 = vmatpush.msra.mxu1 %v2118_v26  ;;  %630 = vmatpush.msra.mxu3 %v2120_v27  ;;  %v3456_v26 = vld [vmem:[#allocation38_spill] sm:$0xff]  ;;  %v3457_v27 = vld [vmem:[#allocation47_spill] sm:$0xff] }
  0x83   :  { %571 = vmatpush.msra.mxu0 %v2124_v28  ;;  %612 = vmatpush.msra.mxu2 %v2138_v33  ;;  %v3458_v28 = vld [vmem:[#allocation45_spill] sm:$0xff]  ;;  %v3463_v33 = vld [vmem:[#allocation44_spill] sm:$0xff] }
  0x84   :  { %591 = vmatpush.msra.mxu1 %v2130_v30  ;;  %631 = vmatpush.msra.mxu3 %v2132_v31  ;;  %v3460_v30 = vld [vmem:[#allocation42_spill] sm:$0xff]  ;;  %v3461_v31 = vld [vmem:[#allocation51_spill] sm:$0xff] }
  0x85   :  { %572 = vmatpush.msra.mxu0 %v2136_v32  ;;  %613 = vmatpush.msra.mxu2 %v2150_v37  ;;  %v3462_v32 = vld [vmem:[#allocation49_spill] sm:$0xff]  ;;  %v3467_v37 = vld [vmem:[#allocation48_spill] sm:$0xff] }
  0x86   :  { %592 = vmatpush.msra.mxu1 %v2142_v34  ;;  %632 = vmatpush.msra.mxu3 %v2144_v35  ;;  %v3464_v34 = vld [vmem:[#allocation46_spill] sm:$0xff]  ;;  %v3465_v35 = vld [vmem:[#allocation55_spill] sm:$0xff] }
  0x87   :  { %573 = vmatpush.msra.mxu0 %v2148_v36  ;;  %614 = vmatpush.msra.mxu2 %v2162_v41  ;;  %v3466_v36 = vld [vmem:[#allocation53_spill] sm:$0xff]  ;;  %v3471_v41 = vld [vmem:[#allocation52_spill] sm:$0xff] }
  0x88   :  { %593 = vmatpush.msra.mxu1 %v2154_v38  ;;  %633 = vmatpush.msra.mxu3 %v2156_v39  ;;  %v3468_v38 = vld [vmem:[#allocation50_spill] sm:$0xff]  ;;  %v3469_v39 = vld [vmem:[#allocation59_spill] sm:$0xff] }
  0x89   :  { %574 = vmatpush.msra.mxu0 %v2160_v40  ;;  %615 = vmatpush.msra.mxu2 %v2176_v45  ;;  %v3470_v40 = vld [vmem:[#allocation57_spill] sm:$0xff]  ;;  %v3475_v45 = vld [vmem:[#allocation56_spill] sm:$0xff] }
  0x8a   :  { %594 = vmatpush.msra.mxu1 %v2168_v42  ;;  %634 = vmatpush.msra.mxu3 %v2170_v43  ;;  %v3472_v42 = vld [vmem:[#allocation54_spill] sm:$0xff]  ;;  %v3473_v43 = vld [vmem:[#allocation63_spill] sm:$0xff] }
  0x8b   :  { %575 = vmatpush.msra.mxu0 %v2174_v44  ;;  %616 = vmatpush.msra.mxu2 %v2188_v49  ;;  %v3474_v44 = vld [vmem:[#allocation61_spill] sm:$0xff]  ;;  %v3479_v49 = vld [vmem:[#allocation60_spill] sm:$0xff] }
  0x8c   :  { %595 = vmatpush.msra.mxu1 %v2180_v46  ;;  %635 = vmatpush.msra.mxu3 %v2182_v47  ;;  %v3476_v46 = vld [vmem:[#allocation58_spill] sm:$0xff]  ;;  %v3477_v47 = vld [vmem:[#allocation67_spill] sm:$0xff] }
  0x8d   :  { %576 = vmatpush.msra.mxu0 %v2186_v48  ;;  %617 = vmatpush.msra.mxu2 %v3430_v0  ;;  %v3478_v48 = vld [vmem:[#allocation65_spill] sm:$0xff] }
  0x8e   :  { %596 = vmatpush.msra.mxu1 %v2192_v50  ;;  %636 = vmatpush.msra.mxu3 %v3432_v2  ;;  %v3480_v50 = vld [vmem:[#allocation62_spill] sm:$0xff]  ;;  %v3482_v0 = vld [vmem:[#allocation69_spill] sm:$0xff] }
  0x8f   :  { %577 = vmatpush.msra.mxu0 %v3431_v1  ;;  %618 = vmatpush.msra.mxu2 %v3434_v4  ;;  %v3483_v1 = vld [vmem:[#allocation64_spill] sm:$0xff]  ;;  %v3484_v2 = vld [vmem:[#allocation66_spill] sm:$0xff]  ;;  %v3486_v4 = vld [vmem:[#allocation73_spill] sm:$0xff] }
  0x90   :  { %597 = vmatpush.msra.mxu1 %v3433_v3  ;;  %637 = vmatpush.msra.mxu3 %v3436_v6  ;;  %v3485_v3 = vld [vmem:[#allocation75_spill] sm:$0xff]  ;;  %v3488_v6 = vld [vmem:[#allocation70_spill] sm:$0xff] }
  0x91   :  { %578 = vmatpush.msra.mxu0 %v3435_v5  ;;  %619 = vmatpush.msra.mxu2 %v3438_v8  ;;  %v3487_v5 = vld [vmem:[#allocation68_spill] sm:$0xff] }
  0x92   :  { %598 = vmatpush.msra.mxu1 %v3437_v7  ;;  %638 = vmatpush.msra.mxu3 %v3440_v10  ;;  %v3489_v7 = vld [vmem:[#allocation77_spill] sm:$0xff]  ;;  %v3490_v8 = vld [vmem:[#allocation72_spill] sm:$0xff] }
  0x93   :  { %579 = vmatpush.msra.mxu0 %v3439_v9  ;;  %684 = vmatpush.msrb.mxu2 %v3442_v12  ;;  %v3491_v9 = vld [vmem:[#allocation74_spill] sm:$0xff]  ;;  %v3492_v10 = vld [vmem:[#allocation76_spill] sm:$0xff]  ;;  %v3494_v12 = vld [vmem:[#allocation79_spill] sm:$0xff] }
  0x94   :  { %599 = vmatpush.msra.mxu1 %v3443_v13  ;;  %639 = vmatpush.msra.mxu3 %v3444_v14 }
  0x95   :  { %644 = vmatpush.msrb.mxu0 %v3441_v11  ;;  %685 = vmatpush.msrb.mxu2 %v3447_v17  ;;  %v3493_v11 = vld [vmem:[#allocation78_spill] sm:$0xff] }
  0x96   :  { %664 = vmatpush.msrb.mxu1 %v3446_v16  ;;  %704 = vmatpush.msrb.mxu3 %v3448_v18 }
  0x97   :  { %645 = vmatpush.msrb.mxu0 %v3445_v15  ;;  %686 = vmatpush.msrb.mxu2 %v3451_v21 }
  0x98   :  { %665 = vmatpush.msrb.mxu1 %v3450_v20  ;;  %705 = vmatpush.msrb.mxu3 %v3452_v22  ;;  %v435_v22 = vld [vmem:[%s434_s19] sm:$0x1] }
  0x99   :  { %646 = vmatpush.msrb.mxu0 %v3449_v19  ;;  %687 = vmatpush.msrb.mxu2 %v3455_v25 }
  0x9a   :  { %666 = vmatpush.msrb.mxu1 %v3454_v24  ;;  %706 = vmatpush.msrb.mxu3 %v3456_v26 }
  0x9b   :  { %647 = vmatpush.msrb.mxu0 %v3453_v23  ;;  %688 = vmatpush.msrb.mxu2 %v3459_v29 }
  0x9c   :  { %667 = vmatpush.msrb.mxu1 %v3458_v28  ;;  %707 = vmatpush.msrb.mxu3 %v3460_v30  ;;  %v2585_v30 = vld [vmem:[#allocation8 + $0x1e0] sm:$0xff] }
  0x9d   :  { %648 = vmatpush.msrb.mxu0 %v3457_v27  ;;  %689 = vmatpush.msrb.mxu2 %v3463_v33 }
  0x9e   :  { %668 = vmatpush.msrb.mxu1 %v3462_v32  ;;  %708 = vmatpush.msrb.mxu3 %v3464_v34  ;;  %v2589_v32 = vld [vmem:[#allocation8 + $0x1c0] sm:$0xff] }
  0x9f   :  { %649 = vmatpush.msrb.mxu0 %v3461_v31  ;;  %690 = vmatpush.msrb.mxu2 %v3467_v37  ;;  %v2587_v31 = vld [vmem:[#allocation8 + $0x1e8] sm:$0xff]  ;;  %v2595_v37 = vld [vmem:[#allocation8 + $0x1a0] sm:$0xff] }
  0xa0   :  { %669 = vmatpush.msrb.mxu1 %v3466_v36  ;;  %709 = vmatpush.msrb.mxu3 %v3468_v38  ;;  %v2597_v38 = vld [vmem:[#allocation8 + $0x1a8] sm:$0xff] }
  0xa1   :  { %650 = vmatpush.msrb.mxu0 %v3465_v35  ;;  %691 = vmatpush.msrb.mxu2 %v3471_v41  ;;  %v2593_v35 = vld [vmem:[#allocation8 + $0x1c8] sm:$0xff] }
  0xa2   :  { %670 = vmatpush.msrb.mxu1 %v3470_v40  ;;  %710 = vmatpush.msrb.mxu3 %v3472_v42 }
  0xa3   :  { %651 = vmatpush.msrb.mxu0 %v3469_v39  ;;  %692 = vmatpush.msrb.mxu2 %v3475_v45 }
  0xa4   :  { %671 = vmatpush.msrb.mxu1 %v3474_v44  ;;  %711 = vmatpush.msrb.mxu3 %v3476_v46  ;;  %v2608_v46 = vld [vmem:[#allocation8 + $0x180] sm:$0xff] }
  0xa5   :  { %652 = vmatpush.msrb.mxu0 %v3473_v43  ;;  %693 = vmatpush.msrb.mxu2 %v3479_v49  ;;  %v2724_v44 = vld [vmem:[#allocation8 + $0x2c0] sm:$0xff] }
  0xa6   :  { %672 = vmatpush.msrb.mxu1 %v3478_v48  ;;  %712 = vmatpush.msrb.mxu3 %v3480_v50  ;;  %3508 = vst [vmem:[#allocation23_spill] sm:$0xff] %v2724_v44 }
  0xa7   :  { %653 = vmatpush.msrb.mxu0 %v3477_v47  ;;  %694 = vmatpush.msrb.mxu2 %v3483_v1  ;;  %v2610_v47 = vld [vmem:[#allocation8 + $0x188] sm:$0xff] }
  0xa8   :  { %673 = vmatpush.msrb.mxu1 %v3482_v0  ;;  %713 = vmatpush.msrb.mxu3 %v3484_v2 }
  0xa9   :  { %654 = vmatpush.msrb.mxu0 %v3481_v62  ;;  %695 = vmatpush.msrb.mxu2 %v3487_v5 }
  0xaa   :  { %674 = vmatpush.msrb.mxu1 %v3486_v4  ;;  %714 = vmatpush.msrb.mxu3 %v3488_v6 }
  0xab   :  { %655 = vmatpush.msrb.mxu0 %v3485_v3  ;;  %696 = vmatpush.msrb.mxu2 %v3490_v8 }
  0xac   :  { %675 = vmatpush.msrb.mxu1 %v3489_v7  ;;  %715 = vmatpush.msrb.mxu3 %v3491_v9 }
  0xad   :  { %656 = vmatpush.msrb.mxu0 %v2395_v63  ;;  %697 = vmatpush.msrb.mxu2 %v3492_v10  ;;  %v3495_v63 = vld [vmem:[#allocation80_spill] sm:$0xff] }
  0xae   :  { %676 = vmatpush.msrb.mxu1 %v2401_v55  ;;  %716 = vmatpush.msrb.mxu3 %v3493_v11 }
  0xaf   :  { %657 = vmatpush.msrb.mxu0 %v2407_v53  ;;  %698 = vmatpush.msrb.mxu2 %v3494_v12  ;;  %v85_v53 = vld [vmem:[#allocation9] sm:$0xf] }
  0xb0   :  { %677 = vmatpush.msrb.mxu1 %v2413_v59  ;;  %717 = vmatpush.msrb.mxu3 %v3495_v63  ;;  %v2571_v55 = vperm.slane %v85_v53, 0  ;;  %v2574_v15 = vperm.slane %v85_v53, 1  ;;  %v2581_v27 = vperm.slane %v85_v53, 2  ;;  %v2583_v29 = vperm.slane %v85_v53, 3 }
  0xb1   :  { %658 = vmatpush.msrb.mxu0 %v2421_v60  ;;  %699 = vmatpush.msrb.mxu2 %v2410_v57 }
  0xb2   :  { %678 = vmatpush.msrb.mxu1 %v2423_v61  ;;  %718 = vmatpush.msrb.mxu3 %v2416_v58  ;;  %3496 = vst [vmem:[#allocation17_spill] sm:$0xff] %v2571_v55 }
  0xb3   :  { %659 = vmatpush.msrb.mxu0 %v2431_v54  ;;  %3497 = vst [vmem:[#allocation16_spill] sm:$0xff] %v2574_v15  ;;  %620 = vmatmul.f32.vlgmr.msra.gmra.mxu2 %v435_v22 }
  0xb4   :  { %679 = vmatpush.msrb.mxu1 %v2435_v52  ;;  %719 = vmatpush.msrb.mxu3 %v2426_v51  ;;  %3498 = vst [vmem:[#allocation15_spill] sm:$0xff] %v2581_v27 }
  0xb5   :  { %580 = vmatmul.f32.vlgmr.msra.gmra.mxu0 %v435_v22  ;;  %3499 = vst [vmem:[#allocation18_spill] sm:$0xff] %v2583_v29  ;;  %942 = vmatpush.msra.mxu2 %v2587_v31 }
  0xb6   :  { %902 = vmatpush.msra.mxu0 %v2585_v30 }
  0xb7   :  { %v244_v59 = vpop.f32.mrf.mxu0  ;;  %943 = vmatpush.msra.mxu2 %v2593_v35 }
  0xb8   :  { %v245_v60 = vadd.f32 %v244_v59, %v2571_v55  ;;  %903 = vmatpush.msra.mxu0 %v2589_v32  ;;  %v2624_v59 = vld [vmem:[#allocation8 + $0x3e0] sm:$0xff] }
  0xb9   :  { %v264_v13 = vpop.f32.mrf.mxu1  ;;  %944 = vmatpush.msra.mxu2 %v2597_v38 }
  0xba   :  { %v265_v14 = vadd.f32 %v264_v13, %v245_v60  ;;  %904 = vmatpush.msra.mxu0 %v2595_v37  ;;  %v2626_v60 = vld [vmem:[#allocation8 + $0x3e8] sm:$0xff]  ;;  %v2634_v13 = vld [vmem:[#allocation8 + $0x3c0] sm:$0xff] }
  0xbb   :  { %700 = vmatmul.f32.vlgmr.msrb.gmra.mxu2 %v435_v22 }
  0xbc   :  { %v1797_v54 = vmul.f32 -1.442695, %v265_v14  ;;  %905 = vmatpush.msra.mxu0 %v2608_v46  ;;  %945 = vmatpush.msra.mxu2 %v2610_v47  ;;  %v2636_v14 = vld [vmem:[#allocation8 + $0x3c8] sm:$0xff] }
  0xbd   :  { %v284_v61 = vpop.f32.mrf.mxu2  ;;  %660 = vmatmul.f32.vlgmr.msrb.gmra.mxu0 %v435_v22  ;;  %v2682_v22 = vld [vmem:[#allocation8 + $0x348] sm:$0xff] }
  0xbe   :  { %1824 = vpow2.f32 %v1797_v54  ;;  %v285_v57 = vadd.f32 %v284_v61, %v2574_v15  ;;  %v2642_v54 = vld [vmem:[#allocation8 + $0x3a8] sm:$0xff]  ;;  %v2650_v61 = vld [vmem:[#allocation8 + $0x160] sm:$0xff] }
  0xbf   :  { %906 = vmatpush.msra.mxu0 %v2650_v61 }
  0xc0   :  { %v304_v58 = vpop.f32.mrf.mxu3 }
  0xc1   :  { %v305_v16 = vadd.f32 %v304_v58, %v285_v57  ;;  %v2652_v57 = vld [vmem:[#allocation8 + $0x380] sm:$0xff]  ;;  %v2654_v58 = vld [vmem:[#allocation8 + $0x168] sm:$0xff] }
  0xc2   :  { %946 = vmatpush.msra.mxu2 %v2654_v58 }
  0xc3   :  { %v1798_v52 = vmul.f32 -1.442695, %v305_v16  ;;  %v2658_v16 = vld [vmem:[#allocation8 + $0x388] sm:$0xff] }
  0xc4   :  { %v1825_v17 = vpop.eup %1824 }
  0xc5   :  { %v390_v51 = vadd.f32 1.0, %v1825_v17  ;;  %1826 = vpow2.f32 %v1798_v52  ;;  %v2662_v52 = vld [vmem:[#allocation8 + $0x140] sm:$0xff] }
  0xc6   :  { %v2664_v17 = vld [vmem:[#allocation8 + $0x360] sm:$0xff]  ;;  %907 = vmatpush.msra.mxu0 %v2662_v52 }
  0xc7   :  { %1828 = vrcp.f32 %v390_v51  ;;  %vm396_vm0 = vweird.f32 %v390_v51  ;;  %v402_v36 = vand.u32 2147483648, %v390_v51  ;;  %v400_v41 = vand.u32 2147483647, %v390_v51 }
  0xc9   :  { %v403_v50 = vor.u32 1.1754944e-38, %v402_v36  ;;  %vm401_vm5 = vcmp.eq.f32.partialorder %v400_v41, 8.507059e+37  ;;  %v2706_v36 = vld [vmem:[#allocation8 + $0x308] sm:$0xff] }
  0xca   :  { %3505 = vst [vmem:[#allocation22_spill] sm:$0xff] %v2706_v36  ;;  %v2714_v41 = vld [vmem:[#allocation8 + $0xc8] sm:$0xff] }
  0xcb   :  { %v1827_v18 = vpop.eup %1826 }
  0xcc   :  { %v2577_v19 = vadd.f32 1.0, %v1827_v18  ;;  %v2670_v18 = vld [vmem:[#allocation8 + $0x368] sm:$0xff] }
  0xcd   :  { %v1829_v20 = vpop.eup %1828 }
  0xce   :  { %1830 = vrcp.f32 %v2577_v19  ;;  %v392_v21 = vmul.f32 %v1829_v20, %v390_v51  ;;  %vm397_vm1 = vweird.f32 %v1829_v20  ;;  %vm415_vm3 = vweird.f32 %v2577_v19  ;;  %v2666_v51 = vld [vmem:[#allocation8 + $0x148] sm:$0xff] }
  0xcf   :  { %vm2604_vm2 = vmor %vm396_vm0, %vm397_vm1  ;;  %v421_v62 = vand.u32 2147483648, %v2577_v19  ;;  %v419_v4 = vand.u32 2147483647, %v2577_v19  ;;  %947 = vmatpush.msra.mxu2 %v2666_v51 }
  0xd0   :  { %v393_v23 = vsub.f32 1.0, %v392_v21  ;;  %v2678_v21 = vld [vmem:[#allocation8 + $0x128] sm:$0xff] }
  0xd1   :  { %v422_v6 = vor.u32 1.1754944e-38, %v421_v62  ;;  %vm420_vm7 = vcmp.eq.f32.partialorder %v419_v4, 8.507059e+37  ;;  %948 = vmatpush.msra.mxu2 %v2678_v21  ;;  %v2738_v62 = vld [vmem:[#allocation8 + $0x88] sm:$0xff] }
  0xd2   :  { %v394_v26 = vmul.f32 %v1829_v20, %v393_v23  ;;  %v2686_v23 = vld [vmem:[#allocation8 + $0x100] sm:$0xff]  ;;  %v2754_v4 = vld [vmem:[#allocation8 + $0x288] sm:$0xff] }
  0xd3   :  { %3513 = vst [vmem:[#allocation35_spill] sm:$0xff] %v2754_v4 }
  0xd4   :  { %v1831_v24 = vpop.eup %1830  ;;  %v395_v34 = vadd.f32 %v1829_v20, %v394_v26  ;;  %v2694_v26 = vld [vmem:[#allocation8 + $0x328] sm:$0xff] }
  0xd5   :  { %v411_v25 = vmul.f32 %v1831_v24, %v2577_v19  ;;  %vm416_vm4 = vweird.f32 %v1831_v24  ;;  %v2674_v19 = vld [vmem:[#allocation8 + $0x120] sm:$0xff]  ;;  %3503 = vst [vmem:[#allocation20_spill] sm:$0xff] %v2694_v26 }
  0xd6   :  { %v399_v48 = vsel %vm2604_vm2, %v1829_v20, %v395_v34  ;;  %vm417_vm6 = vmor %vm415_vm3, %vm416_vm4  ;;  %v2676_v20 = vld [vmem:[#allocation8 + $0x340] sm:$0xff]  ;;  %908 = vmatpush.msra.mxu0 %v2674_v19  ;;  %v2702_v34 = vld [vmem:[#allocation8 + $0xe8] sm:$0xff] }
  0xd7   :  { %v412_v28 = vsub.f32 1.0, %v411_v25  ;;  %v404_v2 = vsel %vm401_vm5, %v403_v50, %v399_v48  ;;  %v2690_v25 = vld [vmem:[#allocation8 + $0x108] sm:$0xff]  ;;  %v2736_v50 = vld [vmem:[#allocation8 + $0x2a0] sm:$0xff] }
  0xd8   :  { %909 = vmatpush.msra.mxu0 %v2686_v23  ;;  %949 = vmatpush.msra.mxu2 %v2690_v25  ;;  %v2730_v48 = vld [vmem:[#allocation8 + $0x2c8] sm:$0xff]  ;;  %3510 = vst [vmem:[#allocation26_spill] sm:$0xff] %v2736_v50 }
  0xd9   :  { %v413_v42 = vmul.f32 %v1831_v24, %v412_v28  ;;  %v2698_v28 = vld [vmem:[#allocation8 + $0xe0] sm:$0xff]  ;;  %3509 = vst [vmem:[#allocation31_spill] sm:$0xff] %v2730_v48 }
  0xda   :  { %910 = vmatpush.msra.mxu0 %v2698_v28  ;;  %950 = vmatpush.msra.mxu2 %v2702_v34 }
  0xdb   :  { %v414_v3 = vadd.f32 %v1831_v24, %v413_v42  ;;  %v2718_v42 = vld [vmem:[#allocation8 + $0x2e8] sm:$0xff] }
  0xdc   :  { %3507 = vst [vmem:[#allocation24_spill] sm:$0xff] %v2718_v42  ;;  %951 = vmatpush.msra.mxu2 %v2714_v41 }
  0xdd   :  { %v418_v8 = vsel %vm417_vm6, %v1831_v24, %v414_v3  ;;  %v2688_v24 = vld [vmem:[#allocation8 + $0x320] sm:$0xff]  ;;  %v2750_v3 = vld [vmem:[#allocation8 + $0x68] sm:$0xff] }
  0xde   :  { %v423_v9 = vsel %vm420_vm7, %v422_v6, %v418_v8  ;;  %3502 = vst [vmem:[#allocation21_spill] sm:$0xff] %v2688_v24  ;;  %v2760_v6 = vld [vmem:[#allocation8 + $0x260] sm:$0xff]  ;;  %v2766_v8 = vld [vmem:[#allocation8 + $0x268] sm:$0xff] }
  0xdf   :  { %v428_v10 = vsub.f32 1.0, %v423_v9  ;;  %v430_v63 = vmul.f32 %v423_v9, %v2241_v56  ;;  %v2640_v56 = vld [vmem:[#allocation8 + $0x3a0] sm:$0xff]  ;;  %3514 = vst [vmem:[#allocation33_spill] sm:$0xff] %v2760_v6 }
  0xe0   :  { %3515 = vst [vmem:[#allocation29_spill] sm:$0xff] %v2766_v8  ;;  %v2770_v9 = vld [vmem:[#allocation8 + $0x20] sm:$0xff] }
  0xf1   :  { %v324_v33 = vpop.f32.mrf.mxu0  ;;  %v364_v39 = vpop.f32.mrf.mxu2 }
  0xf2   :  { %v325_v40 = vadd.f32 %v324_v33, %v2581_v27  ;;  %v365_v43 = vadd.f32 %v364_v39, %v2583_v29  ;;  %v344_v45 = vpop.f32.mrf.mxu1  ;;  %v2700_v33 = vld [vmem:[#allocation8 + $0x300] sm:$0xff] }
  0xf3   :  { %3504 = vst [vmem:[#allocation19_spill] sm:$0xff] %v2700_v33  ;;  %v2710_v39 = vld [vmem:[#allocation8 + $0xc0] sm:$0xff] }
  0xf4   :  { %v345_v1 = vadd.f32 %v344_v45, %v325_v40  ;;  %v2712_v40 = vld [vmem:[#allocation8 + $0x2e0] sm:$0xff]  ;;  %911 = vmatpush.msra.mxu0 %v2710_v39  ;;  %v2726_v45 = vld [vmem:[#allocation8 + $0xa8] sm:$0xff] }
  0xf5   :  { %3506 = vst [vmem:[#allocation25_spill] sm:$0xff] %v2712_v40  ;;  %952 = vmatpush.msra.mxu2 %v2726_v45 }
  0xf6   :  { %v384_v49 = vpop.f32.mrf.mxu3 }
  0xf7   :  { %v385_v0 = vadd.f32 %v384_v49, %v365_v43  ;;  %v2722_v43 = vld [vmem:[#allocation8 + $0xa0] sm:$0xff]  ;;  %953 = vmatpush.msra.mxu2 %v2738_v62 }
  0xf8   :  { %912 = vmatpush.msra.mxu0 %v2722_v43  ;;  %v2734_v49 = vld [vmem:[#allocation8 + $0x80] sm:$0xff] }
  0xf9   :  { %v425_v5 = vmul.f32 %v404_v2, %v385_v0  ;;  %v2742_v0 = vld [vmem:[#allocation8 + $0x2a8] sm:$0xff]  ;;  %v2748_v2 = vld [vmem:[#allocation8 + $0x280] sm:$0xff]  ;;  %954 = vmatpush.msra.mxu2 %v2750_v3 }
  0xfa   :  { %913 = vmatpush.msra.mxu0 %v2734_v49  ;;  %3511 = vst [vmem:[#allocation27_spill] sm:$0xff] %v2742_v0 }
  0xfb   :  { %v426_v7 = vadd.f32 %v425_v5, %v345_v1  ;;  %v2746_v1 = vld [vmem:[#allocation8 + $0x60] sm:$0xff]  ;;  %3512 = vst [vmem:[#allocation28_spill] sm:$0xff] %v2748_v2 }
  0xfc   :  { %914 = vmatpush.msra.mxu0 %v2746_v1  ;;  %v2758_v5 = vld [vmem:[#allocation8 + $0x40] sm:$0xff] }
  0xfd   :  { %1832 = vtanh.f32 %v426_v7  ;;  %v2762_v7 = vld [vmem:[#allocation8 + $0x48] sm:$0xff] }
  0xfe   :  { %915 = vmatpush.msra.mxu0 %v2758_v5  ;;  %955 = vmatpush.msra.mxu2 %v2762_v7 }
 0x100   :  { %916 = vmatpush.msra.mxu0 %v2770_v9 }
 0x103   :  { %v1833_v11 = vpop.eup %1832 }
 0x104   :  { %v429_v12 = vmul.f32 %v1833_v11, %v428_v10  ;;  %v2772_v10 = vld [vmem:[#allocation8 + $0x240] sm:$0xff]  ;;  %v2774_v11 = vld [vmem:[#allocation8 + $0x28] sm:$0xff] }
 0x105   :  { %3516 = vst [vmem:[#allocation30_spill] sm:$0xff] %v2772_v10  ;;  %956 = vmatpush.msra.mxu2 %v2774_v11 }
 0x106   :  { %v2622_v53 = vadd.f32 %v430_v63, %v429_v12  ;;  %v2778_v12 = vld [vmem:[#allocation8 + $0x248] sm:$0xff]  ;;  %v2782_v63 = vld [vmem:[#allocation8] sm:$0xff] }
 0x107   :  { %3517 = vst [vmem:[#allocation39_spill] sm:$0xff] %v2778_v12  ;;  %917 = vmatpush.msra.mxu0 %v2782_v63 }
 0x108   :  { %432 = vst [vmem:[%s3206_s5] sm:$0x1] %v2622_v53  ;;  %600 = vmatmul.f32.vlgmr.msra.gmra.mxu1 %v2622_v53  ;;  %640 = vmatmul.f32.vlgmr.msra.gmra.mxu3 %v2622_v53 }
 0x109   :  { %922 = vmatpush.msra.mxu1 %v2624_v59  ;;  %962 = vmatpush.msra.mxu3 %v2626_v60 }
 0x10b   :  { %923 = vmatpush.msra.mxu1 %v2634_v13  ;;  %963 = vmatpush.msra.mxu3 %v2636_v14 }
 0x10d   :  { %924 = vmatpush.msra.mxu1 %v2640_v56  ;;  %964 = vmatpush.msra.mxu3 %v2642_v54 }
 0x10f   :  { %925 = vmatpush.msra.mxu1 %v2652_v57  ;;  %965 = vmatpush.msra.mxu3 %v2658_v16 }
 0x110   :  { %680 = vmatmul.f32.vlgmr.msrb.gmra.mxu1 %v2622_v53  ;;  %720 = vmatmul.f32.vlgmr.msrb.gmra.mxu3 %v2622_v53 }
 0x111   :  { %926 = vmatpush.msra.mxu1 %v2664_v17  ;;  %966 = vmatpush.msra.mxu3 %v2670_v18 }
 0x113   :  { %927 = vmatpush.msra.mxu1 %v2676_v20  ;;  %967 = vmatpush.msra.mxu3 %v2682_v22 }
 0x115   :  { %928 = vmatpush.msra.mxu1 %v2688_v24  ;;  %968 = vmatpush.msra.mxu3 %v2694_v26 }
 0x117   :  { %929 = vmatpush.msra.mxu1 %v2700_v33  ;;  %969 = vmatpush.msra.mxu3 %v2706_v36  ;;  %v2824_v36 = vld [vmem:[#allocation8 + $0x3d8] sm:$0xff] }
 0x118   :  { %3531 = vst [vmem:[#allocation44_spill] sm:$0xff] %v2824_v36 }
 0x119   :  { %930 = vmatpush.msra.mxu1 %v2712_v40  ;;  %970 = vmatpush.msra.mxu3 %v2718_v42  ;;  %v2818_v42 = vld [vmem:[#allocation8 + $0x3d0] sm:$0xff]  ;;  %v2820_v40 = vld [vmem:[#allocation8 + $0x1b8] sm:$0xff] }
 0x11a   :  { %3529 = vst [vmem:[#allocation51_spill] sm:$0xff] %v2818_v42 }
 0x11b   :  { %931 = vmatpush.msra.mxu1 %v2724_v44  ;;  %971 = vmatpush.msra.mxu3 %v2730_v48  ;;  %v2808_v48 = vld [vmem:[#allocation8 + $0x1d8] sm:$0xff]  ;;  %3530 = vst [vmem:[#allocation49_spill] sm:$0xff] %v2820_v40 }
 0x11c   :  { %3526 = vst [vmem:[#allocation45_spill] sm:$0xff] %v2808_v48  ;;  %v2812_v44 = vld [vmem:[#allocation8 + $0x3f8] sm:$0xff] }
 0x11d   :  { %932 = vmatpush.msra.mxu1 %v2736_v50  ;;  %972 = vmatpush.msra.mxu3 %v2742_v0  ;;  %v2800_v0 = vld [vmem:[#allocation8 + $0x208] sm:$0xff]  ;;  %v2804_v50 = vld [vmem:[#allocation8 + $0x1d0] sm:$0xff]  ;;  %3527 = vst [vmem:[#allocation40_spill] sm:$0xff] %v2812_v44 }
 0x11e   :  { %3523 = vst [vmem:[#allocation36_spill] sm:$0xff] %v2800_v0 }
 0x11f   :  { %933 = vmatpush.msra.mxu1 %v2748_v2  ;;  %973 = vmatpush.msra.mxu3 %v2754_v4  ;;  %v2790_v4 = vld [vmem:[#allocation8 + $0x228] sm:$0xff]  ;;  %v2792_v2 = vld [vmem:[#allocation8 + $0x1f0] sm:$0xff]  ;;  %3524 = vst [vmem:[#allocation38_spill] sm:$0xff] %v2804_v50 }
 0x120   :  { %3519 = vst [vmem:[#allocation32_spill] sm:$0xff] %v2790_v4  ;;  %982 = vmatpush.msrb.mxu0 %v2792_v2 }
 0x121   :  { %934 = vmatpush.msra.mxu1 %v2760_v6  ;;  %974 = vmatpush.msra.mxu3 %v2766_v8  ;;  %v2784_v6 = vld [vmem:[#allocation8 + $0x220] sm:$0xff]  ;;  %v2786_v8 = vld [vmem:[#allocation8 + $0x8] sm:$0xff]  ;;  %3520 = vst [vmem:[#allocation34_spill] sm:$0xff] %v2792_v2 }
 0x122   :  { %3518 = vst [vmem:[#allocation37_spill] sm:$0xff] %v2784_v6  ;;  %957 = vmatpush.msra.mxu2 %v2786_v8  ;;  %983 = vmatpush.msrb.mxu0 %v2804_v50  ;;  %v2832_v50 = vld [vmem:[#allocation8 + $0x198] sm:$0xff] }
 0x123   :  { %935 = vmatpush.msra.mxu1 %v2772_v10  ;;  %975 = vmatpush.msra.mxu3 %v2778_v12  ;;  %v2794_v10 = vld [vmem:[#allocation8 + $0x1f8] sm:$0xff]  ;;  %v2798_v12 = vld [vmem:[#allocation8 + $0x200] sm:$0xff]  ;;  %3534 = vst [vmem:[#allocation53_spill] sm:$0xff] %v2832_v50 }
 0x124   :  { %3521 = vst [vmem:[#allocation43_spill] sm:$0xff] %v2794_v10  ;;  %1022 = vmatpush.msrb.mxu2 %v2794_v10 }
 0x125   :  { %936 = vmatpush.msra.mxu1 %v2784_v6  ;;  %976 = vmatpush.msra.mxu3 %v2790_v4  ;;  %3522 = vst [vmem:[#allocation41_spill] sm:$0xff] %v2798_v12  ;;  %v2806_v6 = vld [vmem:[#allocation8 + $0x3f0] sm:$0xff] }
 0x126   :  { %3525 = vst [vmem:[#allocation47_spill] sm:$0xff] %v2806_v6  ;;  %v2816_v4 = vld [vmem:[#allocation8 + $0x1b0] sm:$0xff]  ;;  %1023 = vmatpush.msrb.mxu2 %v2808_v48  ;;  %v2836_v48 = vld [vmem:[#allocation8 + $0x3b8] sm:$0xff] }
 0x127   :  { %937 = vmatpush.msra.mxu1 %v2798_v12  ;;  %977 = vmatpush.msra.mxu3 %v2800_v0  ;;  %3528 = vst [vmem:[#allocation42_spill] sm:$0xff] %v2816_v4  ;;  %v2828_v0 = vld [vmem:[#allocation8 + $0x190] sm:$0xff] }
 0x128   :  { %984 = vmatpush.msrb.mxu0 %v2816_v4  ;;  %3532 = vst [vmem:[#allocation46_spill] sm:$0xff] %v2828_v0  ;;  %1024 = vmatpush.msrb.mxu2 %v2820_v40  ;;  %v2842_v4 = vld [vmem:[#allocation8 + $0x390] sm:$0xff]  ;;  %v2849_v40 = vld [vmem:[#allocation8 + $0x398] sm:$0xff] }
 0x129   :  { %1002 = vmatpush.msrb.mxu1 %v2806_v6  ;;  %1042 = vmatpush.msrb.mxu3 %v2812_v44  ;;  %v2830_v6 = vld [vmem:[#allocation8 + $0x3b0] sm:$0xff]  ;;  %3535 = vst [vmem:[#allocation48_spill] sm:$0xff] %v2836_v48 }
 0x12a   :  { %3533 = vst [vmem:[#allocation55_spill] sm:$0xff] %v2830_v6  ;;  %985 = vmatpush.msrb.mxu0 %v2828_v0  ;;  %v2840_v44 = vld [vmem:[#allocation8 + $0x170] sm:$0xff]  ;;  %1025 = vmatpush.msrb.mxu2 %v2832_v50  ;;  %v2857_v0 = vld [vmem:[#allocation8 + $0x158] sm:$0xff] }
 0x12b   :  { %1003 = vmatpush.msrb.mxu1 %v2818_v42  ;;  %1043 = vmatpush.msrb.mxu3 %v2824_v36  ;;  %3536 = vst [vmem:[#allocation50_spill] sm:$0xff] %v2840_v44  ;;  %v2844_v42 = vld [vmem:[#allocation8 + $0x178] sm:$0xff]  ;;  %v2853_v36 = vld [vmem:[#allocation8 + $0x150] sm:$0xff] }
 0x12c   :  { %3537 = vst [vmem:[#allocation59_spill] sm:$0xff] %v2842_v4  ;;  %986 = vmatpush.msrb.mxu0 %v2840_v44  ;;  %1026 = vmatpush.msrb.mxu2 %v2844_v42  ;;  %v2865_v44 = vld [vmem:[#allocation8 + $0x130] sm:$0xff]  ;;  %v2869_v50 = vld [vmem:[#allocation8 + $0x138] sm:$0xff] }
 0x12d   :  { %1004 = vmatpush.msrb.mxu1 %v2830_v6  ;;  %3538 = vst [vmem:[#allocation57_spill] sm:$0xff] %v2844_v42  ;;  %1044 = vmatpush.msrb.mxu3 %v2836_v48  ;;  %v2855_v6 = vld [vmem:[#allocation8 + $0x370] sm:$0xff]  ;;  %v2883_v42 = vld [vmem:[#allocation8 + $0x118] sm:$0xff] }
 0x12e   :  { %3539 = vst [vmem:[#allocation52_spill] sm:$0xff] %v2849_v40  ;;  %987 = vmatpush.msrb.mxu0 %v2853_v36  ;;  %1027 = vmatpush.msrb.mxu2 %v2857_v0 }
 0x12f   :  { %1005 = vmatpush.msrb.mxu1 %v2842_v4  ;;  %3540 = vst [vmem:[#allocation54_spill] sm:$0xff] %v2853_v36  ;;  %1045 = vmatpush.msrb.mxu3 %v2849_v40  ;;  %v2867_v4 = vld [vmem:[#allocation8 + $0x350] sm:$0xff]  ;;  %v2875_v40 = vld [vmem:[#allocation8 + $0x358] sm:$0xff] }
 0x130   :  { %3541 = vst [vmem:[#allocation63_spill] sm:$0xff] %v2855_v6  ;;  %988 = vmatpush.msrb.mxu0 %v2865_v44  ;;  %v2881_v36 = vld [vmem:[#allocation8 + $0x330] sm:$0xff]  ;;  %1028 = vmatpush.msrb.mxu2 %v2869_v50 }
 0x131   :  { %3542 = vst [vmem:[#allocation61_spill] sm:$0xff] %v2857_v0  ;;  %1006 = vmatpush.msrb.mxu1 %v2855_v6  ;;  %v2879_v6 = vld [vmem:[#allocation8 + $0x110] sm:$0xff] }
 0x132   :  { %v581_v12 = vpop.f32.mrf.mxu0  ;;  %3544 = vst [vmem:[#allocation58_spill] sm:$0xff] %v2865_v44  ;;  %989 = vmatpush.msrb.mxu0 %v2879_v6  ;;  %1029 = vmatpush.msrb.mxu2 %v2883_v42 }
 0x133   :  { %v582_v33 = vadd.f32 %v581_v12, %v2571_v55  ;;  %v2861_v12 = vld [vmem:[#allocation8 + $0x378] sm:$0xff]  ;;  %3545 = vst [vmem:[#allocation67_spill] sm:$0xff] %v2867_v4  ;;  %1007 = vmatpush.msrb.mxu1 %v2867_v4  ;;  %v2894_v4 = vld [vmem:[#allocation8 + $0x310] sm:$0xff] }
 0x134   :  { %3543 = vst [vmem:[#allocation56_spill] sm:$0xff] %v2861_v12  ;;  %1046 = vmatpush.msrb.mxu3 %v2861_v12  ;;  %v2896_v12 = vld [vmem:[#allocation8 + $0xf8] sm:$0xff] }
 0x135   :  { %3546 = vst [vmem:[#allocation65_spill] sm:$0xff] %v2869_v50  ;;  %1008 = vmatpush.msrb.mxu1 %v2881_v36  ;;  %1030 = vmatpush.msrb.mxu2 %v2896_v12 }
 0x136   :  { %v621_v48 = vpop.f32.mrf.mxu2  ;;  %3547 = vst [vmem:[#allocation60_spill] sm:$0xff] %v2875_v40  ;;  %1047 = vmatpush.msrb.mxu3 %v2875_v40  ;;  %v2908_v40 = vld [vmem:[#allocation8 + $0xd8] sm:$0xff] }
 0x137   :  { %3548 = vst [vmem:[#allocation62_spill] sm:$0xff] %v2879_v6  ;;  %v622_v26 = vadd.f32 %v621_v48, %v2574_v15  ;;  %v2900_v48 = vld [vmem:[#allocation8 + $0x318] sm:$0xff]  ;;  %1009 = vmatpush.msrb.mxu1 %v2894_v4  ;;  %v2904_v15 = vld [vmem:[#allocation8 + $0xd0] sm:$0xff]  ;;  %1031 = vmatpush.msrb.mxu2 %v2908_v40 }
 0x138   :  { %3549 = vst [vmem:[#allocation71_spill] sm:$0xff] %v2881_v36  ;;  %v2906_v36 = vld [vmem:[#allocation8 + $0x2f0] sm:$0xff] }
 0x139   :  { %3550 = vst [vmem:[#allocation69_spill] sm:$0xff] %v2883_v42  ;;  %1010 = vmatpush.msrb.mxu1 %v2906_v36 }
 0x13a   :  { %3553 = vst [vmem:[#allocation75_spill] sm:$0xff] %v2894_v4  ;;  %v2918_v4 = vld [vmem:[#allocation8 + $0x2d0] sm:$0xff] }
 0x13b   :  { %3554 = vst [vmem:[#allocation73_spill] sm:$0xff] %v2896_v12  ;;  %1011 = vmatpush.msrb.mxu1 %v2918_v4 }
 0x13c   :  { %3555 = vst [vmem:[#allocation68_spill] sm:$0xff] %v2900_v48 }
 0x13d   :  { %3556 = vst [vmem:[#allocation70_spill] sm:$0xff] %v2904_v15 }
 0x13e   :  { %3557 = vst [vmem:[#allocation77_spill] sm:$0xff] %v2906_v36  ;;  %v2930_v36 = vld [vmem:[#allocation8 + $0x2b0] sm:$0xff] }
 0x13f   :  { %3558 = vst [vmem:[#allocation72_spill] sm:$0xff] %v2908_v40  ;;  %1012 = vmatpush.msrb.mxu1 %v2930_v36 }
 0x140   :  { %3561 = vst [vmem:[#allocation78_spill] sm:$0xff] %v2918_v4  ;;  %v2943_v4 = vld [vmem:[#allocation8 + $0x70] sm:$0xff] }
 0x141   :  { %3565 = vst [vmem:[#allocation82_spill] sm:$0xff] %v2930_v36  ;;  %v2960_v36 = vld [vmem:[#allocation8 + $0x58] sm:$0xff] }
 0x142   :  { %3568 = vst [vmem:[#allocation85_spill] sm:$0xff] %v2943_v4 }
 0x143   :  { %3574 = vst [vmem:[#allocation91_spill] sm:$0xff] %v2960_v36 }
 0x185   :  { %v601_v55 = vpop.f32.mrf.mxu1 }
 0x186   :  { %v602_v10 = vadd.f32 %v601_v55, %v582_v33  ;;  %v2888_v55 = vld [vmem:[#allocation8 + $0x338] sm:$0xff]  ;;  %v2892_v33 = vld [vmem:[#allocation8 + $0xf0] sm:$0xff] }
 0x187   :  { %3551 = vst [vmem:[#allocation64_spill] sm:$0xff] %v2888_v55  ;;  %1048 = vmatpush.msrb.mxu3 %v2888_v55  ;;  %990 = vmatpush.msrb.mxu0 %v2892_v33  ;;  %v2916_v55 = vld [vmem:[#allocation8 + $0xb0] sm:$0xff] }
 0x188   :  { %v1800_v2 = vmul.f32 -1.442695, %v602_v10  ;;  %3552 = vst [vmem:[#allocation66_spill] sm:$0xff] %v2892_v33  ;;  %v2920_v33 = vld [vmem:[#allocation8 + $0xb8] sm:$0xff] }
 0x189   :  { %1049 = vmatpush.msrb.mxu3 %v2900_v48  ;;  %991 = vmatpush.msrb.mxu0 %v2904_v15  ;;  %3560 = vst [vmem:[#allocation76_spill] sm:$0xff] %v2916_v55  ;;  %v2932_v48 = vld [vmem:[#allocation8 + $0x98] sm:$0xff] }
 0x18a   :  { %1834 = vpow2.f32 %v1800_v2  ;;  %v2912_v2 = vld [vmem:[#allocation8 + $0x2f8] sm:$0xff]  ;;  %3562 = vst [vmem:[#allocation79_spill] sm:$0xff] %v2920_v33  ;;  %1032 = vmatpush.msrb.mxu2 %v2920_v33  ;;  %v2968_v33 = vld [vmem:[#allocation8 + $0x250] sm:$0xff] }
 0x18b   :  { %v641_v10 = vpop.f32.mrf.mxu3  ;;  %3559 = vst [vmem:[#allocation74_spill] sm:$0xff] %v2912_v2  ;;  %1050 = vmatpush.msrb.mxu3 %v2912_v2  ;;  %992 = vmatpush.msrb.mxu0 %v2916_v55  ;;  %v773_v2 = vld [vmem:[%s772_s23] sm:$0x1]  ;;  %v2945_v55 = vld [vmem:[#allocation8 + $0x290] sm:$0xff] }
 0x18c   :  { %v642_v6 = vadd.f32 %v641_v10, %v622_v26  ;;  %v2924_v26 = vld [vmem:[#allocation8 + $0x2d8] sm:$0xff]  ;;  %v2928_v10 = vld [vmem:[#allocation8 + $0x90] sm:$0xff]  ;;  %3566 = vst [vmem:[#allocation83_spill] sm:$0xff] %v2932_v48  ;;  %1033 = vmatpush.msrb.mxu2 %v2932_v48  ;;  %918 = vmatmul.f32.vlgmr.msra.gmra.mxu0 %v773_v2 }
 0x18d   :  { %3563 = vst [vmem:[#allocation80_spill] sm:$0xff] %v2924_v26  ;;  %1051 = vmatpush.msrb.mxu3 %v2924_v26  ;;  %993 = vmatpush.msrb.mxu0 %v2928_v10  ;;  %v2951_v26 = vld [vmem:[#allocation8 + $0x298] sm:$0xff]  ;;  %v681_v24 = vpop.f32.mrf.mxu1 }
 0x18e   :  { %v1801_v42 = vmul.f32 -1.442695, %v642_v6  ;;  %3564 = vst [vmem:[#allocation81_spill] sm:$0xff] %v2928_v10  ;;  %v2936_v6 = vld [vmem:[#allocation8 + $0x2b8] sm:$0xff]  ;;  %958 = vmatmul.f32.vlgmr.msra.gmra.mxu2 %v773_v2  ;;  %v2956_v10 = vld [vmem:[#allocation8 + $0x270] sm:$0xff]  ;;  %1013 = vmatpush.msrb.mxu1 %v2945_v55 }
 0x18f   :  { %3567 = vst [vmem:[#allocation84_spill] sm:$0xff] %v2936_v6  ;;  %1052 = vmatpush.msrb.mxu3 %v2936_v6  ;;  %994 = vmatpush.msrb.mxu0 %v2943_v4  ;;  %v2962_v48 = vld [vmem:[#allocation8 + $0x278] sm:$0xff]  ;;  %v2966_v6 = vld [vmem:[#allocation8 + $0x30] sm:$0xff] }
 0x190   :  { %v1835_v15 = vpop.eup %1834  ;;  %1836 = vpow2.f32 %v1801_v42  ;;  %3569 = vst [vmem:[#allocation86_spill] sm:$0xff] %v2945_v55  ;;  %v2949_v42 = vld [vmem:[#allocation8 + $0x78] sm:$0xff]  ;;  %1014 = vmatpush.msrb.mxu1 %v2956_v10 }
 0x191   :  { %v2939_v40 = vadd.f32 1.0, %v1835_v15  ;;  %3570 = vst [vmem:[#allocation87_spill] sm:$0xff] %v2949_v42  ;;  %v2954_v15 = vld [vmem:[#allocation8 + $0x50] sm:$0xff]  ;;  %1034 = vmatpush.msrb.mxu2 %v2949_v42  ;;  %1053 = vmatpush.msrb.mxu3 %v2951_v26  ;;  %v2972_v4 = vld [vmem:[#allocation8 + $0x38] sm:$0xff] }
 0x192   :  { %3571 = vst [vmem:[#allocation88_spill] sm:$0xff] %v2951_v26  ;;  %995 = vmatpush.msrb.mxu0 %v2954_v15  ;;  %v2974_v55 = vld [vmem:[#allocation8 + $0x258] sm:$0xff]  ;;  %v2980_v26 = vld [vmem:[#allocation8 + $0x10] sm:$0xff]  ;;  %1015 = vmatpush.msrb.mxu1 %v2968_v33 }
 0x193   :  { %1838 = vrcp.f32 %v2939_v40  ;;  %3572 = vst [vmem:[#allocation89_spill] sm:$0xff] %v2954_v15  ;;  %1035 = vmatpush.msrb.mxu2 %v2960_v36  ;;  %1054 = vmatpush.msrb.mxu3 %v2962_v48  ;;  %v2982_v42 = vld [vmem:[#allocation8 + $0x230] sm:$0xff]  ;;  %v2986_v15 = vld [vmem:[#allocation8 + $0x18] sm:$0xff]  ;;  %v661_v36 = vpop.f32.mrf.mxu0  ;;  %vm733_vm9 = vweird.f32 %v2939_v40 }
 0x194   :  { %3573 = vst [vmem:[#allocation90_spill] sm:$0xff] %v2956_v10  ;;  %996 = vmatpush.msrb.mxu0 %v2966_v6  ;;  %v2988_v10 = vld [vmem:[#allocation8 + $0x238] sm:$0xff]  ;;  %1016 = vmatpush.msrb.mxu1 %v2982_v42 }
 0x195   :  { %3575 = vst [vmem:[#allocation92_spill] sm:$0xff] %v2962_v48  ;;  %1036 = vmatpush.msrb.mxu2 %v2972_v4  ;;  %1055 = vmatpush.msrb.mxu3 %v2974_v55  ;;  %v2996_v48 = vld [vmem:[#allocation8 + $0x210] sm:$0xff] }
 0x196   :  { %3576 = vst [vmem:[#allocation93_spill] sm:$0xff] %v2966_v6  ;;  %v1837_v12 = vpop.eup %1836  ;;  %997 = vmatpush.msrb.mxu0 %v2980_v26  ;;  %v701_v6 = vpop.f32.mrf.mxu2  ;;  %1017 = vmatpush.msrb.mxu1 %v2996_v48 }
 0x197   :  { %3577 = vst [vmem:[#allocation94_spill] sm:$0xff] %v2968_v33  ;;  %v2976_v50 = vadd.f32 1.0, %v1837_v12  ;;  %v2998_v33 = vld [vmem:[#allocation8 + $0x218] sm:$0xff]  ;;  %1037 = vmatpush.msrb.mxu2 %v2986_v15  ;;  %1056 = vmatpush.msrb.mxu3 %v2988_v10 }
 0x198   :  { %3578 = vst [vmem:[#allocation95_spill] sm:$0xff] %v2972_v4  ;;  %998 = vmatmul.f32.vlgmr.msrb.gmra.mxu0 %v773_v2  ;;  %1038 = vmatmul.f32.vlgmr.msrb.gmra.mxu2 %v773_v2  ;;  %v737_v4 = vand.u32 2147483647, %v2939_v40  ;;  %v721_v2 = vpop.f32.mrf.mxu3 }
 0x199   :  { %3579 = vst [vmem:[#allocation96_spill] sm:$0xff] %v2974_v55  ;;  %v1839_v44 = vpop.eup %1838  ;;  %1840 = vrcp.f32 %v2976_v50  ;;  %v739_v55 = vand.u32 2147483648, %v2939_v40  ;;  %1057 = vmatpush.msrb.mxu3 %v2998_v33  ;;  %1240 = vmatpush.msra.mxu0 %v2585_v30  ;;  %vm752_vm13 = vweird.f32 %v2976_v50 }
 0x19a   :  { %3580 = vst [vmem:[#allocation97_spill] sm:$0xff] %v2980_v26  ;;  %v729_v12 = vmul.f32 %v1839_v44, %v2939_v40  ;;  %vm734_vm8 = vweird.f32 %v1839_v44  ;;  %1280 = vmatpush.msra.mxu2 %v2587_v31  ;;  %vm738_vm11 = vcmp.eq.f32.partialorder %v737_v4, 8.507059e+37  ;;  %v758_v40 = vand.u32 2147483648, %v2976_v50  ;;  %v3616_v4 = vld [vmem:[#allocation69_spill] sm:$0xff] }
 0x19b   :  { %3581 = vst [vmem:[#allocation98_spill] sm:$0xff] %v2982_v42  ;;  %v702_v42 = vadd.f32 %v701_v6, %v2583_v29  ;;  %1241 = vmatpush.msra.mxu0 %v2589_v32  ;;  %vm735_vm10 = vmor %vm733_vm9, %vm734_vm8  ;;  %v756_v32 = vand.u32 2147483647, %v2976_v50 }
 0x19c   :  { %3582 = vst [vmem:[#allocation99_spill] sm:$0xff] %v2986_v15  ;;  %v730_v0 = vsub.f32 1.0, %v729_v12  ;;  %v662_v12 = vadd.f32 %v661_v36, %v2581_v27  ;;  %1281 = vmatpush.msra.mxu2 %v2593_v35 }
 0x19d   :  { %3583 = vst [vmem:[#allocation100_spill] sm:$0xff] %v2988_v10  ;;  %v722_v30 = vadd.f32 %v721_v2, %v702_v42  ;;  %1242 = vmatpush.msra.mxu0 %v2595_v37  ;;  %vm757_vm15 = vcmp.eq.f32.partialorder %v756_v32, 8.507059e+37  ;;  %v3626_v42 = vld [vmem:[#allocation72_spill] sm:$0xff]  ;;  %v3637_v32 = vld [vmem:[#allocation85_spill] sm:$0xff] }
 0x19e   :  { %3584 = vst [vmem:[#allocation101_spill] sm:$0xff] %v2996_v48  ;;  %v731_v26 = vmul.f32 %v1839_v44, %v730_v0  ;;  %v740_v0 = vor.u32 1.1754944e-38, %v739_v55  ;;  %1282 = vmatpush.msra.mxu2 %v2597_v38  ;;  %v682_v31 = vadd.f32 %v681_v24, %v662_v12  ;;  %v3603_v24 = vld [vmem:[#allocation50_spill] sm:$0xff]  ;;  %v3623_v55 = vld [vmem:[#allocation47_spill] sm:$0xff]  ;;  %v3628_v12 = vld [vmem:[#allocation44_spill] sm:$0xff] }
 0x19f   :  { %v1841_v10 = vpop.eup %1840  ;;  %1243 = vmatpush.msra.mxu0 %v2608_v46  ;;  %v3629_v2 = vld [vmem:[#allocation76_spill] sm:$0xff] }
 0x1a0   :  { %v748_v15 = vmul.f32 %v1841_v10, %v2976_v50  ;;  %v732_v48 = vadd.f32 %v1839_v44, %v731_v26  ;;  %vm753_vm12 = vweird.f32 %v1841_v10  ;;  %1283 = vmatpush.msra.mxu2 %v2610_v47  ;;  %v3612_v50 = vld [vmem:[#allocation65_spill] sm:$0xff] }
 0x1a1   :  { %1244 = vmatpush.msra.mxu0 %v2650_v61  ;;  %vm754_vm14 = vmor %vm752_vm13, %vm753_vm12 }
 0x1a2   :  { %v749_v6 = vsub.f32 1.0, %v748_v15  ;;  %v736_v29 = vsel %vm735_vm10, %v1839_v44, %v732_v48  ;;  %1284 = vmatpush.msra.mxu2 %v2654_v58  ;;  %v3624_v48 = vld [vmem:[#allocation40_spill] sm:$0xff]  ;;  %v3627_v15 = vld [vmem:[#allocation51_spill] sm:$0xff] }
 0x1a3   :  { %v741_v36 = vsel %vm738_vm11, %v740_v0, %v736_v29  ;;  %v759_v29 = vor.u32 1.1754944e-38, %v758_v40  ;;  %1245 = vmatpush.msra.mxu0 %v2662_v52  ;;  %v3594_v52 = vld [vmem:[#allocation24_spill] sm:$0xff]  ;;  %v3630_v0 = vld [vmem:[#allocation79_spill] sm:$0xff] }
 0x1a4   :  { %v750_v27 = vmul.f32 %v1841_v10, %v749_v6  ;;  %v762_v26 = vmul.f32 %v741_v36, %v722_v30  ;;  %1285 = vmatpush.msra.mxu2 %v2666_v51  ;;  %v3596_v51 = vld [vmem:[#allocation49_spill] sm:$0xff]  ;;  %v3631_v6 = vld [vmem:[#allocation55_spill] sm:$0xff]  ;;  %v3632_v30 = vld [vmem:[#allocation48_spill] sm:$0xff] }
 0x1a5   :  { %1246 = vmatpush.msra.mxu0 %v2674_v19  ;;  %v3598_v19 = vld [vmem:[#allocation31_spill] sm:$0xff] }
 0x1a6   :  { %v751_v35 = vadd.f32 %v1841_v10, %v750_v27  ;;  %v763_v44 = vadd.f32 %v762_v26, %v682_v31  ;;  %1286 = vmatpush.msra.mxu2 %v2678_v21  ;;  %v3600_v21 = vld [vmem:[#allocation53_spill] sm:$0xff]  ;;  %v3634_v36 = vld [vmem:[#allocation83_spill] sm:$0xff]  ;;  %v3636_v26 = vld [vmem:[#allocation52_spill] sm:$0xff] }
 0x1a7   :  { %1247 = vmatpush.msra.mxu0 %v2686_v23  ;;  %v3602_v23 = vld [vmem:[#allocation27_spill] sm:$0xff]  ;;  %v3633_v31 = vld [vmem:[#allocation81_spill] sm:$0xff] }
 0x1a8   :  { %v755_v37 = vsel %vm754_vm14, %v1841_v10, %v751_v35  ;;  %1842 = vtanh.f32 %v763_v44  ;;  %1287 = vmatpush.msra.mxu2 %v2690_v25  ;;  %v3604_v25 = vld [vmem:[#allocation57_spill] sm:$0xff]  ;;  %v3625_v10 = vld [vmem:[#allocation70_spill] sm:$0xff]  ;;  %v3635_v40 = vld [vmem:[#allocation59_spill] sm:$0xff] }
 0x1a9   :  { %v760_v38 = vsel %vm757_vm15, %v759_v29, %v755_v37  ;;  %1248 = vmatpush.msra.mxu0 %v2698_v28  ;;  %v3605_v28 = vld [vmem:[#allocation28_spill] sm:$0xff]  ;;  %v3638_v35 = vld [vmem:[#allocation87_spill] sm:$0xff]  ;;  %v3641_v37 = vld [vmem:[#allocation89_spill] sm:$0xff] }
 0x1aa   :  { %v765_v27 = vsub.f32 1.0, %v760_v38  ;;  %1288 = vmatpush.msra.mxu2 %v2702_v34  ;;  %v767_v61 = vmul.f32 %v760_v38, %v2622_v53  ;;  %v3585_v53 = vld [vmem:[#allocation21_spill] sm:$0xff]  ;;  %v3606_v34 = vld [vmem:[#allocation35_spill] sm:$0xff]  ;;  %v3640_v29 = vld [vmem:[#allocation56_spill] sm:$0xff] }
 0x1ab   :  { %1249 = vmatpush.msra.mxu0 %v2710_v39  ;;  %v3607_v39 = vld [vmem:[#allocation54_spill] sm:$0xff]  ;;  %v3639_v44 = vld [vmem:[#allocation63_spill] sm:$0xff] }
 0x1ac   :  { %1289 = vmatpush.msra.mxu2 %v2714_v41  ;;  %v3608_v41 = vld [vmem:[#allocation61_spill] sm:$0xff]  ;;  %v3642_v38 = vld [vmem:[#allocation91_spill] sm:$0xff] }
 0x1ad   :  { %1250 = vmatpush.msra.mxu0 %v2722_v43  ;;  %v3609_v43 = vld [vmem:[#allocation33_spill] sm:$0xff] }
 0x1ae   :  { %v1843_v46 = vpop.eup %1842  ;;  %1290 = vmatpush.msra.mxu2 %v2726_v45  ;;  %v3610_v45 = vld [vmem:[#allocation29_spill] sm:$0xff] }
 0x1af   :  { %v766_v47 = vmul.f32 %v1843_v46, %v765_v27  ;;  %1251 = vmatpush.msra.mxu0 %v2734_v49  ;;  %v3611_v49 = vld [vmem:[#allocation58_spill] sm:$0xff]  ;;  %v3643_v27 = vld [vmem:[#allocation67_spill] sm:$0xff]  ;;  %v3644_v46 = vld [vmem:[#allocation60_spill] sm:$0xff] }
 0x1b0   :  { %1291 = vmatpush.msra.mxu2 %v2738_v62  ;;  %v3613_v62 = vld [vmem:[#allocation30_spill] sm:$0xff] }
 0x1b1   :  { %v3034_v58 = vadd.f32 %v767_v61, %v766_v47  ;;  %1252 = vmatpush.msra.mxu0 %v2746_v1  ;;  %v3614_v1 = vld [vmem:[#allocation39_spill] sm:$0xff]  ;;  %v3645_v47 = vld [vmem:[#allocation93_spill] sm:$0xff] }
 0x1b2   :  { %1292 = vmatpush.msra.mxu2 %v2750_v3  ;;  %v3615_v3 = vld [vmem:[#allocation62_spill] sm:$0xff]  ;;  %v3646_v61 = vld [vmem:[#allocation95_spill] sm:$0xff] }
 0x1b3   :  { %1802 = vst [vmem:[%s3206_s5 + $0x1] sm:$0x1] %v3034_v58  ;;  %938 = vmatmul.f32.vlgmr.msra.gmra.mxu1 %v3034_v58  ;;  %978 = vmatmul.f32.vlgmr.msra.gmra.mxu3 %v3034_v58 }
 0x1b4   :  { %1260 = vmatpush.msra.mxu1 %v2624_v59  ;;  %1300 = vmatpush.msra.mxu3 %v2626_v60  ;;  %v3586_v59 = vld [vmem:[#allocation20_spill] sm:$0xff]  ;;  %v3587_v60 = vld [vmem:[#allocation34_spill] sm:$0xff] }
 0x1b5   :  { %1253 = vmatpush.msra.mxu0 %v2758_v5  ;;  %1293 = vmatpush.msra.mxu2 %v2762_v7  ;;  %v3617_v5 = vld [vmem:[#allocation37_spill] sm:$0xff]  ;;  %v3618_v7 = vld [vmem:[#allocation32_spill] sm:$0xff] }
 0x1b6   :  { %1261 = vmatpush.msra.mxu1 %v2634_v13  ;;  %1301 = vmatpush.msra.mxu3 %v2636_v14  ;;  %v3588_v13 = vld [vmem:[#allocation43_spill] sm:$0xff] }
 0x1b7   :  { %1254 = vmatpush.msra.mxu0 %v2770_v9  ;;  %1294 = vmatpush.msra.mxu2 %v2774_v11  ;;  %v3589_v14 = vld [vmem:[#allocation19_spill] sm:$0xff]  ;;  %v3620_v9 = vld [vmem:[#allocation73_spill] sm:$0xff] }
 0x1b8   :  { %1262 = vmatpush.msra.mxu1 %v2640_v56  ;;  %1302 = vmatpush.msra.mxu3 %v2642_v54  ;;  %v3590_v56 = vld [vmem:[#allocation22_spill] sm:$0xff]  ;;  %v3621_v11 = vld [vmem:[#allocation41_spill] sm:$0xff] }
 0x1b9   :  { %1255 = vmatpush.msra.mxu0 %v2782_v63  ;;  %1295 = vmatpush.msra.mxu2 %v2786_v8  ;;  %v3591_v54 = vld [vmem:[#allocation38_spill] sm:$0xff]  ;;  %v3622_v63 = vld [vmem:[#allocation36_spill] sm:$0xff] }
 0x1ba   :  { %1263 = vmatpush.msra.mxu1 %v2652_v57  ;;  %1303 = vmatpush.msra.mxu3 %v2658_v16  ;;  %v3592_v57 = vld [vmem:[#allocation45_spill] sm:$0xff]  ;;  %v3619_v8 = vld [vmem:[#allocation66_spill] sm:$0xff] }
 0x1bb   :  { %1018 = vmatmul.f32.vlgmr.msrb.gmra.mxu1 %v3034_v58  ;;  %1058 = vmatmul.f32.vlgmr.msrb.gmra.mxu3 %v3034_v58  ;;  %v3593_v16 = vld [vmem:[#allocation25_spill] sm:$0xff] }
 0x1bc   :  { %1264 = vmatpush.msra.mxu1 %v2664_v17  ;;  %1304 = vmatpush.msra.mxu3 %v2670_v18  ;;  %v3595_v17 = vld [vmem:[#allocation42_spill] sm:$0xff]  ;;  %v3597_v18 = vld [vmem:[#allocation23_spill] sm:$0xff] }
 0x1bd   :  { %1320 = vmatpush.msrb.mxu0 %v3587_v60  ;;  %1360 = vmatpush.msrb.mxu2 %v3588_v13  ;;  %v3649_v60 = vld [vmem:[#allocation97_spill] sm:$0xff]  ;;  %v3650_v13 = vld [vmem:[#allocation99_spill] sm:$0xff] }
 0x1be   :  { %1265 = vmatpush.msra.mxu1 %v2676_v20  ;;  %1305 = vmatpush.msra.mxu3 %v2682_v22  ;;  %v3599_v20 = vld [vmem:[#allocation46_spill] sm:$0xff] }
 0x1bf   :  { %1321 = vmatpush.msrb.mxu0 %v3591_v54  ;;  %1361 = vmatpush.msrb.mxu2 %v3592_v57  ;;  %v3601_v22 = vld [vmem:[#allocation26_spill] sm:$0xff]  ;;  %v3653_v54 = vld [vmem:[#allocation77_spill] sm:$0xff] }
 0x1c0   :  { %1266 = vmatpush.msra.mxu1 %v3585_v53  ;;  %1306 = vmatpush.msra.mxu3 %v3586_v59  ;;  %v3647_v53 = vld [vmem:[#allocation71_spill] sm:$0xff]  ;;  %v3648_v59 = vld [vmem:[#allocation64_spill] sm:$0xff]  ;;  %v3654_v57 = vld [vmem:[#allocation74_spill] sm:$0xff] }
 0x1c1   :  { %1322 = vmatpush.msrb.mxu0 %v3595_v17  ;;  %1362 = vmatpush.msrb.mxu2 %v3596_v51  ;;  %v3657_v17 = vld [vmem:[#allocation82_spill] sm:$0xff]  ;;  %v3658_v51 = vld [vmem:[#allocation84_spill] sm:$0xff] }
 0x1c2   :  { %1267 = vmatpush.msra.mxu1 %v3589_v14  ;;  %1307 = vmatpush.msra.mxu3 %v3590_v56  ;;  %v3651_v14 = vld [vmem:[#allocation75_spill] sm:$0xff]  ;;  %v3652_v56 = vld [vmem:[#allocation68_spill] sm:$0xff] }
 0x1c3   :  { %1323 = vmatpush.msrb.mxu0 %v3599_v20  ;;  %1363 = vmatpush.msrb.mxu2 %v3600_v21  ;;  %v3661_v20 = vld [vmem:[#allocation90_spill] sm:$0xff]  ;;  %v3662_v21 = vld [vmem:[#allocation92_spill] sm:$0xff] }
 0x1c4   :  { %1268 = vmatpush.msra.mxu1 %v3593_v16  ;;  %1308 = vmatpush.msra.mxu3 %v3594_v52  ;;  %v3655_v16 = vld [vmem:[#allocation78_spill] sm:$0xff]  ;;  %v3656_v52 = vld [vmem:[#allocation80_spill] sm:$0xff] }
 0x1c5   :  { %1324 = vmatpush.msrb.mxu0 %v3603_v24  ;;  %1364 = vmatpush.msrb.mxu2 %v3604_v25  ;;  %v3665_v24 = vld [vmem:[#allocation98_spill] sm:$0xff]  ;;  %v3666_v25 = vld [vmem:[#allocation100_spill] sm:$0xff] }
 0x1c6   :  { %1269 = vmatpush.msra.mxu1 %v3597_v18  ;;  %1309 = vmatpush.msra.mxu3 %v3598_v19  ;;  %v3659_v18 = vld [vmem:[#allocation86_spill] sm:$0xff]  ;;  %v3660_v19 = vld [vmem:[#allocation88_spill] sm:$0xff] }
 0x1c7   :  { %1325 = vmatpush.msrb.mxu0 %v3607_v39  ;;  %1365 = vmatpush.msrb.mxu2 %v3608_v41  ;;  %v3668_v39 = vld [vmem:[#allocation17_spill] sm:$0xff] }
 0x1c8   :  { %1270 = vmatpush.msra.mxu1 %v3601_v22  ;;  %1310 = vmatpush.msra.mxu3 %v3602_v23  ;;  %v3663_v22 = vld [vmem:[#allocation94_spill] sm:$0xff]  ;;  %v3664_v23 = vld [vmem:[#allocation96_spill] sm:$0xff] }
 0x1c9   :  { %1326 = vmatpush.msrb.mxu0 %v3611_v49  ;;  %1366 = vmatpush.msrb.mxu2 %v3612_v50 }
 0x1ca   :  { %1271 = vmatpush.msra.mxu1 %v3605_v28  ;;  %1311 = vmatpush.msra.mxu3 %v3606_v34  ;;  %v3667_v28 = vld [vmem:[#allocation101_spill] sm:$0xff] }
 0x1cb   :  { %1327 = vmatpush.msrb.mxu0 %v3615_v3  ;;  %1367 = vmatpush.msrb.mxu2 %v3616_v4 }
 0x1cc   :  { %1272 = vmatpush.msra.mxu1 %v3609_v43  ;;  %1312 = vmatpush.msra.mxu3 %v3610_v45 }
 0x1cd   :  { %1328 = vmatpush.msrb.mxu0 %v3619_v8  ;;  %1368 = vmatpush.msrb.mxu2 %v3620_v9  ;;  %v1111_v8 = vld [vmem:[%s1110_s27] sm:$0x1] }
 0x1ce   :  { %1273 = vmatpush.msra.mxu1 %v3613_v62  ;;  %1313 = vmatpush.msra.mxu3 %v3614_v1  ;;  %v3669_v62 = vld [vmem:[#allocation16_spill] sm:$0xff] }
 0x1cf   :  { %1329 = vmatpush.msrb.mxu0 %v3625_v10  ;;  %1369 = vmatpush.msrb.mxu2 %v3626_v42  ;;  %v1510_v10 = vld [vmem:[#allocation8 + $0x1e0] sm:$0xff]  ;;  %v1511_v42 = vld [vmem:[#allocation8 + $0x1e8] sm:$0xff] }
 0x1d0   :  { %1274 = vmatpush.msra.mxu1 %v3617_v5  ;;  %1314 = vmatpush.msra.mxu3 %v3618_v7 }
 0x1d1   :  { %1330 = vmatpush.msrb.mxu0 %v3629_v2  ;;  %1370 = vmatpush.msrb.mxu2 %v3630_v0  ;;  %v1506_v2 = vld [vmem:[#allocation8 + $0x1c0] sm:$0xff]  ;;  %v1507_v0 = vld [vmem:[#allocation8 + $0x1c8] sm:$0xff] }
 0x1d2   :  { %1275 = vmatpush.msra.mxu1 %v3621_v11  ;;  %1315 = vmatpush.msra.mxu3 %v3622_v63 }
 0x1d3   :  { %1331 = vmatpush.msrb.mxu0 %v3633_v31  ;;  %1371 = vmatpush.msrb.mxu2 %v3634_v36  ;;  %v3670_v31 = vld [vmem:[#allocation18_spill] sm:$0xff] }
 0x1d4   :  { %1340 = vmatpush.msrb.mxu1 %v3623_v55  ;;  %1380 = vmatpush.msrb.mxu3 %v3624_v48 }
 0x1d5   :  { %1332 = vmatpush.msrb.mxu0 %v3637_v32  ;;  %1372 = vmatpush.msrb.mxu2 %v3638_v35  ;;  %v1503_v32 = vld [vmem:[#allocation8 + $0x1a8] sm:$0xff] }
 0x1d6   :  { %1341 = vmatpush.msrb.mxu1 %v3627_v15  ;;  %1381 = vmatpush.msrb.mxu3 %v3628_v12 }
 0x1d7   :  { %1333 = vmatpush.msrb.mxu0 %v3641_v37  ;;  %1373 = vmatpush.msrb.mxu2 %v3642_v38  ;;  %v1498_v38 = vld [vmem:[#allocation8 + $0x180] sm:$0xff] }
 0x1d8   :  { %1342 = vmatpush.msrb.mxu1 %v3631_v6  ;;  %1382 = vmatpush.msrb.mxu3 %v3632_v30  ;;  %v1502_v30 = vld [vmem:[#allocation8 + $0x1a0] sm:$0xff] }
 0x1d9   :  { %1334 = vmatpush.msrb.mxu0 %v3645_v47  ;;  %1374 = vmatpush.msrb.mxu2 %v3646_v61 }
 0x1da   :  { %1343 = vmatpush.msrb.mxu1 %v3635_v40  ;;  %1383 = vmatpush.msrb.mxu3 %v3636_v26 }
 0x1db   :  { %1335 = vmatpush.msrb.mxu0 %v3649_v60  ;;  %1375 = vmatpush.msrb.mxu2 %v3650_v13 }
 0x1dc   :  { %1344 = vmatpush.msrb.mxu1 %v3639_v44  ;;  %1384 = vmatpush.msrb.mxu3 %v3640_v29  ;;  %v3671_v44 = vld [vmem:[#allocation15_spill] sm:$0xff] }
 0x1dd   :  { %1256 = vmatmul.f32.vlgmr.msra.gmra.mxu0 %v1111_v8  ;;  %1296 = vmatmul.f32.vlgmr.msra.gmra.mxu2 %v1111_v8 }
 0x1de   :  { %1345 = vmatpush.msrb.mxu1 %v3643_v27  ;;  %1385 = vmatpush.msrb.mxu3 %v3644_v46  ;;  %v1499_v27 = vld [vmem:[#allocation8 + $0x188] sm:$0xff] }
 0x1df   :  { %1578 = vmatpush.msra.mxu0 %v1510_v10  ;;  %1618 = vmatpush.msra.mxu2 %v1511_v42  ;;  %v1483_v10 = vld [vmem:[#allocation8 + $0x108] sm:$0xff] }
 0x1e0   :  { %1346 = vmatpush.msrb.mxu1 %v3647_v53  ;;  %1386 = vmatpush.msrb.mxu3 %v3648_v59  ;;  %v1551_v42 = vld [vmem:[#allocation8 + $0x328] sm:$0xff] }
 0x1e1   :  { %1579 = vmatpush.msra.mxu0 %v1506_v2  ;;  %1619 = vmatpush.msra.mxu2 %v1507_v0  ;;  %v1479_v2 = vld [vmem:[#allocation8 + $0xe8] sm:$0xff] }
 0x1e2   :  { %1347 = vmatpush.msrb.mxu1 %v3651_v14  ;;  %1387 = vmatpush.msrb.mxu3 %v3652_v56  ;;  %v1547_v0 = vld [vmem:[#allocation8 + $0x308] sm:$0xff] }
 0x1e3   :  { %1580 = vmatpush.msra.mxu0 %v1502_v30  ;;  %1620 = vmatpush.msra.mxu2 %v1503_v32  ;;  %v1542_v30 = vld [vmem:[#allocation8 + $0x2e0] sm:$0xff] }
 0x1e4   :  { %1348 = vmatpush.msrb.mxu1 %v3653_v54  ;;  %1388 = vmatpush.msrb.mxu3 %v3654_v57  ;;  %v1538_v32 = vld [vmem:[#allocation8 + $0x2c0] sm:$0xff] }
 0x1e5   :  { %1336 = vmatmul.f32.vlgmr.msrb.gmra.mxu0 %v1111_v8  ;;  %1376 = vmatmul.f32.vlgmr.msrb.gmra.mxu2 %v1111_v8  ;;  %v1559_v8 = vld [vmem:[#allocation8 + $0x368] sm:$0xff] }
 0x1e6   :  { %1349 = vmatpush.msrb.mxu1 %v3655_v16  ;;  %1389 = vmatpush.msrb.mxu3 %v3656_v52 }
 0x1e7   :  { %1581 = vmatpush.msra.mxu0 %v1498_v38  ;;  %1621 = vmatpush.msra.mxu2 %v1499_v27  ;;  %v1534_v38 = vld [vmem:[#allocation8 + $0x2a0] sm:$0xff]  ;;  %v1467_v27 = vld [vmem:[#allocation8 + $0x88] sm:$0xff] }
 0x1e8   :  { %1350 = vmatpush.msrb.mxu1 %v3657_v17  ;;  %1390 = vmatpush.msrb.mxu3 %v3658_v51 }
 0x1ea   :  { %1351 = vmatpush.msrb.mxu1 %v3659_v18  ;;  %1391 = vmatpush.msrb.mxu3 %v3660_v19 }
 0x1ec   :  { %1352 = vmatpush.msrb.mxu1 %v3661_v20  ;;  %1392 = vmatpush.msrb.mxu3 %v3662_v21 }
 0x1ee   :  { %1353 = vmatpush.msrb.mxu1 %v3663_v22  ;;  %1393 = vmatpush.msrb.mxu3 %v3664_v23 }
 0x1f0   :  { %1354 = vmatpush.msrb.mxu1 %v3665_v24  ;;  %1394 = vmatpush.msrb.mxu3 %v3666_v25 }
 0x1f2   :  { %1355 = vmatpush.msrb.mxu1 %v3667_v28  ;;  %1395 = vmatpush.msrb.mxu3 %v2998_v33  ;;  %v1574_v28 = vld [vmem:[#allocation8 + $0x3e0] sm:$0xff] }
 0x209   :  { %v919_v34 = vpop.f32.mrf.mxu0 }
 0x20a   :  { %v920_v41 = vadd.f32 %v919_v34, %v3668_v39  ;;  %v1575_v34 = vld [vmem:[#allocation8 + $0x3e8] sm:$0xff] }
 0x211   :  { %v959_v45 = vpop.f32.mrf.mxu2 }
 0x212   :  { %v960_v1 = vadd.f32 %v959_v45, %v3669_v62  ;;  %v1566_v45 = vld [vmem:[#allocation8 + $0x3a0] sm:$0xff] }
 0x215   :  { %v999_v15 = vpop.f32.mrf.mxu0 }
 0x216   :  { %v1000_v29 = vadd.f32 %v999_v15, %v3671_v44  ;;  %v1478_v15 = vld [vmem:[#allocation8 + $0xe0] sm:$0xff] }
 0x21b   :  { %v1039_v48 = vpop.f32.mrf.mxu2 }
 0x21c   :  { %v1040_v36 = vadd.f32 %v1039_v48, %v3670_v31  ;;  %v1550_v48 = vld [vmem:[#allocation8 + $0x320] sm:$0xff] }
 0x230   :  { %v939_v43 = vpop.f32.mrf.mxu1 }
 0x231   :  { %v940_v49 = vadd.f32 %v939_v43, %v920_v41  ;;  %v1570_v41 = vld [vmem:[#allocation8 + $0x3c0] sm:$0xff]  ;;  %v1571_v43 = vld [vmem:[#allocation8 + $0x3c8] sm:$0xff] }
 0x233   :  { %v1804_v50 = vmul.f32 -1.442695, %v940_v49  ;;  %v1567_v49 = vld [vmem:[#allocation8 + $0x3a8] sm:$0xff] }
 0x235   :  { %1844 = vpow2.f32 %v1804_v50  ;;  %v1562_v50 = vld [vmem:[#allocation8 + $0x380] sm:$0xff] }
 0x236   :  { %v979_v3 = vpop.f32.mrf.mxu3 }
 0x237   :  { %v980_v4 = vadd.f32 %v979_v3, %v960_v1  ;;  %v1495_v1 = vld [vmem:[#allocation8 + $0x168] sm:$0xff] }
 0x238   :  { %v1019_v47 = vpop.f32.mrf.mxu1  ;;  %v1563_v3 = vld [vmem:[#allocation8 + $0x388] sm:$0xff]  ;;  %1622 = vmatpush.msra.mxu2 %v1495_v1  ;;  %v1500_v1 = vld [vmem:[#allocation8 + $0x190] sm:$0xff] }
 0x239   :  { %v1805_v5 = vmul.f32 -1.442695, %v980_v4  ;;  %v1020_v14 = vadd.f32 %v1019_v47, %v1000_v29  ;;  %v1490_v4 = vld [vmem:[#allocation8 + $0x140] sm:$0xff]  ;;  %v1539_v29 = vld [vmem:[#allocation8 + $0x2c8] sm:$0xff] }
 0x23a   :  { %v1462_v47 = vld [vmem:[#allocation8 + $0x60] sm:$0xff] }
 0x23b   :  { %v1845_v7 = vpop.eup %1844  ;;  %1846 = vpow2.f32 %v1805_v5  ;;  %v1558_v5 = vld [vmem:[#allocation8 + $0x360] sm:$0xff] }
 0x23c   :  { %v1065_v9 = vadd.f32 1.0, %v1845_v7  ;;  %v1491_v7 = vld [vmem:[#allocation8 + $0x148] sm:$0xff] }
 0x23d   :  { %1623 = vmatpush.msra.mxu2 %v1491_v7  ;;  %v1496_v7 = vld [vmem:[#allocation8 + $0x170] sm:$0xff] }
 0x23e   :  { %1848 = vrcp.f32 %v1065_v9  ;;  %v1077_v6 = vand.u32 2147483648, %v1065_v9  ;;  %v1075_v26 = vand.u32 2147483647, %v1065_v9  ;;  %v1059_v37 = vpop.f32.mrf.mxu3  ;;  %vm1071_vm1 = vweird.f32 %v1065_v9 }
 0x23f   :  { %v1060_v60 = vadd.f32 %v1059_v37, %v1040_v36  ;;  %v1475_v36 = vld [vmem:[#allocation8 + $0xc8] sm:$0xff]  ;;  %v1466_v37 = vld [vmem:[#allocation8 + $0x80] sm:$0xff] }
 0x240   :  { %v1078_v53 = vor.u32 1.1754944e-38, %v1077_v6  ;;  %vm1076_vm3 = vcmp.eq.f32.partialorder %v1075_v26, 8.507059e+37  ;;  %v1474_v6 = vld [vmem:[#allocation8 + $0xc0] sm:$0xff] }
 0x241   :  { %v1847_v33 = vpop.eup %1846  ;;  %v1470_v26 = vld [vmem:[#allocation8 + $0xa0] sm:$0xff] }
 0x242   :  { %v1084_v11 = vadd.f32 1.0, %v1847_v33  ;;  %v1554_v33 = vld [vmem:[#allocation8 + $0x340] sm:$0xff] }
 0x244   :  { %v1849_v63 = vpop.eup %1848  ;;  %1850 = vrcp.f32 %v1084_v11  ;;  %v1096_v57 = vand.u32 2147483648, %v1084_v11  ;;  %v1094_v52 = vand.u32 2147483647, %v1084_v11  ;;  %vm1090_vm5 = vweird.f32 %v1084_v11 }
 0x245   :  { %v1067_v55 = vmul.f32 %v1849_v63, %v1065_v9  ;;  %vm1072_vm0 = vweird.f32 %v1849_v63  ;;  %v1486_v9 = vld [vmem:[#allocation8 + $0x120] sm:$0xff] }
 0x246   :  { %vm1073_vm2 = vmor %vm1071_vm1, %vm1072_vm0  ;;  %v1097_v18 = vor.u32 1.1754944e-38, %v1096_v57  ;;  %vm1095_vm7 = vcmp.eq.f32.partialorder %v1094_v52, 8.507059e+37  ;;  %v1522_v57 = vld [vmem:[#allocation8 + $0x240] sm:$0xff]  ;;  %v1523_v52 = vld [vmem:[#allocation8 + $0x248] sm:$0xff] }
 0x247   :  { %v1068_v12 = vsub.f32 1.0, %v1067_v55  ;;  %v1482_v55 = vld [vmem:[#allocation8 + $0x100] sm:$0xff] }
 0x249   :  { %v1069_v40 = vmul.f32 %v1849_v63, %v1068_v12  ;;  %v1546_v12 = vld [vmem:[#allocation8 + $0x300] sm:$0xff] }
 0x24a   :  { %v1851_v35 = vpop.eup %1850 }
 0x24b   :  { %v1086_v46 = vmul.f32 %v1851_v35, %v1084_v11  ;;  %v1070_v61 = vadd.f32 %v1849_v63, %v1069_v40  ;;  %vm1091_vm4 = vweird.f32 %v1851_v35  ;;  %v1487_v11 = vld [vmem:[#allocation8 + $0x128] sm:$0xff] }
 0x24c   :  { %vm1092_vm6 = vmor %vm1090_vm5, %vm1091_vm4  ;;  %1624 = vmatpush.msra.mxu2 %v1487_v11  ;;  %v1543_v40 = vld [vmem:[#allocation8 + $0x2e8] sm:$0xff]  ;;  %v1565_v11 = vld [vmem:[#allocation8 + $0x398] sm:$0xff] }
 0x24d   :  { %v1087_v59 = vsub.f32 1.0, %v1086_v46  ;;  %v1074_v13 = vsel %vm1073_vm2, %v1849_v63, %v1070_v61  ;;  %v1555_v63 = vld [vmem:[#allocation8 + $0x348] sm:$0xff]  ;;  %v1530_v61 = vld [vmem:[#allocation8 + $0x280] sm:$0xff] }
 0x24e   :  { %v1079_v56 = vsel %vm1076_vm3, %v1078_v53, %v1074_v13  ;;  %1625 = vmatpush.msra.mxu2 %v1483_v10  ;;  %v1535_v46 = vld [vmem:[#allocation8 + $0x2a8] sm:$0xff]  ;;  %v1526_v13 = vld [vmem:[#allocation8 + $0x260] sm:$0xff]  ;;  %v1561_v10 = vld [vmem:[#allocation8 + $0x378] sm:$0xff] }
 0x24f   :  { %v1088_v54 = vmul.f32 %v1851_v35, %v1087_v59  ;;  %v1100_v16 = vmul.f32 %v1079_v56, %v1060_v60  ;;  %v1463_v53 = vld [vmem:[#allocation8 + $0x68] sm:$0xff]  ;;  %v1458_v60 = vld [vmem:[#allocation8 + $0x40] sm:$0xff] }
 0x250   :  { %1626 = vmatpush.msra.mxu2 %v1479_v2  ;;  %v1531_v59 = vld [vmem:[#allocation8 + $0x288] sm:$0xff]  ;;  %v1556_v2 = vld [vmem:[#allocation8 + $0x350] sm:$0xff] }
 0x251   :  { %v1089_v17 = vadd.f32 %v1851_v35, %v1088_v54  ;;  %v1101_v51 = vadd.f32 %v1100_v16, %v1020_v14  ;;  %v1459_v14 = vld [vmem:[#allocation8 + $0x48] sm:$0xff]  ;;  %v1454_v54 = vld [vmem:[#allocation8 + $0x20] sm:$0xff] }
 0x252   :  { %1627 = vmatpush.msra.mxu2 %v1475_v36  ;;  %v1527_v56 = vld [vmem:[#allocation8 + $0x268] sm:$0xff]  ;;  %v1484_v36 = vld [vmem:[#allocation8 + $0x110] sm:$0xff] }
 0x253   :  { %v1093_v19 = vsel %vm1092_vm6, %v1851_v35, %v1089_v17  ;;  %1852 = vtanh.f32 %v1101_v51  ;;  %v1471_v35 = vld [vmem:[#allocation8 + $0xa8] sm:$0xff]  ;;  %v1450_v17 = vld [vmem:[#allocation8] sm:$0xff] }
 0x254   :  { %v1098_v20 = vsel %vm1095_vm7, %v1097_v18, %v1093_v19  ;;  %1628 = vmatpush.msra.mxu2 %v1471_v35  ;;  %v1455_v16 = vld [vmem:[#allocation8 + $0x28] sm:$0xff]  ;;  %v1518_v51 = vld [vmem:[#allocation8 + $0x220] sm:$0xff] }
 0x255   :  { %v1103_v21 = vsub.f32 1.0, %v1098_v20  ;;  %v1105_v24 = vmul.f32 %v1098_v20, %v3034_v58  ;;  %v1494_v58 = vld [vmem:[#allocation8 + $0x160] sm:$0xff]  ;;  %v1451_v18 = vld [vmem:[#allocation8 + $0x8] sm:$0xff]  ;;  %v1512_v20 = vld [vmem:[#allocation8 + $0x1f0] sm:$0xff] }
 0x256   :  { %1582 = vmatpush.msra.mxu0 %v1494_v58  ;;  %1629 = vmatpush.msra.mxu2 %v1467_v27  ;;  %v1519_v19 = vld [vmem:[#allocation8 + $0x228] sm:$0xff]  ;;  %v1573_v58 = vld [vmem:[#allocation8 + $0x3d8] sm:$0xff] }
 0x257   :  { %v1481_v27 = vld [vmem:[#allocation8 + $0xf8] sm:$0xff] }
 0x258   :  { %1583 = vmatpush.msra.mxu0 %v1490_v4  ;;  %1630 = vmatpush.msra.mxu2 %v1463_v53  ;;  %v1501_v4 = vld [vmem:[#allocation8 + $0x198] sm:$0xff]  ;;  %v1544_v53 = vld [vmem:[#allocation8 + $0x2f0] sm:$0xff] }
 0x259   :  { %v1853_v22 = vpop.eup %1852 }
 0x25a   :  { %v1104_v23 = vmul.f32 %v1853_v22, %v1103_v21  ;;  %1584 = vmatpush.msra.mxu0 %v1486_v9  ;;  %1631 = vmatpush.msra.mxu2 %v1459_v14  ;;  %v1513_v21 = vld [vmem:[#allocation8 + $0x1f8] sm:$0xff]  ;;  %v1514_v22 = vld [vmem:[#allocation8 + $0x200] sm:$0xff]  ;;  %v1472_v14 = vld [vmem:[#allocation8 + $0xb0] sm:$0xff] }
 0x25b   :  { %v1497_v9 = vld [vmem:[#allocation8 + $0x178] sm:$0xff] }
 0x25c   :  { %v3158_v25 = vadd.f32 %v1105_v24, %v1104_v23  ;;  %1585 = vmatpush.msra.mxu0 %v1482_v55  ;;  %1632 = vmatpush.msra.mxu2 %v1455_v16  ;;  %v1515_v23 = vld [vmem:[#allocation8 + $0x208] sm:$0xff]  ;;  %v1508_v24 = vld [vmem:[#allocation8 + $0x1d0] sm:$0xff]  ;;  %v1541_v16 = vld [vmem:[#allocation8 + $0x2d8] sm:$0xff] }
 0x25d   :  { %v1560_v55 = vld [vmem:[#allocation8 + $0x370] sm:$0xff] }
 0x25e   :  { %1806 = vst [vmem:[%s3206_s5 + $0x2] sm:$0x1] %v3158_v25  ;;  %1276 = vmatmul.f32.vlgmr.msra.gmra.mxu1 %v3158_v25  ;;  %1316 = vmatmul.f32.vlgmr.msra.gmra.mxu3 %v3158_v25 }
 0x25f   :  { %1598 = vmatpush.msra.mxu1 %v1574_v28  ;;  %1638 = vmatpush.msra.mxu3 %v1575_v34  ;;  %v1576_v28 = vld [vmem:[#allocation8 + $0x3f0] sm:$0xff]  ;;  %v1509_v34 = vld [vmem:[#allocation8 + $0x1d8] sm:$0xff] }
 0x260   :  { %1586 = vmatpush.msra.mxu0 %v1478_v15  ;;  %1633 = vmatpush.msra.mxu2 %v1451_v18  ;;  %v1297_v15 = vpop.f32.mrf.mxu2 }
 0x261   :  { %1599 = vmatpush.msra.mxu1 %v1570_v41  ;;  %1639 = vmatpush.msra.mxu3 %v1571_v43  ;;  %v1577_v41 = vld [vmem:[#allocation8 + $0x3f8] sm:$0xff]  ;;  %v1504_v43 = vld [vmem:[#allocation8 + $0x1b0] sm:$0xff]  ;;  %v1298_v35 = vadd.f32 %v1297_v15, %v3669_v62 }
 0x262   :  { %1587 = vmatpush.msra.mxu0 %v1474_v6  ;;  %1698 = vmatpush.msrb.mxu2 %v1513_v21 }
 0x263   :  { %1600 = vmatpush.msra.mxu1 %v1566_v45  ;;  %1640 = vmatpush.msra.mxu3 %v1567_v49  ;;  %v1572_v45 = vld [vmem:[#allocation8 + $0x3d0] sm:$0xff]  ;;  %v1505_v49 = vld [vmem:[#allocation8 + $0x1b8] sm:$0xff] }
 0x264   :  { %1588 = vmatpush.msra.mxu0 %v1470_v26  ;;  %1699 = vmatpush.msrb.mxu2 %v1509_v34  ;;  %v1485_v26 = vld [vmem:[#allocation8 + $0x118] sm:$0xff]  ;;  %v1460_v34 = vld [vmem:[#allocation8 + $0x50] sm:$0xff] }
 0x265   :  { %1601 = vmatpush.msra.mxu1 %v1562_v50  ;;  %1641 = vmatpush.msra.mxu3 %v1563_v3  ;;  %v1257_v50 = vpop.f32.mrf.mxu0  ;;  %v1568_v3 = vld [vmem:[#allocation8 + $0x3b0] sm:$0xff] }
 0x266   :  { %1356 = vmatmul.f32.vlgmr.msrb.gmra.mxu1 %v3158_v25  ;;  %1396 = vmatmul.f32.vlgmr.msrb.gmra.mxu3 %v3158_v25 }
 0x267   :  { %1602 = vmatpush.msra.mxu1 %v1558_v5  ;;  %1642 = vmatpush.msra.mxu3 %v1559_v8  ;;  %v1569_v5 = vld [vmem:[#allocation8 + $0x3b8] sm:$0xff]  ;;  %v1564_v8 = vld [vmem:[#allocation8 + $0x390] sm:$0xff] }
 0x268   :  { %1589 = vmatpush.msra.mxu0 %v1466_v37  ;;  %1700 = vmatpush.msrb.mxu2 %v1505_v49  ;;  %v1480_v37 = vld [vmem:[#allocation8 + $0xf0] sm:$0xff] }
 0x269   :  { %1603 = vmatpush.msra.mxu1 %v1554_v33  ;;  %1643 = vmatpush.msra.mxu3 %v1555_v63  ;;  %v1258_v33 = vadd.f32 %v1257_v50, %v3668_v39  ;;  %v1492_v63 = vld [vmem:[#allocation8 + $0x150] sm:$0xff] }
 0x26a   :  { %1590 = vmatpush.msra.mxu0 %v1462_v47  ;;  %1701 = vmatpush.msrb.mxu2 %v1501_v4  ;;  %v1456_v49 = vld [vmem:[#allocation8 + $0x30] sm:$0xff] }
 0x26b   :  { %1604 = vmatpush.msra.mxu1 %v1550_v48  ;;  %1644 = vmatpush.msra.mxu3 %v1551_v42  ;;  %v1493_v48 = vld [vmem:[#allocation8 + $0x158] sm:$0xff] }
 0x26c   :  { %1591 = vmatpush.msra.mxu0 %v1458_v60  ;;  %1702 = vmatpush.msrb.mxu2 %v1497_v9  ;;  %v1521_v9 = vld [vmem:[#allocation8 + $0x238] sm:$0xff] }
 0x26d   :  { %1605 = vmatpush.msra.mxu1 %v1546_v12  ;;  %1645 = vmatpush.msra.mxu3 %v1547_v0  ;;  %v1488_v12 = vld [vmem:[#allocation8 + $0x130] sm:$0xff]  ;;  %v1489_v0 = vld [vmem:[#allocation8 + $0x138] sm:$0xff] }
 0x26e   :  { %1592 = vmatpush.msra.mxu0 %v1454_v54  ;;  %1703 = vmatpush.msrb.mxu2 %v1493_v48  ;;  %v1473_v54 = vld [vmem:[#allocation8 + $0xb8] sm:$0xff]  ;;  %v1377_v48 = vpop.f32.mrf.mxu2 }
 0x26f   :  { %1606 = vmatpush.msra.mxu1 %v1542_v30  ;;  %1646 = vmatpush.msra.mxu3 %v1543_v40  ;;  %v1557_v30 = vld [vmem:[#allocation8 + $0x358] sm:$0xff]  ;;  %v1552_v40 = vld [vmem:[#allocation8 + $0x330] sm:$0xff] }
 0x270   :  { %1593 = vmatpush.msra.mxu0 %v1450_v17  ;;  %1704 = vmatpush.msrb.mxu2 %v1489_v0  ;;  %v1536_v17 = vld [vmem:[#allocation8 + $0x2b0] sm:$0xff] }
 0x271   :  { %1607 = vmatpush.msra.mxu1 %v1538_v32  ;;  %1647 = vmatpush.msra.mxu3 %v1539_v29  ;;  %v1553_v29 = vld [vmem:[#allocation8 + $0x338] sm:$0xff] }
 0x272   :  { %1658 = vmatpush.msrb.mxu0 %v1512_v20  ;;  %1705 = vmatpush.msrb.mxu2 %v1485_v26  ;;  %v1449_v20 = vld [vmem:[%s1448_s30] sm:$0x1] }
 0x273   :  { %1608 = vmatpush.msra.mxu1 %v1534_v38  ;;  %1648 = vmatpush.msra.mxu3 %v1535_v46  ;;  %v1548_v38 = vld [vmem:[#allocation8 + $0x310] sm:$0xff]  ;;  %v1549_v46 = vld [vmem:[#allocation8 + $0x318] sm:$0xff] }
 0x274   :  { %1659 = vmatpush.msrb.mxu0 %v1508_v24  ;;  %1706 = vmatpush.msrb.mxu2 %v1481_v27  ;;  %v1465_v24 = vld [vmem:[#allocation8 + $0x78] sm:$0xff] }
 0x275   :  { %1609 = vmatpush.msra.mxu1 %v1530_v61  ;;  %1649 = vmatpush.msra.mxu3 %v1531_v59  ;;  %v1476_v61 = vld [vmem:[#allocation8 + $0xd0] sm:$0xff]  ;;  %v1477_v59 = vld [vmem:[#allocation8 + $0xd8] sm:$0xff] }
 0x276   :  { %1660 = vmatpush.msrb.mxu0 %v1504_v43  ;;  %1707 = vmatpush.msrb.mxu2 %v1477_v59  ;;  %v1461_v43 = vld [vmem:[#allocation8 + $0x58] sm:$0xff] }
 0x277   :  { %1610 = vmatpush.msra.mxu1 %v1526_v13  ;;  %1650 = vmatpush.msra.mxu3 %v1527_v56  ;;  %v1545_v13 = vld [vmem:[#allocation8 + $0x2f8] sm:$0xff]  ;;  %v1540_v56 = vld [vmem:[#allocation8 + $0x2d0] sm:$0xff] }
 0x278   :  { %1661 = vmatpush.msrb.mxu0 %v1500_v1  ;;  %1708 = vmatpush.msrb.mxu2 %v1473_v54  ;;  %v1457_v1 = vld [vmem:[#allocation8 + $0x38] sm:$0xff] }
 0x279   :  { %1611 = vmatpush.msra.mxu1 %v1522_v57  ;;  %1651 = vmatpush.msra.mxu3 %v1523_v52  ;;  %v1468_v52 = vld [vmem:[#allocation8 + $0x90] sm:$0xff] }
 0x27a   :  { %1662 = vmatpush.msrb.mxu0 %v1496_v7  ;;  %1634 = vmatmul.f32.vlgmr.msra.gmra.mxu2 %v1449_v20  ;;  %v1520_v7 = vld [vmem:[#allocation8 + $0x230] sm:$0xff] }
 0x27b   :  { %1612 = vmatpush.msra.mxu1 %v1518_v51  ;;  %1652 = vmatpush.msra.mxu3 %v1519_v19  ;;  %v1469_v51 = vld [vmem:[#allocation8 + $0x98] sm:$0xff] }
 0x27c   :  { %1663 = vmatpush.msrb.mxu0 %v1492_v63  ;;  %v1537_v19 = vld [vmem:[#allocation8 + $0x2b8] sm:$0xff]  ;;  %1709 = vmatpush.msrb.mxu2 %v1469_v51  ;;  %v1516_v63 = vld [vmem:[#allocation8 + $0x210] sm:$0xff] }
 0x27d   :  { %1613 = vmatpush.msra.mxu1 %v1514_v22  ;;  %1653 = vmatpush.msra.mxu3 %v1515_v23  ;;  %v1464_v22 = vld [vmem:[#allocation8 + $0x70] sm:$0xff] }
 0x27e   :  { %1664 = vmatpush.msrb.mxu0 %v1488_v12  ;;  %v1532_v23 = vld [vmem:[#allocation8 + $0x290] sm:$0xff]  ;;  %1710 = vmatpush.msrb.mxu2 %v1465_v24  ;;  %v1378_v12 = vadd.f32 %v1377_v48, %v3670_v31 }
 0x27f   :  { %1678 = vmatpush.msrb.mxu1 %v1576_v28  ;;  %1718 = vmatpush.msrb.mxu3 %v1577_v41  ;;  %v1533_v28 = vld [vmem:[#allocation8 + $0x298] sm:$0xff]  ;;  %v1528_v41 = vld [vmem:[#allocation8 + $0x270] sm:$0xff] }
 0x280   :  { %1665 = vmatpush.msrb.mxu0 %v1484_v36  ;;  %1711 = vmatpush.msrb.mxu2 %v1461_v43 }
 0x281   :  { %1679 = vmatpush.msrb.mxu1 %v1572_v45  ;;  %1719 = vmatpush.msrb.mxu3 %v1573_v58  ;;  %v1529_v45 = vld [vmem:[#allocation8 + $0x278] sm:$0xff]  ;;  %v1524_v58 = vld [vmem:[#allocation8 + $0x250] sm:$0xff] }
 0x282   :  { %1666 = vmatpush.msrb.mxu0 %v1480_v37  ;;  %1712 = vmatpush.msrb.mxu2 %v1457_v1 }
 0x283   :  { %1680 = vmatpush.msrb.mxu1 %v1568_v3  ;;  %1720 = vmatpush.msrb.mxu3 %v1569_v5  ;;  %v1525_v3 = vld [vmem:[#allocation8 + $0x258] sm:$0xff]  ;;  %v1452_v5 = vld [vmem:[#allocation8 + $0x10] sm:$0xff] }
 0x284   :  { %1667 = vmatpush.msrb.mxu0 %v1476_v61 }
 0x285   :  { %1681 = vmatpush.msrb.mxu1 %v1564_v8  ;;  %1721 = vmatpush.msrb.mxu3 %v1565_v11  ;;  %v1453_v8 = vld [vmem:[#allocation8 + $0x18] sm:$0xff] }
 0x286   :  { %1668 = vmatpush.msrb.mxu0 %v1472_v14  ;;  %1713 = vmatpush.msrb.mxu2 %v1453_v8 }
 0x287   :  { %1682 = vmatpush.msrb.mxu1 %v1560_v55  ;;  %1722 = vmatpush.msrb.mxu3 %v1561_v10  ;;  %v1517_v55 = vld [vmem:[#allocation8 + $0x218] sm:$0xff]  ;;  %v1337_v10 = vpop.f32.mrf.mxu0 }
 0x288   :  { %1669 = vmatpush.msrb.mxu0 %v1468_v52  ;;  %1714 = vmatmul.f32.vlgmr.msrb.gmra.mxu2 %v1449_v20 }
 0x289   :  { %1683 = vmatpush.msrb.mxu1 %v1556_v2  ;;  %1723 = vmatpush.msrb.mxu3 %v1557_v30  ;;  %v1338_v30 = vadd.f32 %v1337_v10, %v3671_v44 }
 0x28a   :  { %1594 = vmatmul.f32.vlgmr.msra.gmra.mxu0 %v1449_v20 }
 0x28b   :  { %1684 = vmatpush.msrb.mxu1 %v1552_v40  ;;  %1724 = vmatpush.msrb.mxu3 %v1553_v29 }
 0x28c   :  { %1670 = vmatpush.msrb.mxu0 %v1464_v22 }
 0x28d   :  { %1685 = vmatpush.msrb.mxu1 %v1548_v38  ;;  %1725 = vmatpush.msrb.mxu3 %v1549_v46 }
 0x28e   :  { %1671 = vmatpush.msrb.mxu0 %v1460_v34 }
 0x28f   :  { %1686 = vmatpush.msrb.mxu1 %v1544_v53  ;;  %1726 = vmatpush.msrb.mxu3 %v1545_v13 }
 0x290   :  { %1672 = vmatpush.msrb.mxu0 %v1456_v49 }
 0x291   :  { %1687 = vmatpush.msrb.mxu1 %v1540_v56  ;;  %1727 = vmatpush.msrb.mxu3 %v1541_v16 }
 0x292   :  { %1673 = vmatpush.msrb.mxu0 %v1452_v5 }
 0x293   :  { %1688 = vmatpush.msrb.mxu1 %v1536_v17  ;;  %1728 = vmatpush.msrb.mxu3 %v1537_v19 }
 0x294   :  { %1674 = vmatmul.f32.vlgmr.msrb.gmra.mxu0 %v1449_v20 }
 0x295   :  { %1689 = vmatpush.msrb.mxu1 %v1532_v23  ;;  %1729 = vmatpush.msrb.mxu3 %v1533_v28 }
 0x297   :  { %1690 = vmatpush.msrb.mxu1 %v1528_v41  ;;  %1730 = vmatpush.msrb.mxu3 %v1529_v45 }
 0x299   :  { %1691 = vmatpush.msrb.mxu1 %v1524_v58  ;;  %1731 = vmatpush.msrb.mxu3 %v1525_v3 }
 0x29b   :  { %1692 = vmatpush.msrb.mxu1 %v1520_v7  ;;  %1732 = vmatpush.msrb.mxu3 %v1521_v9 }
 0x29d   :  { %1693 = vmatpush.msrb.mxu1 %v1516_v63  ;;  %1733 = vmatpush.msrb.mxu3 %v1517_v55 }
 0x2db   :  { %v1277_v42 = vpop.f32.mrf.mxu1 }
 0x2dc   :  { %v1278_v6 = vadd.f32 %v1277_v42, %v1258_v33 }
 0x2de   :  { %v1808_v32 = vmul.f32 -1.442695, %v1278_v6 }
 0x2e0   :  { %1854 = vpow2.f32 %v1808_v32 }
 0x2e1   :  { %v1317_v47 = vpop.f32.mrf.mxu3 }
 0x2e2   :  { %v1318_v60 = vadd.f32 %v1317_v47, %v1298_v35 }
 0x2e3   :  { %v1357_v26 = vpop.f32.mrf.mxu1 }
 0x2e4   :  { %v1809_v57 = vmul.f32 -1.442695, %v1318_v60  ;;  %v1358_v27 = vadd.f32 %v1357_v26, %v1338_v30 }
 0x2e6   :  { %v1855_v18 = vpop.eup %1854  ;;  %1856 = vpow2.f32 %v1809_v57 }
 0x2e7   :  { %v3173_v21 = vadd.f32 1.0, %v1855_v18 }
 0x2e9   :  { %1858 = vrcp.f32 %v3173_v21  ;;  %v1415_v15 = vand.u32 2147483648, %v3173_v21  ;;  %v1413_v0 = vand.u32 2147483647, %v3173_v21  ;;  %v1397_v36 = vpop.f32.mrf.mxu3  ;;  %vm1409_vm9 = vweird.f32 %v3173_v21 }
 0x2ea   :  { %v1398_v37 = vadd.f32 %v1397_v36, %v1378_v12 }
 0x2eb   :  { %v1416_v35 = vor.u32 1.1754944e-38, %v1415_v15  ;;  %vm1414_vm11 = vcmp.eq.f32.partialorder %v1413_v0, 8.507059e+37 }
 0x2ec   :  { %v1857_v50 = vpop.eup %1856 }
 0x2ed   :  { %v1422_v4 = vadd.f32 1.0, %v1857_v50 }
 0x2ef   :  { %v1859_v33 = vpop.eup %1858  ;;  %1860 = vrcp.f32 %v1422_v4  ;;  %v1434_v61 = vand.u32 2147483648, %v1422_v4  ;;  %v1432_v59 = vand.u32 2147483647, %v1422_v4  ;;  %vm1428_vm13 = vweird.f32 %v1422_v4 }
 0x2f0   :  { %v1405_v11 = vmul.f32 %v1859_v33, %v3173_v21  ;;  %vm1410_vm8 = vweird.f32 %v1859_v33 }
 0x2f1   :  { %vm1411_vm10 = vmor %vm1409_vm9, %vm1410_vm8  ;;  %v1435_v14 = vor.u32 1.1754944e-38, %v1434_v61  ;;  %vm1433_vm15 = vcmp.eq.f32.partialorder %v1432_v59, 8.507059e+37 }
 0x2f2   :  { %v1406_v42 = vsub.f32 1.0, %v1405_v11 }
 0x2f4   :  { %v1407_v2 = vmul.f32 %v1859_v33, %v1406_v42 }
 0x2f5   :  { %v1861_v6 = vpop.eup %1860 }
 0x2f6   :  { %v1424_v40 = vmul.f32 %v1861_v6, %v1422_v4  ;;  %v1408_v32 = vadd.f32 %v1859_v33, %v1407_v2  ;;  %vm1429_vm12 = vweird.f32 %v1861_v6 }
 0x2f7   :  { %vm1430_vm14 = vmor %vm1428_vm13, %vm1429_vm12 }
 0x2f8   :  { %v1425_v29 = vsub.f32 1.0, %v1424_v40  ;;  %v1412_v38 = vsel %vm1411_vm10, %v1859_v33, %v1408_v32 }
 0x2f9   :  { %v1417_v46 = vsel %vm1414_vm11, %v1416_v35, %v1412_v38 }
 0x2fa   :  { %v1426_v47 = vmul.f32 %v1861_v6, %v1425_v29  ;;  %v1438_v53 = vmul.f32 %v1417_v46, %v1398_v37 }
 0x2fc   :  { %v1427_v60 = vadd.f32 %v1861_v6, %v1426_v47  ;;  %v1439_v13 = vadd.f32 %v1438_v53, %v1358_v27 }
 0x2fe   :  { %v1431_v56 = vsel %vm1430_vm14, %v1861_v6, %v1427_v60  ;;  %1862 = vtanh.f32 %v1439_v13 }
 0x2ff   :  { %v1436_v54 = vsel %vm1433_vm15, %v1435_v14, %v1431_v56 }
 0x300   :  { %v1441_v57 = vsub.f32 1.0, %v1436_v54  ;;  %v1443_v17 = vmul.f32 %v1436_v54, %v3158_v25  ;;  %v1635_v25 = vpop.f32.mrf.mxu2 }
 0x301   :  { %v1636_v23 = vadd.f32 %v1635_v25, %v3669_v62 }
 0x304   :  { %v1863_v16 = vpop.eup %1862 }
 0x305   :  { %v1442_v52 = vmul.f32 %v1863_v16, %v1441_v57 }
 0x307   :  { %v3183_v51 = vadd.f32 %v1443_v17, %v1442_v52  ;;  %v1595_v18 = vpop.f32.mrf.mxu0 }
 0x308   :  { %v1596_v19 = vadd.f32 %v1595_v18, %v3668_v39 }
 0x309   :  { %1810 = vst [vmem:[%s3206_s5 + $0x3] sm:$0x1] %v3183_v51  ;;  %1614 = vmatmul.f32.vlgmr.msra.gmra.mxu1 %v3183_v51  ;;  %1654 = vmatmul.f32.vlgmr.msra.gmra.mxu3 %v3183_v51 }
 0x30b   :  { %v1715_v39 = vpop.f32.mrf.mxu2 }
 0x30c   :  { %v1716_v5 = vadd.f32 %v1715_v39, %v3670_v31 }
 0x311   :  { %1694 = vmatmul.f32.vlgmr.msrb.gmra.mxu1 %v3183_v51  ;;  %1734 = vmatmul.f32.vlgmr.msrb.gmra.mxu3 %v3183_v51  ;;  %v1675_v1 = vpop.f32.mrf.mxu0 }
 0x312   :  { %v1676_v9 = vadd.f32 %v1675_v1, %v3671_v44 }
 0x386   :  { %v1615_v20 = vpop.f32.mrf.mxu1 }
 0x387   :  { %v1616_v21 = vadd.f32 %v1615_v20, %v1596_v19 }
 0x389   :  { %v1812_v22 = vmul.f32 -1.442695, %v1616_v21 }
 0x38b   :  { %1864 = vpow2.f32 %v1812_v22 }
 0x38c   :  { %v1655_v24 = vpop.f32.mrf.mxu3 }
 0x38d   :  { %v1656_v28 = vadd.f32 %v1655_v24, %v1636_v23 }
 0x38e   :  { %v1695_v63 = vpop.f32.mrf.mxu1 }
 0x38f   :  { %v1813_v34 = vmul.f32 -1.442695, %v1656_v28  ;;  %v1696_v12 = vadd.f32 %v1695_v63, %v1676_v9 }
 0x391   :  { %v1865_v41 = vpop.eup %1864  ;;  %1866 = vpow2.f32 %v1813_v34 }
 0x392   :  { %v1741_v43 = vadd.f32 1.0, %v1865_v41 }
 0x394   :  { %1868 = vrcp.f32 %v1741_v43  ;;  %v1753_v4 = vand.u32 2147483648, %v1741_v43  ;;  %v1751_v7 = vand.u32 2147483647, %v1741_v43  ;;  %v1735_v33 = vpop.f32.mrf.mxu3  ;;  %vm1747_vm1 = vweird.f32 %v1741_v43 }
 0x395   :  { %v1736_v42 = vadd.f32 %v1735_v33, %v1716_v5 }
 0x396   :  { %v1754_v48 = vor.u32 1.1754944e-38, %v1753_v4  ;;  %vm1752_vm3 = vcmp.eq.f32.partialorder %v1751_v7, 8.507059e+37 }
 0x397   :  { %v1867_v45 = vpop.eup %1866 }
 0x398   :  { %v1760_v49 = vadd.f32 1.0, %v1867_v45 }
 0x39a   :  { %v1869_v58 = vpop.eup %1868  ;;  %1870 = vrcp.f32 %v1760_v49  ;;  %v1772_v0 = vand.u32 2147483648, %v1760_v49  ;;  %v1770_v30 = vand.u32 2147483647, %v1760_v49  ;;  %vm1766_vm5 = vweird.f32 %v1760_v49 }
 0x39b   :  { %v1743_v50 = vmul.f32 %v1869_v58, %v1741_v43  ;;  %vm1748_vm0 = vweird.f32 %v1869_v58 }
 0x39c   :  { %vm1749_vm2 = vmor %vm1747_vm1, %vm1748_vm0  ;;  %v1773_v40 = vor.u32 1.1754944e-38, %v1772_v0  ;;  %vm1771_vm7 = vcmp.eq.f32.partialorder %v1770_v30, 8.507059e+37 }
 0x39d   :  { %v1744_v3 = vsub.f32 1.0, %v1743_v50 }
 0x39f   :  { %v1745_v62 = vmul.f32 %v1869_v58, %v1744_v3 }
 0x3a0   :  { %v1871_v8 = vpop.eup %1870 }
 0x3a1   :  { %v1762_v11 = vmul.f32 %v1871_v8, %v1760_v49  ;;  %v1746_v55 = vadd.f32 %v1869_v58, %v1745_v62  ;;  %vm1767_vm4 = vweird.f32 %v1871_v8 }
 0x3a2   :  { %vm1768_vm6 = vmor %vm1766_vm5, %vm1767_vm4 }
 0x3a3   :  { %v1763_v10 = vsub.f32 1.0, %v1762_v11  ;;  %v1750_v15 = vsel %vm1749_vm2, %v1869_v58, %v1746_v55 }
 0x3a4   :  { %v1755_v2 = vsel %vm1752_vm3, %v1754_v48, %v1750_v15 }
 0x3a5   :  { %v1764_v31 = vmul.f32 %v1871_v8, %v1763_v10  ;;  %v1776_v6 = vmul.f32 %v1755_v2, %v1736_v42 }
 0x3a7   :  { %v1765_v36 = vadd.f32 %v1871_v8, %v1764_v31  ;;  %v1777_v44 = vadd.f32 %v1776_v6, %v1696_v12 }
 0x3a9   :  { %v1769_v26 = vsel %vm1768_vm6, %v1871_v8, %v1765_v36  ;;  %1872 = vtanh.f32 %v1777_v44 }
 0x3aa   :  { %v1774_v32 = vsel %vm1771_vm7, %v1773_v40, %v1769_v26 }
 0x3ab   :  { %v1779_v35 = vsub.f32 1.0, %v1774_v32  ;;  %v1781_v38 = vmul.f32 %v1774_v32, %v3183_v51 }
 0x3af   :  { %v1873_v29 = vpop.eup %1872 }
 0x3b0   :  { %v1780_v37 = vmul.f32 %v1873_v29, %v1779_v35 }
 0x3b2   :  { %v1782_v27 = vadd.f32 %v1781_v38, %v1780_v37 }
 0x3b4   :  { %1814 = vst [vmem:[%s3206_s5 + $0x4] sm:$0x1] %v1782_v27 }
 0x3b5   :  { %1789 = vsyncpa [#allocation5], 1 }
 0x3b6   :  { %1790 = vsyncpa [#allocation7], 1 }
 0x3b7   :  { %1791 = vsyncpa [#allocation10], 1 }

</bundles_post_ra>
